<compile_context>
chip_gen: v7x
topology: tpu7x:2x2x1
jax: 0.10.0
libtpu: 0.0.40
codegen_flags: <defaults>
</compile_context>

<pallas_src>
import jax
import jax.numpy as jnp
import numpy as np
from jax.experimental import pallas as pl
from jax.experimental.pallas import tpu as pltpu

T_BLK_MAX = 16  # timesteps processed per sequential grid step


def _rup(n, m):
    return ((n + m - 1) // m) * m


# --------------------------------------------------------------------------
# Kernel 1: blocked LSTM recurrence (sequential grid, h/c carried in VMEM).
# --------------------------------------------------------------------------
def _lstm_kernel(x_ref, w_ref, b_ref, h_out_ref, xh_ref, c_ref):
    """Processes x_ref.shape[0] timesteps per grid step.

    x_ref    : (T_blk, B, E)   timestep inputs (weight dtype, e.g. bf16)
    w_ref    : (E+H, 4H)       fused [w_ih; w_hh] (pre-transposed, padded)
    b_ref    : (1, 4H)         combined bias b_ih + b_hh (f32)
    h_out_ref: (T_blk, B, H)   hidden states (f32)
    xh_ref   : (B, E+H)        scratch holding [x_t | h_{t-1}] in weight dtype
    c_ref    : (B, H)          cell state scratch (f32)
    """
    @pl.when(pl.program_id(0) == 0)
    def _():
        xh_ref[...] = jnp.zeros_like(xh_ref)
        c_ref[...] = jnp.zeros_like(c_ref)

    e_p = x_ref.shape[-1]
    h_p = c_ref.shape[-1]
    t_blk = x_ref.shape[0]

    def step(i, carry):
        xh_ref[:, :e_p] = x_ref[i]
        # Single fused MXU matmul for all four gates (f32 accumulation).
        gates = (jnp.dot(xh_ref[...], w_ref[...],
                         preferred_element_type=jnp.float32) + b_ref[...])
        # PyTorch LSTM gate ordering: input, forget, cell(g), output.
        # Slices are 128-lane aligned because h_p is a multiple of 128.
        i_g = jax.nn.sigmoid(gates[:, 0 * h_p:1 * h_p])
        f_g = jax.nn.sigmoid(gates[:, 1 * h_p:2 * h_p])
        g_g = jnp.tanh(gates[:, 2 * h_p:3 * h_p])
        o_g = jax.nn.sigmoid(gates[:, 3 * h_p:4 * h_p])
        c_new = f_g * c_ref[...] + i_g * g_g
        h_new = o_g * jnp.tanh(c_new)
        c_ref[...] = c_new
        xh_ref[:, e_p:] = h_new.astype(xh_ref.dtype)   # feed back (weight dtype)
        h_out_ref[i] = h_new.astype(h_out_ref.dtype)   # keep state output in f32
        return carry

    jax.lax.fori_loop(0, t_blk, step, 0, unroll=True)


def _run_lstm(x, w_cat, bias, t_blk):
    S_p, B_p, E_p = x.shape
    K, four_h_p = w_cat.shape
    H_p = four_h_p // 4
    n_blocks = S_p // t_blk

    cost = pl.CostEstimate(
        flops=int(2 * S_p * B_p * K * four_h_p),
        transcendentals=int(5 * S_p * B_p * H_p),
        bytes_accessed=int(x.size * x.dtype.itemsize
                           + w_cat.size * w_cat.dtype.itemsize
                           + bias.size * bias.dtype.itemsize
                           + S_p * B_p * H_p * 4))

    return pl.pallas_call(
        _lstm_kernel,
        out_shape=jax.ShapeDtypeStruct((S_p, B_p, H_p), jnp.float32),
        grid_spec=pltpu.PrefetchScalarGridSpec(
            num_scalar_prefetch=0,
            grid=(n_blocks,),
            in_specs=[
                pl.BlockSpec((t_blk, B_p, E_p), lambda t: (t, 0, 0)),
                # Grid-invariant weights/bias (index_map is constant).
                pl.BlockSpec((K, four_h_p), lambda t: (0, 0)),
                pl.BlockSpec((1, four_h_p), lambda t: (0, 0)),
            ],
            out_specs=pl.BlockSpec((t_blk, B_p, H_p), lambda t: (t, 0, 0)),
            scratch_shapes=[
                pltpu.VMEM((B_p, K), x.dtype),        # [x_t | h] fused operand
                pltpu.VMEM((B_p, H_p), jnp.float32),  # c state
            ],
        ),
        compiler_params=pltpu.CompilerParams(
            dimension_semantics=("arbitrary",)),  # recurrence => sequential
        cost_estimate=cost,
    )(x, w_cat, bias)


# --------------------------------------------------------------------------
# Kernel 2: batched output projection (grid-parallel over rows and vocab).
# --------------------------------------------------------------------------
def _proj_kernel(h_ref, w_ref, b_ref, o_ref):
    o_ref[...] = (jnp.dot(h_ref[...].astype(w_ref.dtype), w_ref[...],
                          preferred_element_type=jnp.float32) + b_ref[...])


def _run_projection(h2d, w_out, b_out, tm):
    M, H_p = h2d.shape
    _, V_p = w_out.shape
    tn = max(t for t in (512, 256, 128) if V_p % t == 0)
    while tm > 1024 and tm % 2 == 0:   # keep row tiles moderate; still divides M
        tm //= 2

    cost = pl.CostEstimate(
        flops=int(2 * M * H_p * V_p),
        transcendentals=0,
        bytes_accessed=int(h2d.size * h2d.dtype.itemsize
                           + w_out.size * w_out.dtype.itemsize
                           + b_out.size * b_out.dtype.itemsize
                           + M * V_p * 4))

    return pl.pallas_call(
        _proj_kernel,
        out_shape=jax.ShapeDtypeStruct((M, V_p), jnp.float32),
        grid_spec=pltpu.PrefetchScalarGridSpec(
            num_scalar_prefetch=0,
            grid=(M // tm, V_p // tn),
            in_specs=[
                pl.BlockSpec((tm, H_p), lambda i, j: (i, 0)),
                pl.BlockSpec((H_p, tn), lambda i, j: (0, j)),
                pl.BlockSpec((1, tn), lambda i, j: (0, j)),
            ],
            out_specs=pl.BlockSpec((tm, tn), lambda i, j: (i, j)),
        ),
        compiler_params=pltpu.CompilerParams(
            dimension_semantics=("parallel", "parallel")),  # megacore on v7x
        cost_estimate=cost,
    )(h2d, w_out, b_out)


# --------------------------------------------------------------------------
# Parameter preparation (fuse / transpose / pad / cast) + forward wrapper.
# --------------------------------------------------------------------------
def _prepare_kernel_params(params, weight_dtype):
    w_ih, w_hh = params["w_ih"], params["w_hh"]        # (4H, E), (4H, H)
    w_out, b_out = params["w_out"], params["b_out"]    # (V, H), (V,)
    E = w_ih.shape[1]
    H = w_hh.shape[1]
    V = w_out.shape[0]
    E_p, H_p, V_p = _rup(E, 128), _rup(H, 128), _rup(V, 128)

    # Fused gate weight: rows [x-features | h-features], columns [i|f|g|o],
    # each gate padded to H_p so gate slices are 128-lane aligned.
    wi = jnp.pad(w_ih.reshape(4, H, E).transpose(0, 2, 1),
                 ((0, 0), (0, E_p - E), (0, H_p - H)))          # (4, E_p, H_p)
    wh = jnp.pad(w_hh.reshape(4, H, H).transpose(0, 2, 1),
                 ((0, 0), (0, H_p - H), (0, H_p - H)))          # (4, H_p, H_p)
    w_cat = jnp.concatenate([wi, wh], axis=1)                   # (4, E_p+H_p, H_p)
    w_cat = jnp.transpose(w_cat, (1, 0, 2)).reshape(E_p + H_p, 4 * H_p)
    w_cat = w_cat.astype(weight_dtype)

    bias = jnp.pad((params["b_ih"] + params["b_hh"]).reshape(4, H),
                   ((0, 0), (0, H_p - H))).reshape(1, 4 * H_p).astype(jnp.float32)

    w_out_p = jnp.pad(w_out.T, ((0, H_p - H), (0, V_p - V))).astype(weight_dtype)
    b_out_p = jnp.pad(b_out, (0, V_p - V)).reshape(1, V_p).astype(jnp.float32)

    return {"w_cat": w_cat, "bias": bias, "w_out": w_out_p, "b_out": b_out_p,
            "dims": (E, H, V, E_p, H_p, V_p)}


def decoder_rnn_forward(params, features, captions, *, weight_dtype=jnp.bfloat16):
    """Pallas equivalent of DecoderRNN.forward.

    features : (B, E) float32
    captions : (B, T) int32
    returns  : (B, T+1, V) float32 logits
    """
    B = features.shape[0]
    S = captions.shape[1] + 1
    kp = _prepare_kernel_params(params, weight_dtype)
    E, H, V, E_p, H_p, V_p = kp["dims"]

    emb = jnp.take(params["embed"], captions, axis=0)            # (B, T, E)  glue
    x = jnp.concatenate([features[:, None, :], emb], axis=1)     # (B, S, E)

    # Pad batch to sublane multiple, E to lane multiple, block the time axis.
    B_p = _rup(B, 8)
    t_blk = min(S, T_BLK_MAX)
    S_p = _rup(S, t_blk)
    x_tm = jnp.transpose(x, (1, 0, 2)).astype(weight_dtype)      # (S, B, E)
    x_p = jnp.pad(x_tm, ((0, S_p - S), (0, B_p - B), (0, E_p - E)))

    h_all = _run_lstm(x_p, kp["w_cat"], kp["bias"], t_blk)       # (S_p, B_p, H_p) f32
    logits = _run_projection(h_all.reshape(S_p * B_p, H_p),
                             kp["w_out"], kp["b_out"], tm=t_blk * B_p)
    logits = logits.reshape(S_p, B_p, V_p)[:S, :B, :V]
    return jnp.transpose(logits, (1, 0, 2))                      # (B, S, V)


def init_params(key, embed_size, hidden_size, vocab_size):
    """PyTorch-layout parameters: w_ih (4H,E), w_hh (4H,H), w_out (V,H)."""
    ks = jax.random.split(key, 7)
    H, E, V = hidden_size, embed_size, vocab_size
    s = 1.0 / np.sqrt(H)
    u = lambda k, shape: jax.random.uniform(k, shape, jnp.float32, -s, s)
    return {
        "embed": jax.random.normal(ks[0], (V, E), jnp.float32) * 0.1,
        "w_ih": u(ks[1], (4 * H, E)),
        "w_hh": u(ks[2], (4 * H, H)),
        "b_ih": u(ks[3], (4 * H,)),
        "b_hh": u(ks[4], (4 * H,)),
        "w_out": u(ks[5], (V, H)),
        "b_out": u(ks[6], (V,)),
    }


def _reference_forward(params, features, captions, weight_dtype=jnp.bfloat16):
    """Pure-JAX reference with the same mixed-precision contract."""
    H = params["w_hh"].shape[1]
    emb = jnp.take(params["embed"], captions, axis=0)
    x = jnp.concatenate([features[:, None, :], emb], axis=1)     # (B, S, E)
    B = x.shape[0]

    w_ih_t = params["w_ih"].T.astype(weight_dtype)
    w_hh_t = params["w_hh"].T.astype(weight_dtype)
    bias = (params["b_ih"] + params["b_hh"]).astype(jnp.float32)
    w_out_t = params["w_out"].T.astype(weight_dtype)
    b_out = params["b_out"]

    def step(carry, x_t):
        h, c = carry
        gates = (jnp.dot(x_t.astype(weight_dtype), w_ih_t,
                         preferred_element_type=jnp.float32)
                 + jnp.dot(h.astype(weight_dtype), w_hh_t,
                           preferred_element_type=jnp.float32) + bias)
        i = jax.nn.sigmoid(gates[:, 0 * H:1 * H])
        f = jax.nn.sigmoid(gates[:, 1 * H:2 * H])
        g = jnp.tanh(gates[:, 2 * H:3 * H])
        o = jax.nn.sigmoid(gates[:, 3 * H:4 * H])
        c = f * c + i * g
        h = o * jnp.tanh(c)
        y = jnp.dot(h.astype(weight_dtype), w_out_t,
                    preferred_element_type=jnp.float32) + b_out
        return (h, c), y

    init = (jnp.zeros((B, H), jnp.float32), jnp.zeros((B, H), jnp.float32))
    _, outs = jax.lax.scan(step, init, jnp.transpose(x, (1, 0, 2)))
    return jnp.transpose(outs, (1, 0, 2))


# TODO(synk): beam_search / sample (host-side Python decoding loops with top-k
# bookkeeping) are not translated; only forward() is implemented in Pallas.

if __name__ == "__main__":
    EMBED_SIZE, HIDDEN_SIZE, VOCAB_SIZE = 32, 32, 64
    BATCH, SEQ = 2, 8

    key = jax.random.PRNGKey(0)
    k_params, k_feat, k_cap = jax.random.split(key, 3)

    params = init_params(k_params, EMBED_SIZE, HIDDEN_SIZE, VOCAB_SIZE)
    features = jax.random.normal(k_feat, (BATCH, EMBED_SIZE), jnp.float32)
    captions = jax.random.randint(k_cap, (BATCH, SEQ), 0, VOCAB_SIZE, jnp.int32)

    out = jax.jit(decoder_rnn_forward)(params, features, captions)
    out = jax.block_until_ready(out)

    assert out.shape == (BATCH, SEQ + 1, VOCAB_SIZE), out.shape

    ref = _reference_forward(params, features, captions)
    np.testing.assert_allclose(np.asarray(out), np.asarray(ref),
                               rtol=2e-3, atol=2e-3)

    print("KERNEL_OK")
</pallas_src>

<mosaic_0001>
module attributes {stable_mosaic.version = 11 : i64} {
  func.func @_proj_kernel(%arg0: i32, %arg1: i32, %arg2: memref<72x128xf32, #tpu.memory_space<vmem>>, %arg3: memref<128x128xbf16, #tpu.memory_space<vmem>>, %arg4: memref<1x128xf32, #tpu.memory_space<vmem>>, %arg5: memref<72x128xf32, #tpu.memory_space<vmem>>) attributes {dimension_semantics = [#tpu.dimension_semantics<parallel>, #tpu.dimension_semantics<parallel>], iteration_bounds = array<i64: 1, 1>, scalar_prefetch = 0 : i64, scratch_operands = 0 : i64, tpu.core_type = #tpu.core_type<tc>, window_params = [{transform_indices = @transform_0, window_bounds = array<i64: 72, 128>}, {transform_indices = @transform_1, window_bounds = array<i64: 128, 128>}, {transform_indices = @transform_2, window_bounds = array<i64: 1, 128>}, {transform_indices = @transform_3, window_bounds = array<i64: 72, 128>}]} {
    %c0 = arith.constant 0 : index
    %c0_0 = arith.constant 0 : index
    %0 = vector.load %arg2[%c0, %c0_0] : memref<72x128xf32, #tpu.memory_space<vmem>>, vector<72x128xf32>
    %1 = arith.truncf %0 : vector<72x128xf32> to vector<72x128xbf16>
    %c0_1 = arith.constant 0 : index
    %c0_2 = arith.constant 0 : index
    %2 = vector.load %arg3[%c0_1, %c0_2] : memref<128x128xbf16, #tpu.memory_space<vmem>>, vector<128x128xbf16>
    %cst = arith.constant dense<0.000000e+00> : vector<72x128xf32>
    %3 = tpu.matmul %1, %2, %cst {dimension_numbers = #tpu.dot_dimension_numbers<[1], [0], [0], [1], [0, 0, 1, 1], [], []>} : vector<72x128xbf16>, vector<128x128xbf16>, vector<72x128xf32> -> vector<72x128xf32>
    %c0_3 = arith.constant 0 : index
    %c0_4 = arith.constant 0 : index
    %4 = vector.load %arg4[%c0_3, %c0_4] : memref<1x128xf32, #tpu.memory_space<vmem>>, vector<1x128xf32>
    %5 = vector.broadcast %4 : vector<1x128xf32> to vector<72x128xf32>
    %6 = arith.addf %3, %5 : vector<72x128xf32>
    %c0_5 = arith.constant 0 : index
    %c0_6 = arith.constant 0 : index
    %7 = vector.load %arg5[%c0_5, %c0_6] : memref<72x128xf32, #tpu.memory_space<vmem>>, vector<72x128xf32>
    tpu.vector_store %arg5[%c0_5, %c0_6], %6 {strides = array<i32>} : memref<72x128xf32, #tpu.memory_space<vmem>>, vector<72x128xf32>,
    return
  }
  func.func @transform_0(%arg0: i32, %arg1: i32) -> (i32, i32) {
    %c0_i32 = arith.constant 0 : i32
    %c0_i32_0 = arith.constant 0 : i32
    return %arg0, %c0_i32 : i32, i32
  }
  func.func @transform_1(%arg0: i32, %arg1: i32) -> (i32, i32) {
    %c0_i32 = arith.constant 0 : i32
    %c0_i32_0 = arith.constant 0 : i32
    return %c0_i32, %arg1 : i32, i32
  }
  func.func @transform_2(%arg0: i32, %arg1: i32) -> (i32, i32) {
    %c0_i32 = arith.constant 0 : i32
    %c0_i32_0 = arith.constant 0 : i32
    return %c0_i32, %arg1 : i32, i32
  }
  func.func @transform_3(%arg0: i32, %arg1: i32) -> (i32, i32) {
    %c0_i32 = arith.constant 0 : i32
    return %arg0, %arg1 : i32, i32
  }
}

module attributes {stable_mosaic.version = 11 : i64} {
  func.func @_lstm_kernel(%arg0: i32, %arg1: memref<9x8x128xbf16, #tpu.memory_space<vmem>>, %arg2: memref<256x512xbf16, #tpu.memory_space<vmem>>, %arg3: memref<1x512xf32, #tpu.memory_space<vmem>>, %arg4: memref<9x8x128xf32, #tpu.memory_space<vmem>>, %arg5: memref<8x256xbf16, #tpu.memory_space<vmem>>, %arg6: memref<8x128xf32, #tpu.memory_space<vmem>>) attributes {dimension_semantics = [#tpu.dimension_semantics<arbitrary>], iteration_bounds = array<i64: 1>, scalar_prefetch = 0 : i64, scratch_operands = 2 : i64, tpu.core_type = #tpu.core_type<tc>, window_params = [{transform_indices = @transform_0, window_bounds = array<i64: 9, 8, 128>}, {pipeline_mode = #tpu.pipeline_mode<synchronous>, transform_indices = @transform_1, window_bounds = array<i64: 256, 512>}, {pipeline_mode = #tpu.pipeline_mode<synchronous>, transform_indices = @transform_2, window_bounds = array<i64: 1, 512>}, {transform_indices = @transform_3, window_bounds = array<i64: 9, 8, 128>}]} {
    %c0_i32 = arith.constant 0 : i32
    %0 = arith.cmpi eq, %arg0, %c0_i32 : i32
    %1 = arith.extui %0 : i1 to i32
    %c0_i32_0 = arith.constant 0 : i32
    %2 = arith.cmpi ne, %1, %c0_i32_0 : i32
    scf.if %2 {
      %cst_197 = arith.constant 0.000000e+00 : bf16
      %390 = vector.broadcast %cst_197 : bf16 to vector<8x256xbf16>
      %c0_198 = arith.constant 0 : index
      %c0_199 = arith.constant 0 : index
      %391 = vector.load %arg5[%c0_198, %c0_199] : memref<8x256xbf16, #tpu.memory_space<vmem>>, vector<8x256xbf16>
      tpu.vector_store %arg5[%c0_198, %c0_199], %390 {strides = array<i32>} : memref<8x256xbf16, #tpu.memory_space<vmem>>, vector<8x256xbf16>,
      %cst_200 = arith.constant 0.000000e+00 : f32
      %392 = vector.broadcast %cst_200 : f32 to vector<8x128xf32>
      %c0_201 = arith.constant 0 : index
      %c0_202 = arith.constant 0 : index
      %393 = vector.load %arg6[%c0_201, %c0_202] : memref<8x128xf32, #tpu.memory_space<vmem>>, vector<8x128xf32>
      tpu.vector_store %arg6[%c0_201, %c0_202], %392 {strides = array<i32>} : memref<8x128xf32, #tpu.memory_space<vmem>>, vector<8x128xf32>,
    } else {
    }
    %c0_i32_1 = arith.constant 0 : i32
    %3 = arith.index_cast %c0_i32_1 : i32 to index
    %c0 = arith.constant 0 : index
    %c0_2 = arith.constant 0 : index
    %4 = vector.load %arg1[%3, %c0, %c0_2] : memref<9x8x128xbf16, #tpu.memory_space<vmem>>, vector<1x8x128xbf16>
    %5 = vector.shape_cast %4 : vector<1x8x128xbf16> to vector<8x128xbf16>
    %c0_3 = arith.constant 0 : index
    %c0_4 = arith.constant 0 : index
    %6 = vector.load %arg5[%c0_3, %c0_4] : memref<8x256xbf16, #tpu.memory_space<vmem>>, vector<8x128xbf16>
    tpu.vector_store %arg5[%c0_3, %c0_4], %5 {strides = array<i32>} : memref<8x256xbf16, #tpu.memory_space<vmem>>, vector<8x128xbf16>,
    %c0_5 = arith.constant 0 : index
    %c0_6 = arith.constant 0 : index
    %7 = vector.load %arg5[%c0_5, %c0_6] : memref<8x256xbf16, #tpu.memory_space<vmem>>, vector<8x256xbf16>
    %c0_7 = arith.constant 0 : index
    %c0_8 = arith.constant 0 : index
    %8 = vector.load %arg2[%c0_7, %c0_8] : memref<256x512xbf16, #tpu.memory_space<vmem>>, vector<256x512xbf16>
    %cst = arith.constant dense<0.000000e+00> : vector<8x512xf32>
    %9 = tpu.matmul %7, %8, %cst {dimension_numbers = #tpu.dot_dimension_numbers<[1], [0], [0], [1], [0, 0, 1, 1], [], []>} : vector<8x256xbf16>, vector<256x512xbf16>, vector<8x512xf32> -> vector<8x512xf32>
    %c0_9 = arith.constant 0 : index
    %c0_10 = arith.constant 0 : index
    %10 = vector.load %arg3[%c0_9, %c0_10] : memref<1x512xf32, #tpu.memory_space<vmem>>, vector<1x512xf32>
    %11 = vector.broadcast %10 : vector<1x512xf32> to vector<8x512xf32>
    %12 = arith.addf %9, %11 : vector<8x512xf32>
    %13 = vector.extract_strided_slice %12 {offsets = [0, 0], sizes = [8, 128], strides = [1, 1]} : vector<8x512xf32> to vector<8x128xf32>
    %14 = arith.negf %13 : vector<8x128xf32>
    %15 = math.exp %14 : vector<8x128xf32>
    %cst_11 = arith.constant 1.000000e+00 : f32
    %16 = vector.broadcast %cst_11 : f32 to vector<8x128xf32>
    %17 = arith.addf %16, %15 : vector<8x128xf32>
    %18 = arith.divf %16, %17 : vector<8x128xf32>
    %19 = vector.extract_strided_slice %12 {offsets = [0, 128], sizes = [8, 128], strides = [1, 1]} : vector<8x512xf32> to vector<8x128xf32>
    %20 = arith.negf %19 : vector<8x128xf32>
    %21 = math.exp %20 : vector<8x128xf32>
    %cst_12 = arith.constant 1.000000e+00 : f32
    %22 = vector.broadcast %cst_12 : f32 to vector<8x128xf32>
    %23 = arith.addf %22, %21 : vector<8x128xf32>
    %24 = arith.divf %22, %23 : vector<8x128xf32>
    %25 = vector.extract_strided_slice %12 {offsets = [0, 256], sizes = [8, 128], strides = [1, 1]} : vector<8x512xf32> to vector<8x128xf32>
    %26 = math.tanh %25 : vector<8x128xf32>
    %27 = vector.extract_strided_slice %12 {offsets = [0, 384], sizes = [8, 128], strides = [1, 1]} : vector<8x512xf32> to vector<8x128xf32>
    %28 = arith.negf %27 : vector<8x128xf32>
    %29 = math.exp %28 : vector<8x128xf32>
    %cst_13 = arith.constant 1.000000e+00 : f32
    %30 = vector.broadcast %cst_13 : f32 to vector<8x128xf32>
    %31 = arith.addf %30, %29 : vector<8x128xf32>
    %32 = arith.divf %30, %31 : vector<8x128xf32>
    %c0_14 = arith.constant 0 : index
    %c0_15 = arith.constant 0 : index
    %33 = vector.load %arg6[%c0_14, %c0_15] : memref<8x128xf32, #tpu.memory_space<vmem>>, vector<8x128xf32>
    %34 = arith.mulf %24, %33 : vector<8x128xf32>
    %35 = arith.mulf %18, %26 : vector<8x128xf32>
    %36 = arith.addf %34, %35 : vector<8x128xf32>
    %37 = math.tanh %36 : vector<8x128xf32>
    %38 = arith.mulf %32, %37 : vector<8x128xf32>
    %c0_16 = arith.constant 0 : index
    %c0_17 = arith.constant 0 : index
    %39 = vector.load %arg6[%c0_16, %c0_17] : memref<8x128xf32, #tpu.memory_space<vmem>>, vector<8x128xf32>
    tpu.vector_store %arg6[%c0_16, %c0_17], %36 {strides = array<i32>} : memref<8x128xf32, #tpu.memory_space<vmem>>, vector<8x128xf32>,
    %40 = arith.truncf %38 : vector<8x128xf32> to vector<8x128xbf16>
    %c0_18 = arith.constant 0 : index
    %c128 = arith.constant 128 : index
    %41 = vector.load %arg5[%c0_18, %c128] : memref<8x256xbf16, #tpu.memory_space<vmem>>, vector<8x128xbf16>
    tpu.vector_store %arg5[%c0_18, %c128], %40 {strides = array<i32>} : memref<8x256xbf16, #tpu.memory_space<vmem>>, vector<8x128xbf16>,
    %42 = arith.index_cast %c0_i32_1 : i32 to index
    %c0_19 = arith.constant 0 : index
    %c0_20 = arith.constant 0 : index
    %43 = vector.load %arg4[%42, %c0_19, %c0_20] : memref<9x8x128xf32, #tpu.memory_space<vmem>>, vector<1x8x128xf32>
    %44 = vector.shape_cast %43 : vector<1x8x128xf32> to vector<8x128xf32>
    %45 = vector.shape_cast %38 : vector<8x128xf32> to vector<1x8x128xf32>
    tpu.vector_store %arg4[%42, %c0_19, %c0_20], %45 {strides = array<i32>} : memref<9x8x128xf32, #tpu.memory_space<vmem>>, vector<1x8x128xf32>,
    %c1_i32 = arith.constant 1 : i32
    %46 = arith.index_cast %c1_i32 : i32 to index
    %c0_21 = arith.constant 0 : index
    %c0_22 = arith.constant 0 : index
    %47 = vector.load %arg1[%46, %c0_21, %c0_22] : memref<9x8x128xbf16, #tpu.memory_space<vmem>>, vector<1x8x128xbf16>
    %48 = vector.shape_cast %47 : vector<1x8x128xbf16> to vector<8x128xbf16>
    %c0_23 = arith.constant 0 : index
    %c0_24 = arith.constant 0 : index
    %49 = vector.load %arg5[%c0_23, %c0_24] : memref<8x256xbf16, #tpu.memory_space<vmem>>, vector<8x128xbf16>
    tpu.vector_store %arg5[%c0_23, %c0_24], %48 {strides = array<i32>} : memref<8x256xbf16, #tpu.memory_space<vmem>>, vector<8x128xbf16>,
    %c0_25 = arith.constant 0 : index
    %c0_26 = arith.constant 0 : index
    %50 = vector.load %arg5[%c0_25, %c0_26] : memref<8x256xbf16, #tpu.memory_space<vmem>>, vector<8x256xbf16>
    %c0_27 = arith.constant 0 : index
    %c0_28 = arith.constant 0 : index
    %51 = vector.load %arg2[%c0_27, %c0_28] : memref<256x512xbf16, #tpu.memory_space<vmem>>, vector<256x512xbf16>
    %cst_29 = arith.constant dense<0.000000e+00> : vector<8x512xf32>
    %52 = tpu.matmul %50, %51, %cst_29 {dimension_numbers = #tpu.dot_dimension_numbers<[1], [0], [0], [1], [0, 0, 1, 1], [], []>} : vector<8x256xbf16>, vector<256x512xbf16>, vector<8x512xf32> -> vector<8x512xf32>
    %c0_30 = arith.constant 0 : index
    %c0_31 = arith.constant 0 : index
    %53 = vector.load %arg3[%c0_30, %c0_31] : memref<1x512xf32, #tpu.memory_space<vmem>>, vector<1x512xf32>
    %54 = vector.broadcast %53 : vector<1x512xf32> to vector<8x512xf32>
    %55 = arith.addf %52, %54 : vector<8x512xf32>
    %56 = vector.extract_strided_slice %55 {offsets = [0, 0], sizes = [8, 128], strides = [1, 1]} : vector<8x512xf32> to vector<8x128xf32>
    %57 = arith.negf %56 : vector<8x128xf32>
    %58 = math.exp %57 : vector<8x128xf32>
    %cst_32 = arith.constant 1.000000e+00 : f32
    %59 = vector.broadcast %cst_32 : f32 to vector<8x128xf32>
    %60 = arith.addf %59, %58 : vector<8x128xf32>
    %61 = arith.divf %59, %60 : vector<8x128xf32>
    %62 = vector.extract_strided_slice %55 {offsets = [0, 128], sizes = [8, 128], strides = [1, 1]} : vector<8x512xf32> to vector<8x128xf32>
    %63 = arith.negf %62 : vector<8x128xf32>
    %64 = math.exp %63 : vector<8x128xf32>
    %cst_33 = arith.constant 1.000000e+00 : f32
    %65 = vector.broadcast %cst_33 : f32 to vector<8x128xf32>
    %66 = arith.addf %65, %64 : vector<8x128xf32>
    %67 = arith.divf %65, %66 : vector<8x128xf32>
    %68 = vector.extract_strided_slice %55 {offsets = [0, 256], sizes = [8, 128], strides = [1, 1]} : vector<8x512xf32> to vector<8x128xf32>
    %69 = math.tanh %68 : vector<8x128xf32>
    %70 = vector.extract_strided_slice %55 {offsets = [0, 384], sizes = [8, 128], strides = [1, 1]} : vector<8x512xf32> to vector<8x128xf32>
    %71 = arith.negf %70 : vector<8x128xf32>
    %72 = math.exp %71 : vector<8x128xf32>
    %cst_34 = arith.constant 1.000000e+00 : f32
    %73 = vector.broadcast %cst_34 : f32 to vector<8x128xf32>
    %74 = arith.addf %73, %72 : vector<8x128xf32>
    %75 = arith.divf %73, %74 : vector<8x128xf32>
    %c0_35 = arith.constant 0 : index
    %c0_36 = arith.constant 0 : index
    %76 = vector.load %arg6[%c0_35, %c0_36] : memref<8x128xf32, #tpu.memory_space<vmem>>, vector<8x128xf32>
    %77 = arith.mulf %67, %76 : vector<8x128xf32>
    %78 = arith.mulf %61, %69 : vector<8x128xf32>
    %79 = arith.addf %77, %78 : vector<8x128xf32>
    %80 = math.tanh %79 : vector<8x128xf32>
    %81 = arith.mulf %75, %80 : vector<8x128xf32>
    %c0_37 = arith.constant 0 : index
    %c0_38 = arith.constant 0 : index
    %82 = vector.load %arg6[%c0_37, %c0_38] : memref<8x128xf32, #tpu.memory_space<vmem>>, vector<8x128xf32>
    tpu.vector_store %arg6[%c0_37, %c0_38], %79 {strides = array<i32>} : memref<8x128xf32, #tpu.memory_space<vmem>>, vector<8x128xf32>,
    %83 = arith.truncf %81 : vector<8x128xf32> to vector<8x128xbf16>
    %c0_39 = arith.constant 0 : index
    %c128_40 = arith.constant 128 : index
    %84 = vector.load %arg5[%c0_39, %c128_40] : memref<8x256xbf16, #tpu.memory_space<vmem>>, vector<8x128xbf16>
    tpu.vector_store %arg5[%c0_39, %c128_40], %83 {strides = array<i32>} : memref<8x256xbf16, #tpu.memory_space<vmem>>, vector<8x128xbf16>,
    %85 = arith.index_cast %c1_i32 : i32 to index
    %c0_41 = arith.constant 0 : index
    %c0_42 = arith.constant 0 : index
    %86 = vector.load %arg4[%85, %c0_41, %c0_42] : memref<9x8x128xf32, #tpu.memory_space<vmem>>, vector<1x8x128xf32>
    %87 = vector.shape_cast %86 : vector<1x8x128xf32> to vector<8x128xf32>
    %88 = vector.shape_cast %81 : vector<8x128xf32> to vector<1x8x128xf32>
    tpu.vector_store %arg4[%85, %c0_41, %c0_42], %88 {strides = array<i32>} : memref<9x8x128xf32, #tpu.memory_space<vmem>>, vector<1x8x128xf32>,
    %c2_i32 = arith.constant 2 : i32
    %89 = arith.index_cast %c2_i32 : i32 to index
    %c0_43 = arith.constant 0 : index
    %c0_44 = arith.constant 0 : index
    %90 = vector.load %arg1[%89, %c0_43, %c0_44] : memref<9x8x128xbf16, #tpu.memory_space<vmem>>, vector<1x8x128xbf16>
    %91 = vector.shape_cast %90 : vector<1x8x128xbf16> to vector<8x128xbf16>
    %c0_45 = arith.constant 0 : index
    %c0_46 = arith.constant 0 : index
    %92 = vector.load %arg5[%c0_45, %c0_46] : memref<8x256xbf16, #tpu.memory_space<vmem>>, vector<8x128xbf16>
    tpu.vector_store %arg5[%c0_45, %c0_46], %91 {strides = array<i32>} : memref<8x256xbf16, #tpu.memory_space<vmem>>, vector<8x128xbf16>,
    %c0_47 = arith.constant 0 : index
    %c0_48 = arith.constant 0 : index
    %93 = vector.load %arg5[%c0_47, %c0_48] : memref<8x256xbf16, #tpu.memory_space<vmem>>, vector<8x256xbf16>
    %c0_49 = arith.constant 0 : index
    %c0_50 = arith.constant 0 : index
    %94 = vector.load %arg2[%c0_49, %c0_50] : memref<256x512xbf16, #tpu.memory_space<vmem>>, vector<256x512xbf16>
    %cst_51 = arith.constant dense<0.000000e+00> : vector<8x512xf32>
    %95 = tpu.matmul %93, %94, %cst_51 {dimension_numbers = #tpu.dot_dimension_numbers<[1], [0], [0], [1], [0, 0, 1, 1], [], []>} : vector<8x256xbf16>, vector<256x512xbf16>, vector<8x512xf32> -> vector<8x512xf32>
    %c0_52 = arith.constant 0 : index
    %c0_53 = arith.constant 0 : index
    %96 = vector.load %arg3[%c0_52, %c0_53] : memref<1x512xf32, #tpu.memory_space<vmem>>, vector<1x512xf32>
    %97 = vector.broadcast %96 : vector<1x512xf32> to vector<8x512xf32>
    %98 = arith.addf %95, %97 : vector<8x512xf32>
    %99 = vector.extract_strided_slice %98 {offsets = [0, 0], sizes = [8, 128], strides = [1, 1]} : vector<8x512xf32> to vector<8x128xf32>
    %100 = arith.negf %99 : vector<8x128xf32>
    %101 = math.exp %100 : vector<8x128xf32>
    %cst_54 = arith.constant 1.000000e+00 : f32
    %102 = vector.broadcast %cst_54 : f32 to vector<8x128xf32>
    %103 = arith.addf %102, %101 : vector<8x128xf32>
    %104 = arith.divf %102, %103 : vector<8x128xf32>
    %105 = vector.extract_strided_slice %98 {offsets = [0, 128], sizes = [8, 128], strides = [1, 1]} : vector<8x512xf32> to vector<8x128xf32>
    %106 = arith.negf %105 : vector<8x128xf32>
    %107 = math.exp %106 : vector<8x128xf32>
    %cst_55 = arith.constant 1.000000e+00 : f32
    %108 = vector.broadcast %cst_55 : f32 to vector<8x128xf32>
    %109 = arith.addf %108, %107 : vector<8x128xf32>
    %110 = arith.divf %108, %109 : vector<8x128xf32>
    %111 = vector.extract_strided_slice %98 {offsets = [0, 256], sizes = [8, 128], strides = [1, 1]} : vector<8x512xf32> to vector<8x128xf32>
    %112 = math.tanh %111 : vector<8x128xf32>
    %113 = vector.extract_strided_slice %98 {offsets = [0, 384], sizes = [8, 128], strides = [1, 1]} : vector<8x512xf32> to vector<8x128xf32>
    %114 = arith.negf %113 : vector<8x128xf32>
    %115 = math.exp %114 : vector<8x128xf32>
    %cst_56 = arith.constant 1.000000e+00 : f32
    %116 = vector.broadcast %cst_56 : f32 to vector<8x128xf32>
    %117 = arith.addf %116, %115 : vector<8x128xf32>
    %118 = arith.divf %116, %117 : vector<8x128xf32>
    %c0_57 = arith.constant 0 : index
    %c0_58 = arith.constant 0 : index
    %119 = vector.load %arg6[%c0_57, %c0_58] : memref<8x128xf32, #tpu.memory_space<vmem>>, vector<8x128xf32>
    %120 = arith.mulf %110, %119 : vector<8x128xf32>
    %121 = arith.mulf %104, %112 : vector<8x128xf32>
    %122 = arith.addf %120, %121 : vector<8x128xf32>
    %123 = math.tanh %122 : vector<8x128xf32>
    %124 = arith.mulf %118, %123 : vector<8x128xf32>
    %c0_59 = arith.constant 0 : index
    %c0_60 = arith.constant 0 : index
    %125 = vector.load %arg6[%c0_59, %c0_60] : memref<8x128xf32, #tpu.memory_space<vmem>>, vector<8x128xf32>
    tpu.vector_store %arg6[%c0_59, %c0_60], %122 {strides = array<i32>} : memref<8x128xf32, #tpu.memory_space<vmem>>, vector<8x128xf32>,
    %126 = arith.truncf %124 : vector<8x128xf32> to vector<8x128xbf16>
    %c0_61 = arith.constant 0 : index
    %c128_62 = arith.constant 128 : index
    %127 = vector.load %arg5[%c0_61, %c128_62] : memref<8x256xbf16, #tpu.memory_space<vmem>>, vector<8x128xbf16>
    tpu.vector_store %arg5[%c0_61, %c128_62], %126 {strides = array<i32>} : memref<8x256xbf16, #tpu.memory_space<vmem>>, vector<8x128xbf16>,
    %128 = arith.index_cast %c2_i32 : i32 to index
    %c0_63 = arith.constant 0 : index
    %c0_64 = arith.constant 0 : index
    %129 = vector.load %arg4[%128, %c0_63, %c0_64] : memref<9x8x128xf32, #tpu.memory_space<vmem>>, vector<1x8x128xf32>
    %130 = vector.shape_cast %129 : vector<1x8x128xf32> to vector<8x128xf32>
    %131 = vector.shape_cast %124 : vector<8x128xf32> to vector<1x8x128xf32>
    tpu.vector_store %arg4[%128, %c0_63, %c0_64], %131 {strides = array<i32>} : memref<9x8x128xf32, #tpu.memory_space<vmem>>, vector<1x8x128xf32>,
    %c3_i32 = arith.constant 3 : i32
    %132 = arith.index_cast %c3_i32 : i32 to index
    %c0_65 = arith.constant 0 : index
    %c0_66 = arith.constant 0 : index
    %133 = vector.load %arg1[%132, %c0_65, %c0_66] : memref<9x8x128xbf16, #tpu.memory_space<vmem>>, vector<1x8x128xbf16>
    %134 = vector.shape_cast %133 : vector<1x8x128xbf16> to vector<8x128xbf16>
    %c0_67 = arith.constant 0 : index
    %c0_68 = arith.constant 0 : index
    %135 = vector.load %arg5[%c0_67, %c0_68] : memref<8x256xbf16, #tpu.memory_space<vmem>>, vector<8x128xbf16>
    tpu.vector_store %arg5[%c0_67, %c0_68], %134 {strides = array<i32>} : memref<8x256xbf16, #tpu.memory_space<vmem>>, vector<8x128xbf16>,
    %c0_69 = arith.constant 0 : index
    %c0_70 = arith.constant 0 : index
    %136 = vector.load %arg5[%c0_69, %c0_70] : memref<8x256xbf16, #tpu.memory_space<vmem>>, vector<8x256xbf16>
    %c0_71 = arith.constant 0 : index
    %c0_72 = arith.constant 0 : index
    %137 = vector.load %arg2[%c0_71, %c0_72] : memref<256x512xbf16, #tpu.memory_space<vmem>>, vector<256x512xbf16>
    %cst_73 = arith.constant dense<0.000000e+00> : vector<8x512xf32>
    %138 = tpu.matmul %136, %137, %cst_73 {dimension_numbers = #tpu.dot_dimension_numbers<[1], [0], [0], [1], [0, 0, 1, 1], [], []>} : vector<8x256xbf16>, vector<256x512xbf16>, vector<8x512xf32> -> vector<8x512xf32>
    %c0_74 = arith.constant 0 : index
    %c0_75 = arith.constant 0 : index
    %139 = vector.load %arg3[%c0_74, %c0_75] : memref<1x512xf32, #tpu.memory_space<vmem>>, vector<1x512xf32>
    %140 = vector.broadcast %139 : vector<1x512xf32> to vector<8x512xf32>
    %141 = arith.addf %138, %140 : vector<8x512xf32>
    %142 = vector.extract_strided_slice %141 {offsets = [0, 0], sizes = [8, 128], strides = [1, 1]} : vector<8x512xf32> to vector<8x128xf32>
    %143 = arith.negf %142 : vector<8x128xf32>
    %144 = math.exp %143 : vector<8x128xf32>
    %cst_76 = arith.constant 1.000000e+00 : f32
    %145 = vector.broadcast %cst_76 : f32 to vector<8x128xf32>
    %146 = arith.addf %145, %144 : vector<8x128xf32>
    %147 = arith.divf %145, %146 : vector<8x128xf32>
    %148 = vector.extract_strided_slice %141 {offsets = [0, 128], sizes = [8, 128], strides = [1, 1]} : vector<8x512xf32> to vector<8x128xf32>
    %149 = arith.negf %148 : vector<8x128xf32>
    %150 = math.exp %149 : vector<8x128xf32>
    %cst_77 = arith.constant 1.000000e+00 : f32
    %151 = vector.broadcast %cst_77 : f32 to vector<8x128xf32>
    %152 = arith.addf %151, %150 : vector<8x128xf32>
    %153 = arith.divf %151, %152 : vector<8x128xf32>
    %154 = vector.extract_strided_slice %141 {offsets = [0, 256], sizes = [8, 128], strides = [1, 1]} : vector<8x512xf32> to vector<8x128xf32>
    %155 = math.tanh %154 : vector<8x128xf32>
    %156 = vector.extract_strided_slice %141 {offsets = [0, 384], sizes = [8, 128], strides = [1, 1]} : vector<8x512xf32> to vector<8x128xf32>
    %157 = arith.negf %156 : vector<8x128xf32>
    %158 = math.exp %157 : vector<8x128xf32>
    %cst_78 = arith.constant 1.000000e+00 : f32
    %159 = vector.broadcast %cst_78 : f32 to vector<8x128xf32>
    %160 = arith.addf %159, %158 : vector<8x128xf32>
    %161 = arith.divf %159, %160 : vector<8x128xf32>
    %c0_79 = arith.constant 0 : index
    %c0_80 = arith.constant 0 : index
    %162 = vector.load %arg6[%c0_79, %c0_80] : memref<8x128xf32, #tpu.memory_space<vmem>>, vector<8x128xf32>
    %163 = arith.mulf %153, %162 : vector<8x128xf32>
    %164 = arith.mulf %147, %155 : vector<8x128xf32>
    %165 = arith.addf %163, %164 : vector<8x128xf32>
    %166 = math.tanh %165 : vector<8x128xf32>
    %167 = arith.mulf %161, %166 : vector<8x128xf32>
    %c0_81 = arith.constant 0 : index
    %c0_82 = arith.constant 0 : index
    %168 = vector.load %arg6[%c0_81, %c0_82] : memref<8x128xf32, #tpu.memory_space<vmem>>, vector<8x128xf32>
    tpu.vector_store %arg6[%c0_81, %c0_82], %165 {strides = array<i32>} : memref<8x128xf32, #tpu.memory_space<vmem>>, vector<8x128xf32>,
    %169 = arith.truncf %167 : vector<8x128xf32> to vector<8x128xbf16>
    %c0_83 = arith.constant 0 : index
    %c128_84 = arith.constant 128 : index
    %170 = vector.load %arg5[%c0_83, %c128_84] : memref<8x256xbf16, #tpu.memory_space<vmem>>, vector<8x128xbf16>
    tpu.vector_store %arg5[%c0_83, %c128_84], %169 {strides = array<i32>} : memref<8x256xbf16, #tpu.memory_space<vmem>>, vector<8x128xbf16>,
    %171 = arith.index_cast %c3_i32 : i32 to index
    %c0_85 = arith.constant 0 : index
    %c0_86 = arith.constant 0 : index
    %172 = vector.load %arg4[%171, %c0_85, %c0_86] : memref<9x8x128xf32, #tpu.memory_space<vmem>>, vector<1x8x128xf32>
    %173 = vector.shape_cast %172 : vector<1x8x128xf32> to vector<8x128xf32>
    %174 = vector.shape_cast %167 : vector<8x128xf32> to vector<1x8x128xf32>
    tpu.vector_store %arg4[%171, %c0_85, %c0_86], %174 {strides = array<i32>} : memref<9x8x128xf32, #tpu.memory_space<vmem>>, vector<1x8x128xf32>,
    %c4_i32 = arith.constant 4 : i32
    %175 = arith.index_cast %c4_i32 : i32 to index
    %c0_87 = arith.constant 0 : index
    %c0_88 = arith.constant 0 : index
    %176 = vector.load %arg1[%175, %c0_87, %c0_88] : memref<9x8x128xbf16, #tpu.memory_space<vmem>>, vector<1x8x128xbf16>
    %177 = vector.shape_cast %176 : vector<1x8x128xbf16> to vector<8x128xbf16>
    %c0_89 = arith.constant 0 : index
    %c0_90 = arith.constant 0 : index
    %178 = vector.load %arg5[%c0_89, %c0_90] : memref<8x256xbf16, #tpu.memory_space<vmem>>, vector<8x128xbf16>
    tpu.vector_store %arg5[%c0_89, %c0_90], %177 {strides = array<i32>} : memref<8x256xbf16, #tpu.memory_space<vmem>>, vector<8x128xbf16>,
    %c0_91 = arith.constant 0 : index
    %c0_92 = arith.constant 0 : index
    %179 = vector.load %arg5[%c0_91, %c0_92] : memref<8x256xbf16, #tpu.memory_space<vmem>>, vector<8x256xbf16>
    %c0_93 = arith.constant 0 : index
    %c0_94 = arith.constant 0 : index
    %180 = vector.load %arg2[%c0_93, %c0_94] : memref<256x512xbf16, #tpu.memory_space<vmem>>, vector<256x512xbf16>
    %cst_95 = arith.constant dense<0.000000e+00> : vector<8x512xf32>
    %181 = tpu.matmul %179, %180, %cst_95 {dimension_numbers = #tpu.dot_dimension_numbers<[1], [0], [0], [1], [0, 0, 1, 1], [], []>} : vector<8x256xbf16>, vector<256x512xbf16>, vector<8x512xf32> -> vector<8x512xf32>
    %c0_96 = arith.constant 0 : index
    %c0_97 = arith.constant 0 : index
    %182 = vector.load %arg3[%c0_96, %c0_97] : memref<1x512xf32, #tpu.memory_space<vmem>>, vector<1x512xf32>
    %183 = vector.broadcast %182 : vector<1x512xf32> to vector<8x512xf32>
    %184 = arith.addf %181, %183 : vector<8x512xf32>
    %185 = vector.extract_strided_slice %184 {offsets = [0, 0], sizes = [8, 128], strides = [1, 1]} : vector<8x512xf32> to vector<8x128xf32>
    %186 = arith.negf %185 : vector<8x128xf32>
    %187 = math.exp %186 : vector<8x128xf32>
    %cst_98 = arith.constant 1.000000e+00 : f32
    %188 = vector.broadcast %cst_98 : f32 to vector<8x128xf32>
    %189 = arith.addf %188, %187 : vector<8x128xf32>
    %190 = arith.divf %188, %189 : vector<8x128xf32>
    %191 = vector.extract_strided_slice %184 {offsets = [0, 128], sizes = [8, 128], strides = [1, 1]} : vector<8x512xf32> to vector<8x128xf32>
    %192 = arith.negf %191 : vector<8x128xf32>
    %193 = math.exp %192 : vector<8x128xf32>
    %cst_99 = arith.constant 1.000000e+00 : f32
    %194 = vector.broadcast %cst_99 : f32 to vector<8x128xf32>
    %195 = arith.addf %194, %193 : vector<8x128xf32>
    %196 = arith.divf %194, %195 : vector<8x128xf32>
    %197 = vector.extract_strided_slice %184 {offsets = [0, 256], sizes = [8, 128], strides = [1, 1]} : vector<8x512xf32> to vector<8x128xf32>
    %198 = math.tanh %197 : vector<8x128xf32>
    %199 = vector.extract_strided_slice %184 {offsets = [0, 384], sizes = [8, 128], strides = [1, 1]} : vector<8x512xf32> to vector<8x128xf32>
    %200 = arith.negf %199 : vector<8x128xf32>
    %201 = math.exp %200 : vector<8x128xf32>
    %cst_100 = arith.constant 1.000000e+00 : f32
    %202 = vector.broadcast %cst_100 : f32 to vector<8x128xf32>
    %203 = arith.addf %202, %201 : vector<8x128xf32>
    %204 = arith.divf %202, %203 : vector<8x128xf32>
    %c0_101 = arith.constant 0 : index
    %c0_102 = arith.constant 0 : index
    %205 = vector.load %arg6[%c0_101, %c0_102] : memref<8x128xf32, #tpu.memory_space<vmem>>, vector<8x128xf32>
    %206 = arith.mulf %196, %205 : vector<8x128xf32>
    %207 = arith.mulf %190, %198 : vector<8x128xf32>
    %208 = arith.addf %206, %207 : vector<8x128xf32>
    %209 = math.tanh %208 : vector<8x128xf32>
    %210 = arith.mulf %204, %209 : vector<8x128xf32>
    %c0_103 = arith.constant 0 : index
    %c0_104 = arith.constant 0 : index
    %211 = vector.load %arg6[%c0_103, %c0_104] : memref<8x128xf32, #tpu.memory_space<vmem>>, vector<8x128xf32>
    tpu.vector_store %arg6[%c0_103, %c0_104], %208 {strides = array<i32>} : memref<8x128xf32, #tpu.memory_space<vmem>>, vector<8x128xf32>,
    %212 = arith.truncf %210 : vector<8x128xf32> to vector<8x128xbf16>
    %c0_105 = arith.constant 0 : index
    %c128_106 = arith.constant 128 : index
    %213 = vector.load %arg5[%c0_105, %c128_106] : memref<8x256xbf16, #tpu.memory_space<vmem>>, vector<8x128xbf16>
    tpu.vector_store %arg5[%c0_105, %c128_106], %212 {strides = array<i32>} : memref<8x256xbf16, #tpu.memory_space<vmem>>, vector<8x128xbf16>,
    %214 = arith.index_cast %c4_i32 : i32 to index
    %c0_107 = arith.constant 0 : index
    %c0_108 = arith.constant 0 : index
    %215 = vector.load %arg4[%214, %c0_107, %c0_108] : memref<9x8x128xf32, #tpu.memory_space<vmem>>, vector<1x8x128xf32>
    %216 = vector.shape_cast %215 : vector<1x8x128xf32> to vector<8x128xf32>
    %217 = vector.shape_cast %210 : vector<8x128xf32> to vector<1x8x128xf32>
    tpu.vector_store %arg4[%214, %c0_107, %c0_108], %217 {strides = array<i32>} : memref<9x8x128xf32, #tpu.memory_space<vmem>>, vector<1x8x128xf32>,
    %c5_i32 = arith.constant 5 : i32
    %218 = arith.index_cast %c5_i32 : i32 to index
    %c0_109 = arith.constant 0 : index
    %c0_110 = arith.constant 0 : index
    %219 = vector.load %arg1[%218, %c0_109, %c0_110] : memref<9x8x128xbf16, #tpu.memory_space<vmem>>, vector<1x8x128xbf16>
    %220 = vector.shape_cast %219 : vector<1x8x128xbf16> to vector<8x128xbf16>
    %c0_111 = arith.constant 0 : index
    %c0_112 = arith.constant 0 : index
    %221 = vector.load %arg5[%c0_111, %c0_112] : memref<8x256xbf16, #tpu.memory_space<vmem>>, vector<8x128xbf16>
    tpu.vector_store %arg5[%c0_111, %c0_112], %220 {strides = array<i32>} : memref<8x256xbf16, #tpu.memory_space<vmem>>, vector<8x128xbf16>,
    %c0_113 = arith.constant 0 : index
    %c0_114 = arith.constant 0 : index
    %222 = vector.load %arg5[%c0_113, %c0_114] : memref<8x256xbf16, #tpu.memory_space<vmem>>, vector<8x256xbf16>
    %c0_115 = arith.constant 0 : index
    %c0_116 = arith.constant 0 : index
    %223 = vector.load %arg2[%c0_115, %c0_116] : memref<256x512xbf16, #tpu.memory_space<vmem>>, vector<256x512xbf16>
    %cst_117 = arith.constant dense<0.000000e+00> : vector<8x512xf32>
    %224 = tpu.matmul %222, %223, %cst_117 {dimension_numbers = #tpu.dot_dimension_numbers<[1], [0], [0], [1], [0, 0, 1, 1], [], []>} : vector<8x256xbf16>, vector<256x512xbf16>, vector<8x512xf32> -> vector<8x512xf32>
    %c0_118 = arith.constant 0 : index
    %c0_119 = arith.constant 0 : index
    %225 = vector.load %arg3[%c0_118, %c0_119] : memref<1x512xf32, #tpu.memory_space<vmem>>, vector<1x512xf32>
    %226 = vector.broadcast %225 : vector<1x512xf32> to vector<8x512xf32>
    %227 = arith.addf %224, %226 : vector<8x512xf32>
    %228 = vector.extract_strided_slice %227 {offsets = [0, 0], sizes = [8, 128], strides = [1, 1]} : vector<8x512xf32> to vector<8x128xf32>
    %229 = arith.negf %228 : vector<8x128xf32>
    %230 = math.exp %229 : vector<8x128xf32>
    %cst_120 = arith.constant 1.000000e+00 : f32
    %231 = vector.broadcast %cst_120 : f32 to vector<8x128xf32>
    %232 = arith.addf %231, %230 : vector<8x128xf32>
    %233 = arith.divf %231, %232 : vector<8x128xf32>
    %234 = vector.extract_strided_slice %227 {offsets = [0, 128], sizes = [8, 128], strides = [1, 1]} : vector<8x512xf32> to vector<8x128xf32>
    %235 = arith.negf %234 : vector<8x128xf32>
    %236 = math.exp %235 : vector<8x128xf32>
    %cst_121 = arith.constant 1.000000e+00 : f32
    %237 = vector.broadcast %cst_121 : f32 to vector<8x128xf32>
    %238 = arith.addf %237, %236 : vector<8x128xf32>
    %239 = arith.divf %237, %238 : vector<8x128xf32>
    %240 = vector.extract_strided_slice %227 {offsets = [0, 256], sizes = [8, 128], strides = [1, 1]} : vector<8x512xf32> to vector<8x128xf32>
    %241 = math.tanh %240 : vector<8x128xf32>
    %242 = vector.extract_strided_slice %227 {offsets = [0, 384], sizes = [8, 128], strides = [1, 1]} : vector<8x512xf32> to vector<8x128xf32>
    %243 = arith.negf %242 : vector<8x128xf32>
    %244 = math.exp %243 : vector<8x128xf32>
    %cst_122 = arith.constant 1.000000e+00 : f32
    %245 = vector.broadcast %cst_122 : f32 to vector<8x128xf32>
    %246 = arith.addf %245, %244 : vector<8x128xf32>
    %247 = arith.divf %245, %246 : vector<8x128xf32>
    %c0_123 = arith.constant 0 : index
    %c0_124 = arith.constant 0 : index
    %248 = vector.load %arg6[%c0_123, %c0_124] : memref<8x128xf32, #tpu.memory_space<vmem>>, vector<8x128xf32>
    %249 = arith.mulf %239, %248 : vector<8x128xf32>
    %250 = arith.mulf %233, %241 : vector<8x128xf32>
    %251 = arith.addf %249, %250 : vector<8x128xf32>
    %252 = math.tanh %251 : vector<8x128xf32>
    %253 = arith.mulf %247, %252 : vector<8x128xf32>
    %c0_125 = arith.constant 0 : index
    %c0_126 = arith.constant 0 : index
    %254 = vector.load %arg6[%c0_125, %c0_126] : memref<8x128xf32, #tpu.memory_space<vmem>>, vector<8x128xf32>
    tpu.vector_store %arg6[%c0_125, %c0_126], %251 {strides = array<i32>} : memref<8x128xf32, #tpu.memory_space<vmem>>, vector<8x128xf32>,
    %255 = arith.truncf %253 : vector<8x128xf32> to vector<8x128xbf16>
    %c0_127 = arith.constant 0 : index
    %c128_128 = arith.constant 128 : index
    %256 = vector.load %arg5[%c0_127, %c128_128] : memref<8x256xbf16, #tpu.memory_space<vmem>>, vector<8x128xbf16>
    tpu.vector_store %arg5[%c0_127, %c128_128], %255 {strides = array<i32>} : memref<8x256xbf16, #tpu.memory_space<vmem>>, vector<8x128xbf16>,
    %257 = arith.index_cast %c5_i32 : i32 to index
    %c0_129 = arith.constant 0 : index
    %c0_130 = arith.constant 0 : index
    %258 = vector.load %arg4[%257, %c0_129, %c0_130] : memref<9x8x128xf32, #tpu.memory_space<vmem>>, vector<1x8x128xf32>
    %259 = vector.shape_cast %258 : vector<1x8x128xf32> to vector<8x128xf32>
    %260 = vector.shape_cast %253 : vector<8x128xf32> to vector<1x8x128xf32>
    tpu.vector_store %arg4[%257, %c0_129, %c0_130], %260 {strides = array<i32>} : memref<9x8x128xf32, #tpu.memory_space<vmem>>, vector<1x8x128xf32>,
    %c6_i32 = arith.constant 6 : i32
    %261 = arith.index_cast %c6_i32 : i32 to index
    %c0_131 = arith.constant 0 : index
    %c0_132 = arith.constant 0 : index
    %262 = vector.load %arg1[%261, %c0_131, %c0_132] : memref<9x8x128xbf16, #tpu.memory_space<vmem>>, vector<1x8x128xbf16>
    %263 = vector.shape_cast %262 : vector<1x8x128xbf16> to vector<8x128xbf16>
    %c0_133 = arith.constant 0 : index
    %c0_134 = arith.constant 0 : index
    %264 = vector.load %arg5[%c0_133, %c0_134] : memref<8x256xbf16, #tpu.memory_space<vmem>>, vector<8x128xbf16>
    tpu.vector_store %arg5[%c0_133, %c0_134], %263 {strides = array<i32>} : memref<8x256xbf16, #tpu.memory_space<vmem>>, vector<8x128xbf16>,
    %c0_135 = arith.constant 0 : index
    %c0_136 = arith.constant 0 : index
    %265 = vector.load %arg5[%c0_135, %c0_136] : memref<8x256xbf16, #tpu.memory_space<vmem>>, vector<8x256xbf16>
    %c0_137 = arith.constant 0 : index
    %c0_138 = arith.constant 0 : index
    %266 = vector.load %arg2[%c0_137, %c0_138] : memref<256x512xbf16, #tpu.memory_space<vmem>>, vector<256x512xbf16>
    %cst_139 = arith.constant dense<0.000000e+00> : vector<8x512xf32>
    %267 = tpu.matmul %265, %266, %cst_139 {dimension_numbers = #tpu.dot_dimension_numbers<[1], [0], [0], [1], [0, 0, 1, 1], [], []>} : vector<8x256xbf16>, vector<256x512xbf16>, vector<8x512xf32> -> vector<8x512xf32>
    %c0_140 = arith.constant 0 : index
    %c0_141 = arith.constant 0 : index
    %268 = vector.load %arg3[%c0_140, %c0_141] : memref<1x512xf32, #tpu.memory_space<vmem>>, vector<1x512xf32>
    %269 = vector.broadcast %268 : vector<1x512xf32> to vector<8x512xf32>
    %270 = arith.addf %267, %269 : vector<8x512xf32>
    %271 = vector.extract_strided_slice %270 {offsets = [0, 0], sizes = [8, 128], strides = [1, 1]} : vector<8x512xf32> to vector<8x128xf32>
    %272 = arith.negf %271 : vector<8x128xf32>
    %273 = math.exp %272 : vector<8x128xf32>
    %cst_142 = arith.constant 1.000000e+00 : f32
    %274 = vector.broadcast %cst_142 : f32 to vector<8x128xf32>
    %275 = arith.addf %274, %273 : vector<8x128xf32>
    %276 = arith.divf %274, %275 : vector<8x128xf32>
    %277 = vector.extract_strided_slice %270 {offsets = [0, 128], sizes = [8, 128], strides = [1, 1]} : vector<8x512xf32> to vector<8x128xf32>
    %278 = arith.negf %277 : vector<8x128xf32>
    %279 = math.exp %278 : vector<8x128xf32>
    %cst_143 = arith.constant 1.000000e+00 : f32
    %280 = vector.broadcast %cst_143 : f32 to vector<8x128xf32>
    %281 = arith.addf %280, %279 : vector<8x128xf32>
    %282 = arith.divf %280, %281 : vector<8x128xf32>
    %283 = vector.extract_strided_slice %270 {offsets = [0, 256], sizes = [8, 128], strides = [1, 1]} : vector<8x512xf32> to vector<8x128xf32>
    %284 = math.tanh %283 : vector<8x128xf32>
    %285 = vector.extract_strided_slice %270 {offsets = [0, 384], sizes = [8, 128], strides = [1, 1]} : vector<8x512xf32> to vector<8x128xf32>
    %286 = arith.negf %285 : vector<8x128xf32>
    %287 = math.exp %286 : vector<8x128xf32>
    %cst_144 = arith.constant 1.000000e+00 : f32
    %288 = vector.broadcast %cst_144 : f32 to vector<8x128xf32>
    %289 = arith.addf %288, %287 : vector<8x128xf32>
    %290 = arith.divf %288, %289 : vector<8x128xf32>
    %c0_145 = arith.constant 0 : index
    %c0_146 = arith.constant 0 : index
    %291 = vector.load %arg6[%c0_145, %c0_146] : memref<8x128xf32, #tpu.memory_space<vmem>>, vector<8x128xf32>
    %292 = arith.mulf %282, %291 : vector<8x128xf32>
    %293 = arith.mulf %276, %284 : vector<8x128xf32>
    %294 = arith.addf %292, %293 : vector<8x128xf32>
    %295 = math.tanh %294 : vector<8x128xf32>
    %296 = arith.mulf %290, %295 : vector<8x128xf32>
    %c0_147 = arith.constant 0 : index
    %c0_148 = arith.constant 0 : index
    %297 = vector.load %arg6[%c0_147, %c0_148] : memref<8x128xf32, #tpu.memory_space<vmem>>, vector<8x128xf32>
    tpu.vector_store %arg6[%c0_147, %c0_148], %294 {strides = array<i32>} : memref<8x128xf32, #tpu.memory_space<vmem>>, vector<8x128xf32>,
    %298 = arith.truncf %296 : vector<8x128xf32> to vector<8x128xbf16>
    %c0_149 = arith.constant 0 : index
    %c128_150 = arith.constant 128 : index
    %299 = vector.load %arg5[%c0_149, %c128_150] : memref<8x256xbf16, #tpu.memory_space<vmem>>, vector<8x128xbf16>
    tpu.vector_store %arg5[%c0_149, %c128_150], %298 {strides = array<i32>} : memref<8x256xbf16, #tpu.memory_space<vmem>>, vector<8x128xbf16>,
    %300 = arith.index_cast %c6_i32 : i32 to index
    %c0_151 = arith.constant 0 : index
    %c0_152 = arith.constant 0 : index
    %301 = vector.load %arg4[%300, %c0_151, %c0_152] : memref<9x8x128xf32, #tpu.memory_space<vmem>>, vector<1x8x128xf32>
    %302 = vector.shape_cast %301 : vector<1x8x128xf32> to vector<8x128xf32>
    %303 = vector.shape_cast %296 : vector<8x128xf32> to vector<1x8x128xf32>
    tpu.vector_store %arg4[%300, %c0_151, %c0_152], %303 {strides = array<i32>} : memref<9x8x128xf32, #tpu.memory_space<vmem>>, vector<1x8x128xf32>,
    %c7_i32 = arith.constant 7 : i32
    %304 = arith.index_cast %c7_i32 : i32 to index
    %c0_153 = arith.constant 0 : index
    %c0_154 = arith.constant 0 : index
    %305 = vector.load %arg1[%304, %c0_153, %c0_154] : memref<9x8x128xbf16, #tpu.memory_space<vmem>>, vector<1x8x128xbf16>
    %306 = vector.shape_cast %305 : vector<1x8x128xbf16> to vector<8x128xbf16>
    %c0_155 = arith.constant 0 : index
    %c0_156 = arith.constant 0 : index
    %307 = vector.load %arg5[%c0_155, %c0_156] : memref<8x256xbf16, #tpu.memory_space<vmem>>, vector<8x128xbf16>
    tpu.vector_store %arg5[%c0_155, %c0_156], %306 {strides = array<i32>} : memref<8x256xbf16, #tpu.memory_space<vmem>>, vector<8x128xbf16>,
    %c0_157 = arith.constant 0 : index
    %c0_158 = arith.constant 0 : index
    %308 = vector.load %arg5[%c0_157, %c0_158] : memref<8x256xbf16, #tpu.memory_space<vmem>>, vector<8x256xbf16>
    %c0_159 = arith.constant 0 : index
    %c0_160 = arith.constant 0 : index
    %309 = vector.load %arg2[%c0_159, %c0_160] : memref<256x512xbf16, #tpu.memory_space<vmem>>, vector<256x512xbf16>
    %cst_161 = arith.constant dense<0.000000e+00> : vector<8x512xf32>
    %310 = tpu.matmul %308, %309, %cst_161 {dimension_numbers = #tpu.dot_dimension_numbers<[1], [0], [0], [1], [0, 0, 1, 1], [], []>} : vector<8x256xbf16>, vector<256x512xbf16>, vector<8x512xf32> -> vector<8x512xf32>
    %c0_162 = arith.constant 0 : index
    %c0_163 = arith.constant 0 : index
    %311 = vector.load %arg3[%c0_162, %c0_163] : memref<1x512xf32, #tpu.memory_space<vmem>>, vector<1x512xf32>
    %312 = vector.broadcast %311 : vector<1x512xf32> to vector<8x512xf32>
    %313 = arith.addf %310, %312 : vector<8x512xf32>
    %314 = vector.extract_strided_slice %313 {offsets = [0, 0], sizes = [8, 128], strides = [1, 1]} : vector<8x512xf32> to vector<8x128xf32>
    %315 = arith.negf %314 : vector<8x128xf32>
    %316 = math.exp %315 : vector<8x128xf32>
    %cst_164 = arith.constant 1.000000e+00 : f32
    %317 = vector.broadcast %cst_164 : f32 to vector<8x128xf32>
    %318 = arith.addf %317, %316 : vector<8x128xf32>
    %319 = arith.divf %317, %318 : vector<8x128xf32>
    %320 = vector.extract_strided_slice %313 {offsets = [0, 128], sizes = [8, 128], strides = [1, 1]} : vector<8x512xf32> to vector<8x128xf32>
    %321 = arith.negf %320 : vector<8x128xf32>
    %322 = math.exp %321 : vector<8x128xf32>
    %cst_165 = arith.constant 1.000000e+00 : f32
    %323 = vector.broadcast %cst_165 : f32 to vector<8x128xf32>
    %324 = arith.addf %323, %322 : vector<8x128xf32>
    %325 = arith.divf %323, %324 : vector<8x128xf32>
    %326 = vector.extract_strided_slice %313 {offsets = [0, 256], sizes = [8, 128], strides = [1, 1]} : vector<8x512xf32> to vector<8x128xf32>
    %327 = math.tanh %326 : vector<8x128xf32>
    %328 = vector.extract_strided_slice %313 {offsets = [0, 384], sizes = [8, 128], strides = [1, 1]} : vector<8x512xf32> to vector<8x128xf32>
    %329 = arith.negf %328 : vector<8x128xf32>
    %330 = math.exp %329 : vector<8x128xf32>
    %cst_166 = arith.constant 1.000000e+00 : f32
    %331 = vector.broadcast %cst_166 : f32 to vector<8x128xf32>
    %332 = arith.addf %331, %330 : vector<8x128xf32>
    %333 = arith.divf %331, %332 : vector<8x128xf32>
    %c0_167 = arith.constant 0 : index
    %c0_168 = arith.constant 0 : index
    %334 = vector.load %arg6[%c0_167, %c0_168] : memref<8x128xf32, #tpu.memory_space<vmem>>, vector<8x128xf32>
    %335 = arith.mulf %325, %334 : vector<8x128xf32>
    %336 = arith.mulf %319, %327 : vector<8x128xf32>
    %337 = arith.addf %335, %336 : vector<8x128xf32>
    %338 = math.tanh %337 : vector<8x128xf32>
    %339 = arith.mulf %333, %338 : vector<8x128xf32>
    %c0_169 = arith.constant 0 : index
    %c0_170 = arith.constant 0 : index
    %340 = vector.load %arg6[%c0_169, %c0_170] : memref<8x128xf32, #tpu.memory_space<vmem>>, vector<8x128xf32>
    tpu.vector_store %arg6[%c0_169, %c0_170], %337 {strides = array<i32>} : memref<8x128xf32, #tpu.memory_space<vmem>>, vector<8x128xf32>,
    %341 = arith.truncf %339 : vector<8x128xf32> to vector<8x128xbf16>
    %c0_171 = arith.constant 0 : index
    %c128_172 = arith.constant 128 : index
    %342 = vector.load %arg5[%c0_171, %c128_172] : memref<8x256xbf16, #tpu.memory_space<vmem>>, vector<8x128xbf16>
    tpu.vector_store %arg5[%c0_171, %c128_172], %341 {strides = array<i32>} : memref<8x256xbf16, #tpu.memory_space<vmem>>, vector<8x128xbf16>,
    %343 = arith.index_cast %c7_i32 : i32 to index
    %c0_173 = arith.constant 0 : index
    %c0_174 = arith.constant 0 : index
    %344 = vector.load %arg4[%343, %c0_173, %c0_174] : memref<9x8x128xf32, #tpu.memory_space<vmem>>, vector<1x8x128xf32>
    %345 = vector.shape_cast %344 : vector<1x8x128xf32> to vector<8x128xf32>
    %346 = vector.shape_cast %339 : vector<8x128xf32> to vector<1x8x128xf32>
    tpu.vector_store %arg4[%343, %c0_173, %c0_174], %346 {strides = array<i32>} : memref<9x8x128xf32, #tpu.memory_space<vmem>>, vector<1x8x128xf32>,
    %c8_i32 = arith.constant 8 : i32
    %347 = arith.index_cast %c8_i32 : i32 to index
    %c0_175 = arith.constant 0 : index
    %c0_176 = arith.constant 0 : index
    %348 = vector.load %arg1[%347, %c0_175, %c0_176] : memref<9x8x128xbf16, #tpu.memory_space<vmem>>, vector<1x8x128xbf16>
    %349 = vector.shape_cast %348 : vector<1x8x128xbf16> to vector<8x128xbf16>
    %c0_177 = arith.constant 0 : index
    %c0_178 = arith.constant 0 : index
    %350 = vector.load %arg5[%c0_177, %c0_178] : memref<8x256xbf16, #tpu.memory_space<vmem>>, vector<8x128xbf16>
    tpu.vector_store %arg5[%c0_177, %c0_178], %349 {strides = array<i32>} : memref<8x256xbf16, #tpu.memory_space<vmem>>, vector<8x128xbf16>,
    %c0_179 = arith.constant 0 : index
    %c0_180 = arith.constant 0 : index
    %351 = vector.load %arg5[%c0_179, %c0_180] : memref<8x256xbf16, #tpu.memory_space<vmem>>, vector<8x256xbf16>
    %c0_181 = arith.constant 0 : index
    %c0_182 = arith.constant 0 : index
    %352 = vector.load %arg2[%c0_181, %c0_182] : memref<256x512xbf16, #tpu.memory_space<vmem>>, vector<256x512xbf16>
    %cst_183 = arith.constant dense<0.000000e+00> : vector<8x512xf32>
    %353 = tpu.matmul %351, %352, %cst_183 {dimension_numbers = #tpu.dot_dimension_numbers<[1], [0], [0], [1], [0, 0, 1, 1], [], []>} : vector<8x256xbf16>, vector<256x512xbf16>, vector<8x512xf32> -> vector<8x512xf32>
    %c0_184 = arith.constant 0 : index
    %c0_185 = arith.constant 0 : index
    %354 = vector.load %arg3[%c0_184, %c0_185] : memref<1x512xf32, #tpu.memory_space<vmem>>, vector<1x512xf32>
    %355 = vector.broadcast %354 : vector<1x512xf32> to vector<8x512xf32>
    %356 = arith.addf %353, %355 : vector<8x512xf32>
    %357 = vector.extract_strided_slice %356 {offsets = [0, 0], sizes = [8, 128], strides = [1, 1]} : vector<8x512xf32> to vector<8x128xf32>
    %358 = arith.negf %357 : vector<8x128xf32>
    %359 = math.exp %358 : vector<8x128xf32>
    %cst_186 = arith.constant 1.000000e+00 : f32
    %360 = vector.broadcast %cst_186 : f32 to vector<8x128xf32>
    %361 = arith.addf %360, %359 : vector<8x128xf32>
    %362 = arith.divf %360, %361 : vector<8x128xf32>
    %363 = vector.extract_strided_slice %356 {offsets = [0, 128], sizes = [8, 128], strides = [1, 1]} : vector<8x512xf32> to vector<8x128xf32>
    %364 = arith.negf %363 : vector<8x128xf32>
    %365 = math.exp %364 : vector<8x128xf32>
    %cst_187 = arith.constant 1.000000e+00 : f32
    %366 = vector.broadcast %cst_187 : f32 to vector<8x128xf32>
    %367 = arith.addf %366, %365 : vector<8x128xf32>
    %368 = arith.divf %366, %367 : vector<8x128xf32>
    %369 = vector.extract_strided_slice %356 {offsets = [0, 256], sizes = [8, 128], strides = [1, 1]} : vector<8x512xf32> to vector<8x128xf32>
    %370 = math.tanh %369 : vector<8x128xf32>
    %371 = vector.extract_strided_slice %356 {offsets = [0, 384], sizes = [8, 128], strides = [1, 1]} : vector<8x512xf32> to vector<8x128xf32>
    %372 = arith.negf %371 : vector<8x128xf32>
    %373 = math.exp %372 : vector<8x128xf32>
    %cst_188 = arith.constant 1.000000e+00 : f32
    %374 = vector.broadcast %cst_188 : f32 to vector<8x128xf32>
    %375 = arith.addf %374, %373 : vector<8x128xf32>
    %376 = arith.divf %374, %375 : vector<8x128xf32>
    %c0_189 = arith.constant 0 : index
    %c0_190 = arith.constant 0 : index
    %377 = vector.load %arg6[%c0_189, %c0_190] : memref<8x128xf32, #tpu.memory_space<vmem>>, vector<8x128xf32>
    %378 = arith.mulf %368, %377 : vector<8x128xf32>
    %379 = arith.mulf %362, %370 : vector<8x128xf32>
    %380 = arith.addf %378, %379 : vector<8x128xf32>
    %381 = math.tanh %380 : vector<8x128xf32>
    %382 = arith.mulf %376, %381 : vector<8x128xf32>
    %c0_191 = arith.constant 0 : index
    %c0_192 = arith.constant 0 : index
    %383 = vector.load %arg6[%c0_191, %c0_192] : memref<8x128xf32, #tpu.memory_space<vmem>>, vector<8x128xf32>
    tpu.vector_store %arg6[%c0_191, %c0_192], %380 {strides = array<i32>} : memref<8x128xf32, #tpu.memory_space<vmem>>, vector<8x128xf32>,
    %384 = arith.truncf %382 : vector<8x128xf32> to vector<8x128xbf16>
    %c0_193 = arith.constant 0 : index
    %c128_194 = arith.constant 128 : index
    %385 = vector.load %arg5[%c0_193, %c128_194] : memref<8x256xbf16, #tpu.memory_space<vmem>>, vector<8x128xbf16>
    tpu.vector_store %arg5[%c0_193, %c128_194], %384 {strides = array<i32>} : memref<8x256xbf16, #tpu.memory_space<vmem>>, vector<8x128xbf16>,
    %386 = arith.index_cast %c8_i32 : i32 to index
    %c0_195 = arith.constant 0 : index
    %c0_196 = arith.constant 0 : index
    %387 = vector.load %arg4[%386, %c0_195, %c0_196] : memref<9x8x128xf32, #tpu.memory_space<vmem>>, vector<1x8x128xf32>
    %388 = vector.shape_cast %387 : vector<1x8x128xf32> to vector<8x128xf32>
    %389 = vector.shape_cast %382 : vector<8x128xf32> to vector<1x8x128xf32>
    tpu.vector_store %arg4[%386, %c0_195, %c0_196], %389 {strides = array<i32>} : memref<9x8x128xf32, #tpu.memory_space<vmem>>, vector<1x8x128xf32>,
    %c9_i32 = arith.constant 9 : i32
    return
  }
  func.func @transform_0(%arg0: i32) -> (i32, i32, i32) {
    %c0_i32 = arith.constant 0 : i32
    %c0_i32_0 = arith.constant 0 : i32
    %c0_i32_1 = arith.constant 0 : i32
    return %arg0, %c0_i32, %c0_i32_0 : i32, i32, i32
  }
  func.func @transform_1(%arg0: i32) -> (i32, i32) {
    %c0_i32 = arith.constant 0 : i32
    %c0_i32_0 = arith.constant 0 : i32
    %c0_i32_1 = arith.constant 0 : i32
    return %c0_i32, %c0_i32_0 : i32, i32
  }
  func.func @transform_2(%arg0: i32) -> (i32, i32) {
    %c0_i32 = arith.constant 0 : i32
    %c0_i32_0 = arith.constant 0 : i32
    %c0_i32_1 = arith.constant 0 : i32
    return %c0_i32, %c0_i32_0 : i32, i32
  }
  func.func @transform_3(%arg0: i32) -> (i32, i32, i32) {
    %c0_i32 = arith.constant 0 : i32
    %c0_i32_0 = arith.constant 0 : i32
    %c0_i32_1 = arith.constant 0 : i32
    return %arg0, %c0_i32, %c0_i32_0 : i32, i32, i32
  }
}

</mosaic_0001>

<bundles_post_ra>
// kernel: decoder_rnn_forward.3
= control target key start
LH: loop header
LB: loop body
LE: loop exit
PB: predicated region body
PF: predicated region fallthrough
CT: control target
= control target key end

     0   :  { %v269_v0 = vmov 0.0   ;;  %vm270_vm0 = vmmov 0   ;;  %s377_s1 = inlined_call_operand.vmem [shape: bf16[128,128], index: 1, kind: input, shape index: {}]   ;;  %s378_s0 = inlined_call_operand.vmem [shape: f32[72,128], index: 0, kind: input, shape index: {}]   ;;  %s379_s2 = inlined_call_operand.vmem [shape: f32[1,128], index: 2, kind: input, shape index: {}]   ;;  %s380_s3 = inlined_call_operand.vmem [shape: f32[72,128], index: 3, kind: output, shape index: {}]  }
   0x1   :  { %207 = vmatprep.subr.bf16.mxu0 %v269_v0  ;;  %v261_v1 = vld [vmem:[%s377_s1] sm:$0xff]   ;;  %243 = vmatprep.subr.bf16.mxu1 %v269_v0  ;;  %v262_v2 = vld [vmem:[%s377_s1 + $0x8] sm:$0xff]   ;;  %v263_v3 = vld [vmem:[%s377_s1 + $0x10] sm:$0xff]  }
   0x2   :  { %223 = vmatprep.mubr.msk.bf16.mxu0 %vm270_vm0, %v269_v0  ;;  %235 = vmatprep.mubr.msk.bf16.mxu1 %vm270_vm0, %v269_v0  ;;  %v264_v4 = vld [vmem:[%s377_s1 + $0x18] sm:$0xff]   ;;  %v265_v5 = vld [vmem:[%s377_s1 + $0x20] sm:$0xff]   ;;  %v266_v6 = vld [vmem:[%s377_s1 + $0x28] sm:$0xff]  }
   0x3   :  { %208 = vmatpush3.bf16.msra.mxu0 %v261_v1  ;;  %251 = vmatpush3.bf16.msra.mxu1 %v261_v1  ;;  %v267_v7 = vld [vmem:[%s377_s1 + $0x30] sm:$0xff]   ;;  %v268_v8 = vld [vmem:[%s377_s1 + $0x38] sm:$0xff]   ;;  %v15_v9 = vld [vmem:[%s378_s0] sm:$0xff] }
   0x4   :  { %209 = vmatprep.subr.bf16.mxu0 %v269_v0  ;;  %244 = vmatprep.subr.bf16.mxu1 %v269_v0  ;;  %v16_v10 = vld [vmem:[%s378_s0 + $0x8] sm:$0xff]  ;;  %v21_v11 = vld [vmem:[%s378_s0 + $0x30] sm:$0xff]  ;;  %v22_v12 = vld [vmem:[%s378_s0 + $0x38] sm:$0xff] }
   0x5   :  { %v24_v13 = vpack.c.bf16 %v16_v10, %v15_v9  ;;  %v27_v14 = vpack.c.bf16 %v22_v12, %v21_v11  ;;  %v17_v15 = vld [vmem:[%s378_s0 + $0x10] sm:$0xff]  ;;  %v18_v16 = vld [vmem:[%s378_s0 + $0x18] sm:$0xff]  ;;  %v23_v17 = vld [vmem:[%s378_s0 + $0x40] sm:$0xff] }
   0x6   :  { %v25_v18 = vpack.c.bf16 %v18_v16, %v17_v15  ;;  %v28_v19 = vpack.c.bf16 %v23_v17, %v23_v17  ;;  %v19_v20 = vld [vmem:[%s378_s0 + $0x20] sm:$0xff]  ;;  %v20_v21 = vld [vmem:[%s378_s0 + $0x28] sm:$0xff] }
   0x7   :  { %210 = vmatpush3.bf16.msra.mxu0 %v262_v2  ;;  %252 = vmatpush3.bf16.msra.mxu1 %v262_v2  ;;  %v26_v22 = vpack.c.bf16 %v20_v21, %v19_v20  ;;  %v185_v23 = vld [vmem:[%s379_s2] ss:$0 sm:$0xff] }
   0x8   :  { %211 = vmatprep.subr.bf16.mxu0 %v269_v0  ;;  %245 = vmatprep.subr.bf16.mxu1 %v269_v0 }
   0xb   :  { %212 = vmatpush3.bf16.msra.mxu0 %v263_v3  ;;  %253 = vmatpush3.bf16.msra.mxu1 %v263_v3 }
   0xc   :  { %213 = vmatprep.subr.bf16.mxu0 %v269_v0  ;;  %246 = vmatprep.subr.bf16.mxu1 %v269_v0 }
   0xf   :  { %214 = vmatpush3.bf16.msra.mxu0 %v264_v4  ;;  %254 = vmatpush3.bf16.msra.mxu1 %v264_v4 }
  0x10   :  { %215 = vmatprep.subr.bf16.mxu0 %v269_v0  ;;  %247 = vmatprep.subr.bf16.mxu1 %v269_v0 }
  0x13   :  { %216 = vmatpush3.bf16.msra.mxu0 %v265_v5  ;;  %255 = vmatpush3.bf16.msra.mxu1 %v265_v5 }
  0x14   :  { %217 = vmatprep.subr.bf16.mxu0 %v269_v0  ;;  %248 = vmatprep.subr.bf16.mxu1 %v269_v0 }
  0x17   :  { %218 = vmatpush3.bf16.msra.mxu0 %v266_v6  ;;  %256 = vmatpush3.bf16.msra.mxu1 %v266_v6 }
  0x18   :  { %219 = vmatprep.subr.bf16.mxu0 %v269_v0  ;;  %249 = vmatprep.subr.bf16.mxu1 %v269_v0 }
  0x1b   :  { %220 = vmatpush3.bf16.msra.mxu0 %v267_v7  ;;  %257 = vmatpush3.bf16.msra.mxu1 %v267_v7 }
  0x1c   :  { %221 = vmatprep.subr.bf16.mxu0 %v269_v0  ;;  %250 = vmatprep.subr.bf16.mxu1 %v269_v0 }
  0x1f   :  { %222 = vmatpush3.bf16.msra.mxu0 %v268_v8  ;;  %258 = vmatpush3.bf16.msra.mxu1 %v268_v8 }
  0x22   :  { %224 = vmatmul.mubr.bf16.vlgmr.msra.gmra.mrb[0].mxu0 %v24_v13  ;;  %236 = vmatmul.mubr.bf16.vlgmr.msra.gmra.mrb[0].mxu1 %v27_v14 }
  0x23   :  { %227 = vmatprep.mubr.msk.bf16.mxu0 %vm270_vm0, %v269_v0  ;;  %239 = vmatprep.mubr.msk.bf16.mxu1 %vm270_vm0, %v269_v0 }
  0x2a   :  { %228 = vmatmul.mubr.bf16.gmra.mrb[4].mxu0 %v25_v18  ;;  %240 = vmatmul.mubr.bf16.gmra.mrb[4].mxu1 %v28_v19 }
  0x2b   :  { %231 = vmatprep.mubr.msk.bf16.mxu0 %vm270_vm0, %v269_v0 }
  0x32   :  { %232 = vmatmul.mubr.bf16.gmra.mrb[8].mxu0 %v26_v22 }
  0xf5   :  { %v134_v24 = vpop.f32.mrb[0].mxu0  ;;  %v158_v25 = vpop.f32.mrb[0].mxu1 }
  0xf6   :  { %v135_v26 = vadd.f32 %v185_v23, %v134_v24  ;;  %v225_v27 = vpop.f32.mrb[1].mxu0  ;;  %v159_v28 = vadd.f32 %v185_v23, %v158_v25  ;;  %v237_v29 = vpop.f32.mrb[1].mxu1 }
  0xf7   :  { %v137_v30 = vpop.f32.mrb[2].mxu0  ;;  %v161_v31 = vpop.f32.mrb[2].mxu1 }
  0xf8   :  { %172 = vst [vmem:[%s380_s3] sm:$0xff] %v135_v26  ;;  %v138_v32 = vadd.f32 %v185_v23, %v137_v30  ;;  %v226_v33 = vpop.f32.mrb[3].mxu0  ;;  %178 = vst [vmem:[%s380_s3 + $0x30] sm:$0xff] %v159_v28  ;;  %v162_v34 = vadd.f32 %v185_v23, %v161_v31  ;;  %v238_v35 = vpop.f32.mrb[3].mxu1 }
  0xfa   :  { %173 = vst [vmem:[%s380_s3 + $0x8] sm:$0xff] %v138_v32  ;;  %179 = vst [vmem:[%s380_s3 + $0x38] sm:$0xff] %v162_v34 }
  0xfd   :  { %v142_v36 = vpop.f32.mrb[4].mxu0  ;;  %v166_v37 = vpop.f32.mrb[4].mxu1 }
  0xfe   :  { %v143_v38 = vadd.f32 %v185_v23, %v142_v36  ;;  %v229_v39 = vpop.f32.mrb[5].mxu0  ;;  %v167_v40 = vadd.f32 %v185_v23, %v166_v37  ;;  %v241_v41 = vpop.f32.mrb[5].mxu1 }
  0xff   :  { %v145_v42 = vpop.f32.mrb[6].mxu0  ;;  %v169_v43 = vpop.f32.mrb[6].mxu1 }
 0x100   :  { %174 = vst [vmem:[%s380_s3 + $0x10] sm:$0xff] %v143_v38  ;;  %v146_v44 = vadd.f32 %v185_v23, %v145_v42  ;;  %v230_v45 = vpop.f32.mrb[7].mxu0  ;;  %180 = vst [vmem:[%s380_s3 + $0x40] sm:$0xff] %v167_v40  ;;  %v242_v46 = vpop.f32.mrb[7].mxu1 }
 0x102   :  { %175 = vst [vmem:[%s380_s3 + $0x18] sm:$0xff] %v146_v44 }
 0x105   :  { %v150_v47 = vpop.f32.mrb[8].mxu0 }
 0x106   :  { %v151_v48 = vadd.f32 %v185_v23, %v150_v47  ;;  %v233_v49 = vpop.f32.mrb[9].mxu0 }
 0x107   :  { %v153_v50 = vpop.f32.mrb[10].mxu0 }
 0x108   :  { %176 = vst [vmem:[%s380_s3 + $0x20] sm:$0xff] %v151_v48  ;;  %v154_v51 = vadd.f32 %v185_v23, %v153_v50  ;;  %v234_v52 = vpop.f32.mrb[11].mxu0 }
 0x10a   :  { %177 = vst [vmem:[%s380_s3 + $0x28] sm:$0xff] %v154_v51 }

// kernel: decoder_rnn_forward.2
= control target key start
LH: loop header
LB: loop body
LE: loop exit
PB: predicated region body
PF: predicated region fallthrough
CT: control target
= control target key end

     0   :  { %v5869_v1 = vmov 0   ;;  %s7579_s1 = inlined_call_operand.vmem [shape: bf16[256,512], index: 1, kind: input, shape index: {}]   ;;  %s7580_s0 = inlined_call_operand.vmem [shape: bf16[9,8,128], index: 0, kind: input, shape index: {}]   ;;  %s7581_s2 = inlined_call_operand.vmem [shape: f32[1,512], index: 2, kind: input, shape index: {}]   ;;  %s7582_s3 = inlined_call_operand.vmem [shape: f32[9,8,128], index: 3, kind: output, shape index: {}]  }
   0x1   :  { %v5893_v0 = vld [vmem:[%s7579_s1 + $0x4] ss:$16 sps:$4 sm:$0xff]   ;;  %19 = vst [vmem:[#allocation2] sm:$0xff] %v5869_v1  ;;  %v5898_v2 = vld [vmem:[%s7579_s1] ss:$16 sps:$4 sm:$0xff]  }
   0x2   :  { %437 = vmatprep.subr.bf16.mxu0 %v5893_v0  ;;  %v5904_v3 = vld [vmem:[%s7579_s1 + $0x24] ss:$16 sps:$4 sm:$0xff]   ;;  %v5910_v4 = vld [vmem:[%s7579_s1 + $0x20] ss:$16 sps:$4 sm:$0xff]   ;;  %v5921_v6 = vld [vmem:[%s7579_s1 + $0xc] ss:$16 sps:$4 sm:$0xff]  }
   0x3   :  { %438 = vmatpush1.bf16.msra.mxu0 %v5898_v2  ;;  %v5916_v5 = vld [vmem:[%s7579_s1 + $0x44] ss:$16 sps:$4 sm:$0xff]   ;;  %v5926_v7 = vld [vmem:[%s7579_s1 + $0x8] ss:$16 sps:$4 sm:$0xff]   ;;  %v5932_v8 = vld [vmem:[%s7579_s1 + $0x40] ss:$16 sps:$4 sm:$0xff]   ;;  %478 = vmatprep.subr.bf16.mxu1 %v5921_v6 }
   0x4   :  { %439 = vmatprep.subr.bf16.mxu0 %v5904_v3  ;;  %v5939_v9 = vld [vmem:[%s7579_s1 + $0x64] ss:$16 sps:$4 sm:$0xff]   ;;  %479 = vmatpush1.bf16.msra.mxu1 %v5926_v7  ;;  %v5945_v10 = vld [vmem:[%s7579_s1 + $0x2c] ss:$16 sps:$4 sm:$0xff]   ;;  %v5950_v11 = vld [vmem:[%s7579_s1 + $0x28] ss:$16 sps:$4 sm:$0xff]  }
   0x5   :  { %480 = vmatprep.subr.bf16.mxu1 %v5945_v10  ;;  %v5957_v12 = vld [vmem:[%s7579_s1 + $0x60] ss:$16 sps:$4 sm:$0xff]   ;;  %v5962_v13 = vld [vmem:[%s7579_s1 + $0x84] ss:$16 sps:$4 sm:$0xff]   ;;  %v5967_v14 = vld [vmem:[%s7579_s1 + $0x4c] ss:$16 sps:$4 sm:$0xff]  }
   0x6   :  { %v5974_v15 = vld [vmem:[%s7579_s1 + $0x48] ss:$16 sps:$4 sm:$0xff]   ;;  %v5980_v16 = vld [vmem:[%s7579_s1 + $0x6c] ss:$16 sps:$4 sm:$0xff]   ;;  %v5986_v17 = vld [vmem:[%s7579_s1 + $0x80] ss:$16 sps:$4 sm:$0xff]  }
   0x7   :  { %440 = vmatpush1.bf16.msra.mxu0 %v5910_v4  ;;  %v5992_v18 = vld [vmem:[%s7579_s1 + $0xa4] ss:$16 sps:$4 sm:$0xff]   ;;  %v5998_v19 = vld [vmem:[%s7579_s1 + $0x68] ss:$16 sps:$4 sm:$0xff]   ;;  %v6004_v20 = vld [vmem:[%s7579_s1 + $0x8c] ss:$16 sps:$4 sm:$0xff]  }
   0x8   :  { %441 = vmatprep.subr.bf16.mxu0 %v5916_v5  ;;  %481 = vmatpush1.bf16.msra.mxu1 %v5950_v11  ;;  %v6010_v21 = vld [vmem:[%s7579_s1 + $0xa0] ss:$16 sps:$4 sm:$0xff]   ;;  %v6015_v22 = vld [vmem:[%s7579_s1 + $0xc4] ss:$16 sps:$4 sm:$0xff]   ;;  %v6022_v23 = vld [vmem:[%s7579_s1 + $0x88] ss:$16 sps:$4 sm:$0xff]  }
   0x9   :  { %482 = vmatprep.subr.bf16.mxu1 %v5967_v14  ;;  %v6028_v24 = vld [vmem:[%s7579_s1 + $0xac] ss:$16 sps:$4 sm:$0xff]   ;;  %v6034_v25 = vld [vmem:[%s7579_s1 + $0xc0] ss:$16 sps:$4 sm:$0xff]   ;;  %v6040_v26 = vld [vmem:[%s7579_s1 + $0xe4] ss:$16 sps:$4 sm:$0xff]  }
   0xa   :  { %v6046_v27 = vld [vmem:[%s7579_s1 + $0xa8] ss:$16 sps:$4 sm:$0xff]   ;;  %v6052_v28 = vld [vmem:[%s7579_s1 + $0xcc] ss:$16 sps:$4 sm:$0xff]   ;;  %v6058_v29 = vld [vmem:[%s7579_s1 + $0xe0] ss:$16 sps:$4 sm:$0xff]  }
   0xb   :  { %442 = vmatpush1.bf16.msra.mxu0 %v5932_v8  ;;  %v6063_v30 = vld [vmem:[%s7579_s1 + $0x104] ss:$16 sps:$4 sm:$0xff]   ;;  %v6070_v31 = vld [vmem:[%s7579_s1 + $0xc8] ss:$16 sps:$4 sm:$0xff]   ;;  %v6076_v32 = vld [vmem:[%s7579_s1 + $0xec] ss:$16 sps:$4 sm:$0xff]  }
   0xc   :  { %443 = vmatprep.subr.bf16.mxu0 %v5939_v9  ;;  %483 = vmatpush1.bf16.msra.mxu1 %v5974_v15  ;;  %v6082_v33 = vld [vmem:[%s7579_s1 + $0x100] ss:$16 sps:$4 sm:$0xff]   ;;  %v6088_v34 = vld [vmem:[%s7579_s1 + $0x124] ss:$16 sps:$4 sm:$0xff]   ;;  %v6094_v35 = vld [vmem:[%s7579_s1 + $0xe8] ss:$16 sps:$4 sm:$0xff]  }
   0xd   :  { %484 = vmatprep.subr.bf16.mxu1 %v5980_v16  ;;  %v6100_v36 = vld [vmem:[%s7579_s1 + $0x10c] ss:$16 sps:$4 sm:$0xff]   ;;  %v6106_v37 = vld [vmem:[%s7579_s1 + $0x120] ss:$16 sps:$4 sm:$0xff]   ;;  %v6111_v38 = vld [vmem:[%s7579_s1 + $0x144] ss:$16 sps:$4 sm:$0xff]  }
   0xe   :  { %v6118_v39 = vld [vmem:[%s7579_s1 + $0x108] ss:$16 sps:$4 sm:$0xff]   ;;  %v6124_v40 = vld [vmem:[%s7579_s1 + $0x12c] ss:$16 sps:$4 sm:$0xff]   ;;  %v6129_v41 = vld [vmem:[%s7579_s1 + $0x140] ss:$16 sps:$4 sm:$0xff]  }
   0xf   :  { %444 = vmatpush1.bf16.msra.mxu0 %v5957_v12  ;;  %v21_v42 = vld [vmem:[%s7580_s0] sm:$0xf]  ;;  %v6138_v43 = vld [vmem:[%s7579_s1 + $0x164] ss:$16 sps:$4 sm:$0xff]   ;;  %v6145_v44 = vld [vmem:[%s7579_s1 + $0x128] ss:$16 sps:$4 sm:$0xff]  }
  0x10   :  { %445 = vmatprep.subr.bf16.mxu0 %v5962_v13  ;;  %485 = vmatpush1.bf16.msra.mxu1 %v5998_v19  ;;  %22 = vst [vmem:[#allocation2] sm:$0xf] %v21_v42  ;;  %v6150_v45 = vld [vmem:[%s7579_s1 + $0x160] ss:$16 sps:$4 sm:$0xff]   ;;  %v6156_v46 = vld [vmem:[%s7579_s1 + $0x14c] ss:$16 sps:$4 sm:$0xff]  }
  0x11   :  { %486 = vmatprep.subr.bf16.mxu1 %v6004_v20  ;;  %7704 = vst [vmem:[#allocation4_spill] sm:$0xff] %v6150_v45  ;;  %v6161_v47 = vld [vmem:[%s7579_s1 + $0x184] ss:$16 sps:$4 sm:$0xff]   ;;  %v6166_v48 = vld [vmem:[%s7579_s1 + $0x148] ss:$16 sps:$4 sm:$0xff]  }
  0x12   :  { %7705 = vst [vmem:[#allocation5_spill] sm:$0xff] %v6161_v47  ;;  %v6172_v49 = vld [vmem:[%s7579_s1 + $0x16c] ss:$16 sps:$4 sm:$0xff]   ;;  %v6179_v50 = vld [vmem:[%s7579_s1 + $0x180] ss:$16 sps:$4 sm:$0xff]  }
  0x13   :  { %446 = vmatpush1.bf16.msra.mxu0 %v5986_v17  ;;  %7706 = vst [vmem:[#allocation6_spill] sm:$0xff] %v6172_v49  ;;  %7707 = vst [vmem:[#allocation7_spill] sm:$0xff] %v6179_v50  ;;  %v6185_v51 = vld [vmem:[%s7579_s1 + $0x1a4] ss:$16 sps:$4 sm:$0xff]   ;;  %v6190_v52 = vld [vmem:[%s7579_s1 + $0x168] ss:$16 sps:$4 sm:$0xff]  }
  0x14   :  { %447 = vmatprep.subr.bf16.mxu0 %v5992_v18  ;;  %487 = vmatpush1.bf16.msra.mxu1 %v6022_v23  ;;  %7708 = vst [vmem:[#allocation8_spill] sm:$0xff] %v6185_v51  ;;  %7709 = vst [vmem:[#allocation9_spill] sm:$0xff] %v6190_v52  ;;  %v6196_v54 = vld [vmem:[%s7579_s1 + $0x18c] ss:$16 sps:$4 sm:$0xff]   ;;  %v6203_v56 = vld [vmem:[%s7579_s1 + $0x1a0] ss:$16 sps:$4 sm:$0xff]  }
  0x15   :  { %488 = vmatprep.subr.bf16.mxu1 %v6028_v24  ;;  %7710 = vst [vmem:[#allocation10_spill] sm:$0xff] %v6196_v54  ;;  %7711 = vst [vmem:[#allocation11_spill] sm:$0xff] %v6203_v56  ;;  %v6209_v57 = vld [vmem:[%s7579_s1 + $0x1c4] ss:$16 sps:$4 sm:$0xff]   ;;  %v6214_v58 = vld [vmem:[%s7579_s1 + $0x188] ss:$16 sps:$4 sm:$0xff]  }
  0x16   :  { %7712 = vst [vmem:[#allocation12_spill] sm:$0xff] %v6209_v57  ;;  %7713 = vst [vmem:[#allocation13_spill] sm:$0xff] %v6214_v58  ;;  %v6220_v59 = vld [vmem:[%s7579_s1 + $0x1ac] ss:$16 sps:$4 sm:$0xff]   ;;  %v6227_v60 = vld [vmem:[%s7579_s1 + $0x1c0] ss:$16 sps:$4 sm:$0xff]  }
  0x17   :  { %448 = vmatpush1.bf16.msra.mxu0 %v6010_v21  ;;  %v23_v53 = vld [vmem:[#allocation2] sm:$0xff]  ;;  %7714 = vst [vmem:[#allocation14_spill] sm:$0xff] %v6220_v59  ;;  %7715 = vst [vmem:[#allocation15_spill] sm:$0xff] %v6227_v60  ;;  %v6238_v62 = vld [vmem:[%s7579_s1 + $0x1a8] ss:$16 sps:$4 sm:$0xff]  }
  0x18   :  { %449 = vmatprep.subr.bf16.mxu0 %v6015_v22  ;;  %489 = vmatpush1.bf16.msra.mxu1 %v6046_v27  ;;  %v4785_v55 = vcombine.high %v23_v53, %v23_v53  ;;  %v6233_v61 = vld [vmem:[%s7579_s1 + $0x1e4] ss:$16 sps:$4 sm:$0xff]   ;;  %7717 = vst [vmem:[#allocation17_spill] sm:$0xff] %v6238_v62  ;;  %v6244_v63 = vld [vmem:[%s7579_s1 + $0x1cc] ss:$16 sps:$4 sm:$0xff]  }
  0x19   :  { %490 = vmatprep.subr.bf16.mxu1 %v6052_v28  ;;  %7716 = vst [vmem:[#allocation16_spill] sm:$0xff] %v6233_v61  ;;  %7718 = vst [vmem:[#allocation18_spill] sm:$0xff] %v6244_v63  ;;  %v6251_v1 = vld [vmem:[%s7579_s1 + $0x1e0] ss:$16 sps:$4 sm:$0xff]   ;;  %v6257_v42 = vld [vmem:[%s7579_s1 + $0x1c8] ss:$16 sps:$4 sm:$0xff]  }
  0x1a   :  { %469 = vmatprep.mubr.bf16.mxu0 %v4785_v55  ;;  %510 = vmatprep.mubr.bf16.mxu1 %v4785_v55  ;;  %7719 = vst [vmem:[#allocation19_spill] sm:$0xff] %v6251_v1  ;;  %7720 = vst [vmem:[#allocation20_spill] sm:$0xff] %v6257_v42  ;;  %v6263_v55 = vld [vmem:[%s7579_s1 + $0x1ec] ss:$16 sps:$4 sm:$0xff]  }
  0x1b   :  { %450 = vmatpush1.bf16.msra.mxu0 %v6034_v25  ;;  %7721 = vst [vmem:[#allocation21_spill] sm:$0xff] %v6263_v55 }
  0x1c   :  { %451 = vmatprep.subr.bf16.mxu0 %v6040_v26  ;;  %491 = vmatpush1.bf16.msra.mxu1 %v6070_v31 }
  0x1d   :  { %492 = vmatprep.subr.bf16.mxu1 %v6076_v32 }
  0x1f   :  { %452 = vmatpush1.bf16.msra.mxu0 %v6058_v29 }
  0x20   :  { %453 = vmatprep.subr.bf16.mxu0 %v6063_v30  ;;  %493 = vmatpush1.bf16.msra.mxu1 %v6094_v35 }
  0x21   :  { %494 = vmatprep.subr.bf16.mxu1 %v6100_v36 }
  0x23   :  { %454 = vmatpush1.bf16.msra.mxu0 %v6082_v33 }
  0x24   :  { %455 = vmatprep.subr.bf16.mxu0 %v6088_v34  ;;  %495 = vmatpush1.bf16.msra.mxu1 %v6118_v39 }
  0x25   :  { %496 = vmatprep.subr.bf16.mxu1 %v6124_v40 }
  0x27   :  { %456 = vmatpush1.bf16.msra.mxu0 %v6106_v37 }
  0x28   :  { %457 = vmatprep.subr.bf16.mxu0 %v6111_v38  ;;  %497 = vmatpush1.bf16.msra.mxu1 %v6145_v44 }
  0x29   :  { %498 = vmatprep.subr.bf16.mxu1 %v6156_v46 }
  0x2b   :  { %458 = vmatpush1.bf16.msra.mxu0 %v6129_v41 }
  0x2c   :  { %459 = vmatprep.subr.bf16.mxu0 %v6138_v43  ;;  %499 = vmatpush1.bf16.msra.mxu1 %v6166_v48 }
  0x2d   :  { %500 = vmatprep.subr.bf16.mxu1 %v6172_v49 }
  0x2f   :  { %460 = vmatpush1.bf16.msra.mxu0 %v6150_v45 }
  0x30   :  { %461 = vmatprep.subr.bf16.mxu0 %v6161_v47  ;;  %501 = vmatpush1.bf16.msra.mxu1 %v6190_v52 }
  0x31   :  { %502 = vmatprep.subr.bf16.mxu1 %v6196_v54 }
  0x33   :  { %462 = vmatpush1.bf16.msra.mxu0 %v6179_v50 }
  0x34   :  { %463 = vmatprep.subr.bf16.mxu0 %v6185_v51  ;;  %503 = vmatpush1.bf16.msra.mxu1 %v6214_v58 }
  0x35   :  { %504 = vmatprep.subr.bf16.mxu1 %v6220_v59  ;;  %v6271_v59 = vld [vmem:[%s7579_s1 + $0x1e8] ss:$16 sps:$4 sm:$0xff]  }
  0x36   :  { %7722 = vst [vmem:[#allocation22_spill] sm:$0xff] %v6271_v59 }
  0x37   :  { %464 = vmatpush1.bf16.msra.mxu0 %v6203_v56 }
  0x38   :  { %465 = vmatprep.subr.bf16.mxu0 %v6209_v57  ;;  %505 = vmatpush1.bf16.msra.mxu1 %v6238_v62  ;;  %v4784_v57 = vcombine.low %v23_v53, %v23_v53  ;;  %v7723_v53 = vld [vmem:[#allocation12_spill] sm:$0xff] }
  0x39   :  { %506 = vmatprep.subr.bf16.mxu1 %v6244_v63 }
  0x3b   :  { %466 = vmatpush1.bf16.msra.mxu0 %v6227_v60 }
  0x3c   :  { %467 = vmatprep.subr.bf16.mxu0 %v6233_v61  ;;  %507 = vmatpush1.bf16.msra.mxu1 %v6257_v42 }
  0x3d   :  { %508 = vmatprep.subr.bf16.mxu1 %v6263_v55 }
  0x3f   :  { %468 = vmatpush1.bf16.msra.mxu0 %v6251_v1 }
  0x40   :  { %965 = vmatprep.subr.bf16.mxu0 %v5893_v0  ;;  %509 = vmatpush1.bf16.msra.mxu1 %v6271_v59 }
  0x41   :  { %1006 = vmatprep.subr.bf16.mxu1 %v5921_v6 }
  0x42   :  { %470 = vmatmul.mubr.bf16.vlgmr.msra.gmra.mrb[0].mxu0 %v4784_v57 }
  0x43   :  { %966 = vmatpush1.bf16.msra.mxu0 %v5898_v2  ;;  %511 = vmatmul.mubr.bf16.vlgmr.msra.gmra.mrb[0].mxu1 %v4784_v57  ;;  %v7724_v57 = vld [vmem:[#allocation14_spill] sm:$0xff] }
  0x44   :  { %967 = vmatprep.subr.bf16.mxu0 %v5904_v3  ;;  %1007 = vmatpush1.bf16.msra.mxu1 %v5926_v7 }
  0x45   :  { %1008 = vmatprep.subr.bf16.mxu1 %v5945_v10 }
  0x47   :  { %968 = vmatpush1.bf16.msra.mxu0 %v5910_v4 }
  0x48   :  { %969 = vmatprep.subr.bf16.mxu0 %v5916_v5  ;;  %1009 = vmatpush1.bf16.msra.mxu1 %v5950_v11 }
  0x49   :  { %1010 = vmatprep.subr.bf16.mxu1 %v5967_v14 }
  0x4b   :  { %970 = vmatpush1.bf16.msra.mxu0 %v5932_v8 }
  0x4c   :  { %971 = vmatprep.subr.bf16.mxu0 %v5939_v9  ;;  %1011 = vmatpush1.bf16.msra.mxu1 %v5974_v15 }
  0x4d   :  { %1012 = vmatprep.subr.bf16.mxu1 %v5980_v16 }
  0x4f   :  { %972 = vmatpush1.bf16.msra.mxu0 %v5957_v12 }
  0x50   :  { %973 = vmatprep.subr.bf16.mxu0 %v5962_v13  ;;  %1013 = vmatpush1.bf16.msra.mxu1 %v5998_v19 }
  0x51   :  { %1014 = vmatprep.subr.bf16.mxu1 %v6004_v20 }
  0x53   :  { %974 = vmatpush1.bf16.msra.mxu0 %v5986_v17 }
  0x54   :  { %975 = vmatprep.subr.bf16.mxu0 %v5992_v18  ;;  %1015 = vmatpush1.bf16.msra.mxu1 %v6022_v23 }
  0x55   :  { %1016 = vmatprep.subr.bf16.mxu1 %v6028_v24 }
  0x57   :  { %976 = vmatpush1.bf16.msra.mxu0 %v6010_v21 }
  0x58   :  { %977 = vmatprep.subr.bf16.mxu0 %v6015_v22  ;;  %1017 = vmatpush1.bf16.msra.mxu1 %v6046_v27 }
  0x59   :  { %1018 = vmatprep.subr.bf16.mxu1 %v6052_v28 }
  0x5b   :  { %978 = vmatpush1.bf16.msra.mxu0 %v6034_v25 }
  0x5c   :  { %979 = vmatprep.subr.bf16.mxu0 %v6040_v26  ;;  %1019 = vmatpush1.bf16.msra.mxu1 %v6070_v31 }
  0x5d   :  { %1020 = vmatprep.subr.bf16.mxu1 %v6076_v32 }
  0x5f   :  { %980 = vmatpush1.bf16.msra.mxu0 %v6058_v29 }
  0x60   :  { %981 = vmatprep.subr.bf16.mxu0 %v6063_v30  ;;  %1021 = vmatpush1.bf16.msra.mxu1 %v6094_v35 }
  0x61   :  { %1022 = vmatprep.subr.bf16.mxu1 %v6100_v36 }
  0x63   :  { %982 = vmatpush1.bf16.msra.mxu0 %v6082_v33 }
  0x64   :  { %983 = vmatprep.subr.bf16.mxu0 %v6088_v34  ;;  %1023 = vmatpush1.bf16.msra.mxu1 %v6118_v39 }
  0x65   :  { %1024 = vmatprep.subr.bf16.mxu1 %v6124_v40 }
  0x67   :  { %984 = vmatpush1.bf16.msra.mxu0 %v6106_v37 }
  0x68   :  { %985 = vmatprep.subr.bf16.mxu0 %v6111_v38  ;;  %1025 = vmatpush1.bf16.msra.mxu1 %v6145_v44 }
  0x69   :  { %1026 = vmatprep.subr.bf16.mxu1 %v6156_v46 }
  0x6b   :  { %986 = vmatpush1.bf16.msra.mxu0 %v6129_v41 }
  0x6c   :  { %987 = vmatprep.subr.bf16.mxu0 %v6138_v43  ;;  %1027 = vmatpush1.bf16.msra.mxu1 %v6166_v48 }
  0x6d   :  { %1028 = vmatprep.subr.bf16.mxu1 %v6172_v49 }
  0x6f   :  { %988 = vmatpush1.bf16.msra.mxu0 %v6150_v45 }
  0x70   :  { %989 = vmatprep.subr.bf16.mxu0 %v6161_v47  ;;  %1029 = vmatpush1.bf16.msra.mxu1 %v6190_v52 }
  0x71   :  { %1030 = vmatprep.subr.bf16.mxu1 %v6196_v54 }
  0x73   :  { %990 = vmatpush1.bf16.msra.mxu0 %v6179_v50 }
  0x74   :  { %991 = vmatprep.subr.bf16.mxu0 %v6185_v51  ;;  %1031 = vmatpush1.bf16.msra.mxu1 %v6214_v58 }
  0x75   :  { %1032 = vmatprep.subr.bf16.mxu1 %v7724_v57 }
  0x77   :  { %992 = vmatpush1.bf16.msra.mxu0 %v6203_v56 }
  0x78   :  { %993 = vmatprep.subr.bf16.mxu0 %v7723_v53  ;;  %1033 = vmatpush1.bf16.msra.mxu1 %v6238_v62 }
  0x79   :  { %1034 = vmatprep.subr.bf16.mxu1 %v6244_v63 }
  0x7b   :  { %994 = vmatpush1.bf16.msra.mxu0 %v6227_v60  ;;  %v4853_v60 = vld [vmem:[%s7580_s0 + $0x4] sm:$0xf] }
  0x7c   :  { %995 = vmatprep.subr.bf16.mxu0 %v6233_v61  ;;  %1035 = vmatpush1.bf16.msra.mxu1 %v6257_v42  ;;  %550 = vst [vmem:[#allocation2] sm:$0xf] %v4853_v60  ;;  %v90_v61 = vlaneseq }
  0x7d   :  { %1036 = vmatprep.subr.bf16.mxu1 %v6263_v55 }
  0x7e   :  { %v91_v53 = vshrl.u32 %v90_v61, 7 }
  0x7f   :  { %996 = vmatpush1.bf16.msra.mxu0 %v6251_v1  ;;  %v88_v1 = vld [vmem:[%s7581_s2] sm:$0xf] }
  0x80   :  { %1494 = vmatprep.subr.bf16.mxu0 %v5893_v0  ;;  %1037 = vmatpush1.bf16.msra.mxu1 %v6271_v59  ;;  %v6346_v63 = vsub.s32 0, %v91_v53  ;;  %v6351_v0 = vsub.s32 1, %v91_v53  ;;  %v6358_v54 = vsub.s32 2, %v91_v53 }
  0x81   :  { %1535 = vmatprep.subr.bf16.mxu1 %v5921_v6  ;;  %v6355_v6 = vsub.s32 3, %v91_v53 }
  0x82   :  { %7725 = vst [vmem:[#allocation23_spill] sm:$0xff] %v6346_v63  ;;  %7726 = vst [vmem:[#allocation24_spill] sm:$0xff] %v6351_v0  ;;  %v93_v55 = vrot.slane %v88_v1, %v6346_v63  ;;  %v97_v59 = vrot.slane %v88_v1, %v6351_v0  ;;  %v101_v45 = vrot.slane %v88_v1, %v6358_v54 }
  0x83   :  { %v105_v58 = vrot.slane %v88_v1, %v6355_v6 }
 0x115   :  { %v471_v42 = vpop.f32.mrb[0].mxu0 }
 0x116   :  { %v472_v62 = vadd.f32 %v471_v42, %v93_v55  ;;  %v473_v56 = vpop.f32.mrb[1].mxu0  ;;  %v512_v47 = vpop.f32.mrb[0].mxu1 }
 0x117   :  { %v474_v60 = vadd.f32 %v473_v56, %v97_v59  ;;  %v475_v57 = vpop.f32.mrb[2].mxu0  ;;  %v514_v63 = vpop.f32.mrb[1].mxu1  ;;  %v513_v55 = vadd.f32 %v512_v47, %v101_v45 }
 0x118   :  { %v4850_v61 = vmul.f32 -1.442695, %v472_v62  ;;  %v476_v51 = vpop.f32.mrb[3].mxu0  ;;  %v515_v52 = vadd.f32 %v514_v63, %v105_v58  ;;  %v516_v0 = vpop.f32.mrb[2].mxu1 }
 0x119   :  { %v4851_v50 = vmul.f32 -1.442695, %v474_v60  ;;  %v517_v49 = vpop.f32.mrb[3].mxu1 }
 0x11a   :  { %5725 = vpow2.f32 %v4850_v61  ;;  %v4852_v42 = vmul.f32 -1.442695, %v515_v52 }
 0x11b   :  { %5727 = vpow2.f32 %v4851_v50 }
 0x11c   :  { %5729 = vpow2.f32 %v4852_v42 }
 0x11d   :  { %5731 = vtanh.f32 %v513_v55 }
 0x124   :  { %v5726_v56 = vpop.eup %5725 }
 0x125   :  { %v5728_v59 = vpop.eup %5727  ;;  %v522_v51 = vadd.f32 1.0, %v5726_v56 }
 0x126   :  { %v528_v62 = vadd.f32 1.0, %v5728_v59  ;;  %v5730_v53 = vpop.eup %5729 }
 0x127   :  { %5733 = vrcp.f32 %v522_v51  ;;  %v5732_v57 = vpop.eup %5731  ;;  %v535_v50 = vadd.f32 1.0, %v5730_v53 }
 0x128   :  { %5735 = vrcp.f32 %v528_v62 }
 0x129   :  { %5737 = vrcp.f32 %v535_v50 }
 0x131   :  { %v5734_v60 = vpop.eup %5733 }
 0x132   :  { %v5736_v61 = vpop.eup %5735  ;;  %v540_v58 = vmul.f32 %v5734_v60, %v5732_v57 }
 0x133   :  { %v539_v63 = vmul.f32 0.0, %v5736_v61  ;;  %v5738_v45 = vpop.eup %5737 }
 0x135   :  { %v6361_v0 = vadd.f32 %v540_v58, %v539_v63 }
 0x137   :  { %5739 = vtanh.f32 %v6361_v0 }
 0x141   :  { %v5740_v47 = vpop.eup %5739 }
 0x142   :  { %v543_v49 = vmul.f32 %v5740_v47, %v5738_v45 }
 0x144   :  { %v545_v52 = vpack.c.bf16 %v543_v49, %v543_v49  ;;  %547 = vst [vmem:[%s7582_s3] sm:$0xff] %v543_v49 }
 0x146   :  { %546 = vst [vmem:[#allocation2 + $0x4] sm:$0xf] %v545_v52 }
 0x14d   :  { %v551_v1 = vld [vmem:[#allocation2] sm:$0xff] }
 0x14e   :  { %v4855_v42 = vcombine.high %v551_v1, %v551_v1  ;;  %v4854_v55 = vcombine.low %v551_v1, %v551_v1 }
 0x150   :  { %997 = vmatprep.mubr.bf16.mxu0 %v4855_v42  ;;  %1038 = vmatprep.mubr.bf16.mxu1 %v4855_v42 }
 0x151   :  { %998 = vmatmul.mubr.bf16.vlgmr.msra.gmra.mrb[4].mxu0 %v4854_v55  ;;  %1039 = vmatmul.mubr.bf16.vlgmr.msra.gmra.mrb[4].mxu1 %v4854_v55 }
 0x152   :  { %1495 = vmatpush1.bf16.msra.mxu0 %v5898_v2  ;;  %1536 = vmatpush1.bf16.msra.mxu1 %v5926_v7  ;;  %v7727_v2 = vld [vmem:[#allocation6_spill] sm:$0xff] }
 0x153   :  { %1496 = vmatprep.subr.bf16.mxu0 %v5904_v3  ;;  %1537 = vmatprep.subr.bf16.mxu1 %v5945_v10  ;;  %v7728_v3 = vld [vmem:[#allocation4_spill] sm:$0xff]  ;;  %v7731_v7 = vld [vmem:[#allocation10_spill] sm:$0xff] }
 0x154   :  { %v7734_v10 = vld [vmem:[#allocation8_spill] sm:$0xff] }
 0x156   :  { %1497 = vmatpush1.bf16.msra.mxu0 %v5910_v4  ;;  %1538 = vmatpush1.bf16.msra.mxu1 %v5950_v11  ;;  %v7729_v4 = vld [vmem:[#allocation9_spill] sm:$0xff]  ;;  %v7735_v11 = vld [vmem:[#allocation14_spill] sm:$0xff] }
 0x157   :  { %1498 = vmatprep.subr.bf16.mxu0 %v5916_v5  ;;  %1539 = vmatprep.subr.bf16.mxu1 %v5967_v14  ;;  %v7730_v5 = vld [vmem:[#allocation5_spill] sm:$0xff]  ;;  %v7738_v14 = vld [vmem:[#allocation12_spill] sm:$0xff] }
 0x15a   :  { %1499 = vmatpush1.bf16.msra.mxu0 %v5932_v8  ;;  %1540 = vmatpush1.bf16.msra.mxu1 %v5974_v15  ;;  %v7732_v8 = vld [vmem:[#allocation7_spill] sm:$0xff]  ;;  %v7739_v15 = vld [vmem:[#allocation18_spill] sm:$0xff] }
 0x15b   :  { %1500 = vmatprep.subr.bf16.mxu0 %v5939_v9  ;;  %1541 = vmatprep.subr.bf16.mxu1 %v5980_v16  ;;  %v7733_v9 = vld [vmem:[#allocation13_spill] sm:$0xff]  ;;  %v7740_v16 = vld [vmem:[#allocation15_spill] sm:$0xff] }
 0x15e   :  { %1501 = vmatpush1.bf16.msra.mxu0 %v5957_v12  ;;  %1542 = vmatpush1.bf16.msra.mxu1 %v5998_v19  ;;  %v7736_v12 = vld [vmem:[#allocation11_spill] sm:$0xff]  ;;  %v7743_v19 = vld [vmem:[#allocation21_spill] sm:$0xff] }
 0x15f   :  { %1502 = vmatprep.subr.bf16.mxu0 %v5962_v13  ;;  %1543 = vmatprep.subr.bf16.mxu1 %v6004_v20  ;;  %v7737_v13 = vld [vmem:[#allocation17_spill] sm:$0xff]  ;;  %v7744_v20 = vld [vmem:[#allocation19_spill] sm:$0xff] }
 0x162   :  { %1503 = vmatpush1.bf16.msra.mxu0 %v5986_v17  ;;  %1544 = vmatpush1.bf16.msra.mxu1 %v6022_v23  ;;  %v7741_v17 = vld [vmem:[#allocation20_spill] sm:$0xff]  ;;  %v6435_v23 = vld [vmem:[%s7579_s1 + $0x4] ss:$16 sps:$4 sm:$0xff]  }
 0x163   :  { %1504 = vmatprep.subr.bf16.mxu0 %v5992_v18  ;;  %1545 = vmatprep.subr.bf16.mxu1 %v6028_v24  ;;  %v7742_v18 = vld [vmem:[#allocation16_spill] sm:$0xff]  ;;  %7746 = vst [vmem:[#allocation6_spill] sm:$0xff] %v6435_v23 }
 0x164   :  { %v6440_v24 = vld [vmem:[%s7579_s1 + $0xc] ss:$16 sps:$4 sm:$0xff]  }
 0x165   :  { %7747 = vst [vmem:[#allocation4_spill] sm:$0xff] %v6440_v24 }
 0x166   :  { %1505 = vmatpush1.bf16.msra.mxu0 %v6010_v21  ;;  %1546 = vmatpush1.bf16.msra.mxu1 %v6046_v27  ;;  %v7745_v21 = vld [vmem:[#allocation22_spill] sm:$0xff] }
 0x167   :  { %1506 = vmatprep.subr.bf16.mxu0 %v6015_v22  ;;  %1547 = vmatprep.subr.bf16.mxu1 %v6052_v28  ;;  %v4924_v22 = vld [vmem:[%s7580_s0 + $0x8] sm:$0xf] }
 0x168   :  { %1079 = vst [vmem:[#allocation2] sm:$0xf] %v4924_v22  ;;  %v7749_v28 = vld [vmem:[#allocation24_spill] sm:$0xff]  ;;  %v6569_v22 = vld [vmem:[%s7579_s1 + $0xa4] ss:$16 sps:$4 sm:$0xff]  }
 0x16a   :  { %1507 = vmatpush1.bf16.msra.mxu0 %v6034_v25  ;;  %1548 = vmatpush1.bf16.msra.mxu1 %v6070_v31  ;;  %v616_v25 = vld [vmem:[%s7581_s2] sm:$0xf] }
 0x16b   :  { %1508 = vmatprep.subr.bf16.mxu0 %v6040_v26  ;;  %1549 = vmatprep.subr.bf16.mxu1 %v6076_v32  ;;  %v7748_v26 = vld [vmem:[#allocation23_spill] sm:$0xff] }
 0x16c   :  { %v621_v27 = vrot.slane %v616_v25, %v7748_v26 }
 0x16e   :  { %1509 = vmatpush1.bf16.msra.mxu0 %v6058_v29  ;;  %1550 = vmatpush1.bf16.msra.mxu1 %v6094_v35  ;;  %v625_v29 = vrot.slane %v616_v25, %v7749_v28 }
 0x16f   :  { %1510 = vmatprep.subr.bf16.mxu0 %v6063_v30  ;;  %1551 = vmatprep.subr.bf16.mxu1 %v6100_v36 }
 0x172   :  { %1511 = vmatpush1.bf16.msra.mxu0 %v6082_v33  ;;  %1552 = vmatpush1.bf16.msra.mxu1 %v6118_v39 }
 0x173   :  { %1512 = vmatprep.subr.bf16.mxu0 %v6088_v34  ;;  %1553 = vmatprep.subr.bf16.mxu1 %v6124_v40 }
 0x176   :  { %1513 = vmatpush1.bf16.msra.mxu0 %v6106_v37  ;;  %1554 = vmatpush1.bf16.msra.mxu1 %v6145_v44 }
 0x177   :  { %1514 = vmatprep.subr.bf16.mxu0 %v6111_v38  ;;  %1555 = vmatprep.subr.bf16.mxu1 %v6156_v46  ;;  %v629_v46 = vrot.slane %v616_v25, %v6358_v54 }
 0x17a   :  { %1515 = vmatpush1.bf16.msra.mxu0 %v6129_v41  ;;  %1556 = vmatpush1.bf16.msra.mxu1 %v6166_v48 }
 0x17b   :  { %1516 = vmatprep.subr.bf16.mxu0 %v6138_v43  ;;  %1557 = vmatprep.subr.bf16.mxu1 %v7727_v2  ;;  %v633_v43 = vrot.slane %v616_v25, %v6355_v6  ;;  %v6574_v25 = vld [vmem:[%s7579_s1 + $0xac] ss:$16 sps:$4 sm:$0xff]  }
 0x17e   :  { %1517 = vmatpush1.bf16.msra.mxu0 %v7728_v3  ;;  %1558 = vmatpush1.bf16.msra.mxu1 %v7729_v4  ;;  %v6466_v4 = vld [vmem:[%s7579_s1 + $0x8] ss:$16 sps:$4 sm:$0xff]  }
 0x17f   :  { %1518 = vmatprep.subr.bf16.mxu0 %v7730_v5  ;;  %1559 = vmatprep.subr.bf16.mxu1 %v7731_v7  ;;  %v6473_v5 = vld [vmem:[%s7579_s1 + $0x24] ss:$16 sps:$4 sm:$0xff]   ;;  %v6478_v7 = vld [vmem:[%s7579_s1 + $0x2c] ss:$16 sps:$4 sm:$0xff]  }
 0x182   :  { %1519 = vmatpush1.bf16.msra.mxu0 %v7732_v8  ;;  %1560 = vmatpush1.bf16.msra.mxu1 %v7733_v9  ;;  %v6483_v8 = vld [vmem:[%s7579_s1 + $0x20] ss:$16 sps:$4 sm:$0xff]   ;;  %v6488_v9 = vld [vmem:[%s7579_s1 + $0x28] ss:$16 sps:$4 sm:$0xff]  }
 0x183   :  { %1520 = vmatprep.subr.bf16.mxu0 %v7734_v10  ;;  %1561 = vmatprep.subr.bf16.mxu1 %v7735_v11  ;;  %v6497_v10 = vld [vmem:[%s7579_s1 + $0x44] ss:$16 sps:$4 sm:$0xff]   ;;  %v6502_v11 = vld [vmem:[%s7579_s1 + $0x4c] ss:$16 sps:$4 sm:$0xff]  }
 0x186   :  { %1521 = vmatpush1.bf16.msra.mxu0 %v7736_v12  ;;  %1562 = vmatpush1.bf16.msra.mxu1 %v7737_v13  ;;  %v6507_v12 = vld [vmem:[%s7579_s1 + $0x40] ss:$16 sps:$4 sm:$0xff]   ;;  %v6512_v13 = vld [vmem:[%s7579_s1 + $0x48] ss:$16 sps:$4 sm:$0xff]  }
 0x187   :  { %1522 = vmatprep.subr.bf16.mxu0 %v7738_v14  ;;  %1563 = vmatprep.subr.bf16.mxu1 %v7739_v15  ;;  %v6521_v14 = vld [vmem:[%s7579_s1 + $0x64] ss:$16 sps:$4 sm:$0xff]   ;;  %v6526_v15 = vld [vmem:[%s7579_s1 + $0x6c] ss:$16 sps:$4 sm:$0xff]  }
 0x18a   :  { %1523 = vmatpush1.bf16.msra.mxu0 %v7740_v16  ;;  %1564 = vmatpush1.bf16.msra.mxu1 %v7741_v17  ;;  %v6531_v16 = vld [vmem:[%s7579_s1 + $0x60] ss:$16 sps:$4 sm:$0xff]   ;;  %v6536_v17 = vld [vmem:[%s7579_s1 + $0x68] ss:$16 sps:$4 sm:$0xff]  }
 0x18b   :  { %1524 = vmatprep.subr.bf16.mxu0 %v7742_v18  ;;  %1565 = vmatprep.subr.bf16.mxu1 %v7743_v19  ;;  %v6545_v18 = vld [vmem:[%s7579_s1 + $0x84] ss:$16 sps:$4 sm:$0xff]   ;;  %v6550_v19 = vld [vmem:[%s7579_s1 + $0x8c] ss:$16 sps:$4 sm:$0xff]  }
 0x18e   :  { %1525 = vmatpush1.bf16.msra.mxu0 %v7744_v20  ;;  %1566 = vmatpush1.bf16.msra.mxu1 %v7745_v21  ;;  %v6555_v20 = vld [vmem:[%s7579_s1 + $0x80] ss:$16 sps:$4 sm:$0xff]   ;;  %v6560_v21 = vld [vmem:[%s7579_s1 + $0x88] ss:$16 sps:$4 sm:$0xff]  }
 0x18f   :  { %2023 = vmatprep.subr.bf16.mxu0 %v6435_v23  ;;  %2064 = vmatprep.subr.bf16.mxu1 %v6440_v24 }
 0x224   :  { %v999_v30 = vpop.f32.mrb[4].mxu0  ;;  %v1040_v31 = vpop.f32.mrb[4].mxu1 }
 0x225   :  { %v1000_v32 = vadd.f32 %v999_v30, %v621_v27  ;;  %v1001_v33 = vpop.f32.mrb[5].mxu0  ;;  %v1042_v34 = vpop.f32.mrb[5].mxu1  ;;  %v1041_v56 = vadd.f32 %v1040_v31, %v629_v46  ;;  %v6579_v27 = vld [vmem:[%s7579_s1 + $0xa0] ss:$16 sps:$4 sm:$0xff]   ;;  %v6593_v30 = vld [vmem:[%s7579_s1 + $0xc4] ss:$16 sps:$4 sm:$0xff]  }
 0x226   :  { %v1002_v35 = vadd.f32 %v1001_v33, %v625_v29  ;;  %v1003_v36 = vpop.f32.mrb[6].mxu0  ;;  %v1044_v37 = vpop.f32.mrb[6].mxu1  ;;  %v1043_v44 = vadd.f32 %v1042_v34, %v633_v43  ;;  %v6584_v29 = vld [vmem:[%s7579_s1 + $0xa8] ss:$16 sps:$4 sm:$0xff]   ;;  %v6598_v31 = vld [vmem:[%s7579_s1 + $0xcc] ss:$16 sps:$4 sm:$0xff]  }
 0x227   :  { %v4920_v38 = vmul.f32 -1.442695, %v1000_v32  ;;  %v1004_v39 = vpop.f32.mrb[7].mxu0  ;;  %v1045_v40 = vpop.f32.mrb[7].mxu1  ;;  %v6603_v32 = vld [vmem:[%s7579_s1 + $0xc0] ss:$16 sps:$4 sm:$0xff]  }
 0x228   :  { %v4921_v41 = vmul.f32 -1.442695, %v1002_v35  ;;  %v4922_v48 = vmul.f32 -1.442695, %v1043_v44  ;;  %v6608_v33 = vld [vmem:[%s7579_s1 + $0xc8] ss:$16 sps:$4 sm:$0xff]  }
 0x229   :  { %5741 = vpow2.f32 %v4920_v38  ;;  %v6617_v34 = vld [vmem:[%s7579_s1 + $0xe4] ss:$16 sps:$4 sm:$0xff]   ;;  %v6622_v35 = vld [vmem:[%s7579_s1 + $0xec] ss:$16 sps:$4 sm:$0xff]   ;;  %v6627_v36 = vld [vmem:[%s7579_s1 + $0xe0] ss:$16 sps:$4 sm:$0xff]  }
 0x22a   :  { %5743 = vpow2.f32 %v4921_v41  ;;  %v6632_v37 = vld [vmem:[%s7579_s1 + $0xe8] ss:$16 sps:$4 sm:$0xff]   ;;  %v6641_v38 = vld [vmem:[%s7579_s1 + $0x104] ss:$16 sps:$4 sm:$0xff]   ;;  %v6646_v39 = vld [vmem:[%s7579_s1 + $0x10c] ss:$16 sps:$4 sm:$0xff]  }
 0x22b   :  { %5745 = vpow2.f32 %v4922_v48  ;;  %v6651_v40 = vld [vmem:[%s7579_s1 + $0x100] ss:$16 sps:$4 sm:$0xff]   ;;  %v6656_v41 = vld [vmem:[%s7579_s1 + $0x108] ss:$16 sps:$4 sm:$0xff]   ;;  %v6665_v43 = vld [vmem:[%s7579_s1 + $0x124] ss:$16 sps:$4 sm:$0xff]  }
 0x22c   :  { %5747 = vtanh.f32 %v1041_v56  ;;  %v6670_v44 = vld [vmem:[%s7579_s1 + $0x12c] ss:$16 sps:$4 sm:$0xff]   ;;  %v6675_v46 = vld [vmem:[%s7579_s1 + $0x120] ss:$16 sps:$4 sm:$0xff]   ;;  %v6680_v48 = vld [vmem:[%s7579_s1 + $0x128] ss:$16 sps:$4 sm:$0xff]  }
 0x22d   :  { %v6689_v56 = vld [vmem:[%s7579_s1 + $0x144] ss:$16 sps:$4 sm:$0xff]  }
 0x233   :  { %v5742_v59 = vpop.eup %5741 }
 0x234   :  { %v5744_v51 = vpop.eup %5743  ;;  %v1050_v62 = vadd.f32 1.0, %v5742_v59  ;;  %v6694_v59 = vld [vmem:[%s7579_s1 + $0x14c] ss:$16 sps:$4 sm:$0xff]  }
 0x235   :  { %v1056_v53 = vadd.f32 1.0, %v5744_v51  ;;  %v5746_v57 = vpop.eup %5745  ;;  %v6699_v51 = vld [vmem:[%s7579_s1 + $0x140] ss:$16 sps:$4 sm:$0xff]  }
 0x236   :  { %5749 = vrcp.f32 %v1050_v62  ;;  %v5748_v60 = vpop.eup %5747  ;;  %v1063_v63 = vadd.f32 1.0, %v5746_v57  ;;  %7750 = vst [vmem:[#allocation9_spill] sm:$0xff] %v6699_v51  ;;  %v6704_v62 = vld [vmem:[%s7579_s1 + $0x148] ss:$16 sps:$4 sm:$0xff]   ;;  %v6718_v57 = vld [vmem:[%s7579_s1 + $0x16c] ss:$16 sps:$4 sm:$0xff]  }
 0x237   :  { %5751 = vrcp.f32 %v1056_v53  ;;  %7751 = vst [vmem:[#allocation5_spill] sm:$0xff] %v6704_v62  ;;  %v6713_v53 = vld [vmem:[%s7579_s1 + $0x164] ss:$16 sps:$4 sm:$0xff]   ;;  %7753 = vst [vmem:[#allocation7_spill] sm:$0xff] %v6718_v57 }
 0x238   :  { %5753 = vrcp.f32 %v1063_v63  ;;  %7752 = vst [vmem:[#allocation10_spill] sm:$0xff] %v6713_v53  ;;  %v6747_v63 = vld [vmem:[%s7579_s1 + $0x180] ss:$16 sps:$4 sm:$0xff]  }
 0x239   :  { %7758 = vst [vmem:[#allocation17_spill] sm:$0xff] %v6747_v63 }
 0x240   :  { %v5750_v50 = vpop.eup %5749 }
 0x241   :  { %v5752_v61 = vpop.eup %5751  ;;  %v1068_v58 = vmul.f32 %v5750_v50, %v5748_v60  ;;  %v6723_v60 = vld [vmem:[%s7579_s1 + $0x160] ss:$16 sps:$4 sm:$0xff]   ;;  %v6728_v50 = vld [vmem:[%s7579_s1 + $0x168] ss:$16 sps:$4 sm:$0xff]  }
 0x242   :  { %v1067_v45 = vmul.f32 %v5752_v61, %v6361_v0  ;;  %v5754_v49 = vpop.eup %5753  ;;  %v6461_v0 = vld [vmem:[%s7579_s1] ss:$16 sps:$4 sm:$0xff]   ;;  %7754 = vst [vmem:[#allocation13_spill] sm:$0xff] %v6723_v60  ;;  %7755 = vst [vmem:[#allocation8_spill] sm:$0xff] %v6728_v50  ;;  %v6737_v61 = vld [vmem:[%s7579_s1 + $0x184] ss:$16 sps:$4 sm:$0xff]  }
 0x243   :  { %7756 = vst [vmem:[#allocation14_spill] sm:$0xff] %v6737_v61 }
 0x244   :  { %v6452_v47 = vadd.f32 %v1068_v58, %v1067_v45  ;;  %v6742_v58 = vld [vmem:[%s7579_s1 + $0x18c] ss:$16 sps:$4 sm:$0xff]   ;;  %v6752_v45 = vld [vmem:[%s7579_s1 + $0x188] ss:$16 sps:$4 sm:$0xff]  }
 0x245   :  { %7757 = vst [vmem:[#allocation11_spill] sm:$0xff] %v6742_v58  ;;  %7759 = vst [vmem:[#allocation12_spill] sm:$0xff] %v6752_v45 }
 0x246   :  { %5755 = vtanh.f32 %v6452_v47 }
 0x250   :  { %v5756_v52 = vpop.eup %5755 }
 0x251   :  { %v1071_v1 = vmul.f32 %v5756_v52, %v5754_v49  ;;  %v6761_v49 = vld [vmem:[%s7579_s1 + $0x1a4] ss:$16 sps:$4 sm:$0xff]   ;;  %v6766_v52 = vld [vmem:[%s7579_s1 + $0x1ac] ss:$16 sps:$4 sm:$0xff]  }
 0x252   :  { %7760 = vst [vmem:[#allocation18_spill] sm:$0xff] %v6761_v49  ;;  %7761 = vst [vmem:[#allocation15_spill] sm:$0xff] %v6766_v52 }
 0x253   :  { %v1073_v42 = vpack.c.bf16 %v1071_v1, %v1071_v1  ;;  %4923 = vst [vmem:[%s7582_s3 + $0x8] sm:$0xff] %v1071_v1  ;;  %v6771_v1 = vld [vmem:[%s7579_s1 + $0x1a0] ss:$16 sps:$4 sm:$0xff]  }
 0x254   :  { %7762 = vst [vmem:[#allocation20_spill] sm:$0xff] %v6771_v1 }
 0x255   :  { %1074 = vst [vmem:[#allocation2 + $0x4] sm:$0xf] %v1073_v42  ;;  %v6776_v42 = vld [vmem:[%s7579_s1 + $0x1a8] ss:$16 sps:$4 sm:$0xff]  }
 0x256   :  { %7763 = vst [vmem:[#allocation16_spill] sm:$0xff] %v6776_v42 }
 0x25c   :  { %v1080_v55 = vld [vmem:[#allocation2] sm:$0xff] }
 0x25d   :  { %v4926_v2 = vcombine.high %v1080_v55, %v1080_v55  ;;  %v4925_v3 = vcombine.low %v1080_v55, %v1080_v55  ;;  %v6783_v55 = vld [vmem:[%s7579_s1 + $0x1c4] ss:$16 sps:$4 sm:$0xff]  }
 0x25e   :  { %7764 = vst [vmem:[#allocation21_spill] sm:$0xff] %v6783_v55 }
 0x25f   :  { %1526 = vmatprep.mubr.bf16.mxu0 %v4926_v2  ;;  %1567 = vmatprep.mubr.bf16.mxu1 %v4926_v2  ;;  %v6790_v2 = vld [vmem:[%s7579_s1 + $0x1c0] ss:$16 sps:$4 sm:$0xff]  }
 0x260   :  { %1527 = vmatmul.mubr.bf16.vlgmr.msra.gmra.mrb[8].mxu0 %v4925_v3  ;;  %1568 = vmatmul.mubr.bf16.vlgmr.msra.gmra.mrb[8].mxu1 %v4925_v3  ;;  %7765 = vst [vmem:[#allocation19_spill] sm:$0xff] %v6790_v2  ;;  %v6795_v3 = vld [vmem:[%s7579_s1 + $0x1c8] ss:$16 sps:$4 sm:$0xff]  }
 0x261   :  { %2024 = vmatpush1.bf16.msra.mxu0 %v6461_v0  ;;  %2065 = vmatpush1.bf16.msra.mxu1 %v6466_v4  ;;  %7766 = vst [vmem:[#allocation22_spill] sm:$0xff] %v6795_v3 }
 0x262   :  { %2025 = vmatprep.subr.bf16.mxu0 %v6473_v5  ;;  %2066 = vmatprep.subr.bf16.mxu1 %v6478_v7 }
 0x265   :  { %2026 = vmatpush1.bf16.msra.mxu0 %v6483_v8  ;;  %2067 = vmatpush1.bf16.msra.mxu1 %v6488_v9 }
 0x266   :  { %2027 = vmatprep.subr.bf16.mxu0 %v6497_v10  ;;  %2068 = vmatprep.subr.bf16.mxu1 %v6502_v11 }
 0x269   :  { %2028 = vmatpush1.bf16.msra.mxu0 %v6507_v12  ;;  %2069 = vmatpush1.bf16.msra.mxu1 %v6512_v13 }
 0x26a   :  { %2029 = vmatprep.subr.bf16.mxu0 %v6521_v14  ;;  %2070 = vmatprep.subr.bf16.mxu1 %v6526_v15 }
 0x26d   :  { %2030 = vmatpush1.bf16.msra.mxu0 %v6531_v16  ;;  %2071 = vmatpush1.bf16.msra.mxu1 %v6536_v17 }
 0x26e   :  { %2031 = vmatprep.subr.bf16.mxu0 %v6545_v18  ;;  %2072 = vmatprep.subr.bf16.mxu1 %v6550_v19 }
 0x271   :  { %2032 = vmatpush1.bf16.msra.mxu0 %v6555_v20  ;;  %2073 = vmatpush1.bf16.msra.mxu1 %v6560_v21 }
 0x272   :  { %2033 = vmatprep.subr.bf16.mxu0 %v6569_v22  ;;  %2074 = vmatprep.subr.bf16.mxu1 %v6574_v25 }
 0x275   :  { %2034 = vmatpush1.bf16.msra.mxu0 %v6579_v27  ;;  %2075 = vmatpush1.bf16.msra.mxu1 %v6584_v29 }
 0x276   :  { %2035 = vmatprep.subr.bf16.mxu0 %v6593_v30  ;;  %2076 = vmatprep.subr.bf16.mxu1 %v6598_v31 }
 0x279   :  { %2036 = vmatpush1.bf16.msra.mxu0 %v6603_v32  ;;  %2077 = vmatpush1.bf16.msra.mxu1 %v6608_v33 }
 0x27a   :  { %2037 = vmatprep.subr.bf16.mxu0 %v6617_v34  ;;  %2078 = vmatprep.subr.bf16.mxu1 %v6622_v35 }
 0x27d   :  { %2038 = vmatpush1.bf16.msra.mxu0 %v6627_v36  ;;  %2079 = vmatpush1.bf16.msra.mxu1 %v6632_v37 }
 0x27e   :  { %2039 = vmatprep.subr.bf16.mxu0 %v6641_v38  ;;  %2080 = vmatprep.subr.bf16.mxu1 %v6646_v39 }
 0x281   :  { %2040 = vmatpush1.bf16.msra.mxu0 %v6651_v40  ;;  %2081 = vmatpush1.bf16.msra.mxu1 %v6656_v41 }
 0x282   :  { %2041 = vmatprep.subr.bf16.mxu0 %v6665_v43  ;;  %2082 = vmatprep.subr.bf16.mxu1 %v6670_v44 }
 0x285   :  { %2042 = vmatpush1.bf16.msra.mxu0 %v6675_v46  ;;  %2083 = vmatpush1.bf16.msra.mxu1 %v6680_v48 }
 0x286   :  { %2043 = vmatprep.subr.bf16.mxu0 %v6689_v56  ;;  %2084 = vmatprep.subr.bf16.mxu1 %v6694_v59 }
 0x289   :  { %2044 = vmatpush1.bf16.msra.mxu0 %v6699_v51  ;;  %2085 = vmatpush1.bf16.msra.mxu1 %v6704_v62 }
 0x28a   :  { %2045 = vmatprep.subr.bf16.mxu0 %v6713_v53  ;;  %2086 = vmatprep.subr.bf16.mxu1 %v6718_v57 }
 0x28d   :  { %2046 = vmatpush1.bf16.msra.mxu0 %v6723_v60  ;;  %2087 = vmatpush1.bf16.msra.mxu1 %v6728_v50 }
 0x28e   :  { %2047 = vmatprep.subr.bf16.mxu0 %v6737_v61  ;;  %2088 = vmatprep.subr.bf16.mxu1 %v6742_v58 }
 0x291   :  { %2048 = vmatpush1.bf16.msra.mxu0 %v6747_v63  ;;  %2089 = vmatpush1.bf16.msra.mxu1 %v6752_v45  ;;  %v6827_v45 = vld [vmem:[%s7579_s1 + $0x1e8] ss:$16 sps:$4 sm:$0xff]  }
 0x292   :  { %2049 = vmatprep.subr.bf16.mxu0 %v6761_v49  ;;  %2090 = vmatprep.subr.bf16.mxu1 %v6766_v52  ;;  %v6800_v52 = vld [vmem:[%s7579_s1 + $0x1cc] ss:$16 sps:$4 sm:$0xff]   ;;  %7771 = vst [vmem:[#allocation29_spill] sm:$0xff] %v6827_v45 }
 0x293   :  { %7767 = vst [vmem:[#allocation25_spill] sm:$0xff] %v6800_v52  ;;  %v4995_v49 = vld [vmem:[%s7580_s0 + $0xc] sm:$0xf] }
 0x294   :  { %1608 = vst [vmem:[#allocation2] sm:$0xf] %v4995_v49  ;;  %v1145_v49 = vld [vmem:[%s7581_s2] sm:$0xf] }
 0x295   :  { %2050 = vmatpush1.bf16.msra.mxu0 %v6771_v1  ;;  %2091 = vmatpush1.bf16.msra.mxu1 %v6776_v42  ;;  %v6806_v42 = vld [vmem:[%s7579_s1 + $0x1e4] ss:$16 sps:$4 sm:$0xff]   ;;  %v6811_v1 = vld [vmem:[%s7579_s1 + $0x1ec] ss:$16 sps:$4 sm:$0xff]   ;;  %v1162_v57 = vrot.slane %v1145_v49, %v6355_v6 }
 0x296   :  { %2051 = vmatprep.subr.bf16.mxu0 %v6783_v55  ;;  %7768 = vst [vmem:[#allocation26_spill] sm:$0xff] %v6806_v42  ;;  %7769 = vst [vmem:[#allocation27_spill] sm:$0xff] %v6811_v1  ;;  %2092 = vmatprep.subr.bf16.mxu1 %v6800_v52  ;;  %v6822_v55 = vld [vmem:[%s7579_s1 + $0x1e0] ss:$16 sps:$4 sm:$0xff]  }
 0x297   :  { %7770 = vst [vmem:[#allocation28_spill] sm:$0xff] %v6822_v55 }
 0x299   :  { %2052 = vmatpush1.bf16.msra.mxu0 %v6790_v2  ;;  %2093 = vmatpush1.bf16.msra.mxu1 %v6795_v3  ;;  %v1150_v3 = vrot.slane %v1145_v49, %v7748_v26  ;;  %v1154_v2 = vrot.slane %v1145_v49, %v7749_v28  ;;  %v1158_v26 = vrot.slane %v1145_v49, %v6358_v54  ;;  %v7775_v49 = vld [vmem:[#allocation7_spill] sm:$0xff] }
 0x29a   :  { %2053 = vmatprep.subr.bf16.mxu0 %v6806_v42  ;;  %2094 = vmatprep.subr.bf16.mxu1 %v6811_v1 }
 0x29d   :  { %2054 = vmatpush1.bf16.msra.mxu0 %v6822_v55  ;;  %2095 = vmatpush1.bf16.msra.mxu1 %v6827_v45 }
 0x29e   :  { %2552 = vmatprep.subr.bf16.mxu0 %v6435_v23  ;;  %2593 = vmatprep.subr.bf16.mxu1 %v6440_v24 }
 0x333   :  { %v1528_v52 = vpop.f32.mrb[8].mxu0  ;;  %v1569_v42 = vpop.f32.mrb[8].mxu1 }
 0x334   :  { %v1529_v63 = vadd.f32 %v1528_v52, %v1150_v3  ;;  %v1530_v1 = vpop.f32.mrb[9].mxu0  ;;  %v1571_v58 = vpop.f32.mrb[9].mxu1  ;;  %v1570_v62 = vadd.f32 %v1569_v42, %v1158_v26 }
 0x335   :  { %v1531_v55 = vadd.f32 %v1530_v1, %v1154_v2  ;;  %v1532_v61 = vpop.f32.mrb[10].mxu0  ;;  %v1573_v45 = vpop.f32.mrb[10].mxu1  ;;  %v1572_v53 = vadd.f32 %v1571_v58, %v1162_v57  ;;  %v7774_v2 = vld [vmem:[#allocation10_spill] sm:$0xff] }
 0x336   :  { %v4991_v50 = vmul.f32 -1.442695, %v1529_v63  ;;  %v1533_v23 = vpop.f32.mrb[11].mxu0  ;;  %v1574_v60 = vpop.f32.mrb[11].mxu1 }
 0x337   :  { %v4992_v24 = vmul.f32 -1.442695, %v1531_v55  ;;  %v4993_v28 = vmul.f32 -1.442695, %v1572_v53  ;;  %v7773_v55 = vld [vmem:[#allocation5_spill] sm:$0xff] }
 0x338   :  { %5757 = vpow2.f32 %v4991_v50 }
 0x339   :  { %5759 = vpow2.f32 %v4992_v24 }
 0x33a   :  { %5761 = vpow2.f32 %v4993_v28 }
 0x33b   :  { %5763 = vtanh.f32 %v1570_v62 }
 0x342   :  { %v5758_v51 = vpop.eup %5757 }
 0x343   :  { %v5760_v52 = vpop.eup %5759  ;;  %v1579_v3 = vadd.f32 1.0, %v5758_v51 }
 0x344   :  { %v1585_v61 = vadd.f32 1.0, %v5760_v52  ;;  %v5762_v23 = vpop.eup %5761  ;;  %v7776_v52 = vld [vmem:[#allocation13_spill] sm:$0xff] }
 0x345   :  { %5765 = vrcp.f32 %v1579_v3  ;;  %v5764_v60 = vpop.eup %5763  ;;  %v1592_v50 = vadd.f32 1.0, %v5762_v23  ;;  %v7777_v3 = vld [vmem:[#allocation8_spill] sm:$0xff]  ;;  %v7779_v23 = vld [vmem:[#allocation11_spill] sm:$0xff] }
 0x346   :  { %5767 = vrcp.f32 %v1585_v61  ;;  %v7778_v61 = vld [vmem:[#allocation14_spill] sm:$0xff] }
 0x347   :  { %5769 = vrcp.f32 %v1592_v50  ;;  %v7784_v50 = vld [vmem:[#allocation20_spill] sm:$0xff] }
 0x34f   :  { %v5766_v63 = vpop.eup %5765 }
 0x350   :  { %v5768_v45 = vpop.eup %5767  ;;  %v1597_v1 = vmul.f32 %v5766_v63, %v5764_v60  ;;  %v7780_v60 = vld [vmem:[#allocation17_spill] sm:$0xff]  ;;  %v7781_v63 = vld [vmem:[#allocation12_spill] sm:$0xff] }
 0x351   :  { %v1596_v24 = vmul.f32 %v5768_v45, %v6452_v47  ;;  %v5770_v26 = vpop.eup %5769  ;;  %v7772_v47 = vld [vmem:[#allocation9_spill] sm:$0xff]  ;;  %v7782_v45 = vld [vmem:[#allocation18_spill] sm:$0xff] }
 0x353   :  { %v6843_v57 = vadd.f32 %v1597_v1, %v1596_v24  ;;  %v7783_v1 = vld [vmem:[#allocation15_spill] sm:$0xff]  ;;  %v7785_v24 = vld [vmem:[#allocation16_spill] sm:$0xff] }
 0x355   :  { %5771 = vtanh.f32 %v6843_v57 }
 0x35f   :  { %v5772_v51 = vpop.eup %5771 }
 0x360   :  { %v1600_v28 = vmul.f32 %v5772_v51, %v5770_v26  ;;  %v7786_v26 = vld [vmem:[#allocation21_spill] sm:$0xff] }
 0x361   :  { %v7787_v51 = vld [vmem:[#allocation25_spill] sm:$0xff] }
 0x362   :  { %v1602_v62 = vpack.c.bf16 %v1600_v28, %v1600_v28  ;;  %4994 = vst [vmem:[%s7582_s3 + $0x10] sm:$0xff] %v1600_v28  ;;  %v7788_v28 = vld [vmem:[#allocation19_spill] sm:$0xff] }
 0x364   :  { %1603 = vst [vmem:[#allocation2 + $0x4] sm:$0xf] %v1602_v62  ;;  %v7789_v62 = vld [vmem:[#allocation22_spill] sm:$0xff] }
 0x36b   :  { %v1609_v53 = vld [vmem:[#allocation2] sm:$0xff] }
 0x36c   :  { %v4997_v58 = vcombine.high %v1609_v53, %v1609_v53  ;;  %v4996_v42 = vcombine.low %v1609_v53, %v1609_v53  ;;  %v7790_v53 = vld [vmem:[#allocation26_spill] sm:$0xff] }
 0x36e   :  { %2055 = vmatprep.mubr.bf16.mxu0 %v4997_v58  ;;  %2096 = vmatprep.mubr.bf16.mxu1 %v4997_v58  ;;  %v7791_v58 = vld [vmem:[#allocation27_spill] sm:$0xff] }
 0x36f   :  { %2056 = vmatmul.mubr.bf16.vlgmr.msra.gmra.mrb[12].mxu0 %v4996_v42  ;;  %2097 = vmatmul.mubr.bf16.vlgmr.msra.gmra.mrb[12].mxu1 %v4996_v42  ;;  %v7792_v42 = vld [vmem:[#allocation28_spill] sm:$0xff] }
 0x370   :  { %2553 = vmatpush1.bf16.msra.mxu0 %v6461_v0  ;;  %2594 = vmatpush1.bf16.msra.mxu1 %v6466_v4 }
 0x371   :  { %2554 = vmatprep.subr.bf16.mxu0 %v6473_v5  ;;  %2595 = vmatprep.subr.bf16.mxu1 %v6478_v7 }
 0x374   :  { %2555 = vmatpush1.bf16.msra.mxu0 %v6483_v8  ;;  %2596 = vmatpush1.bf16.msra.mxu1 %v6488_v9 }
 0x375   :  { %2556 = vmatprep.subr.bf16.mxu0 %v6497_v10  ;;  %2597 = vmatprep.subr.bf16.mxu1 %v6502_v11 }
 0x378   :  { %2557 = vmatpush1.bf16.msra.mxu0 %v6507_v12  ;;  %2598 = vmatpush1.bf16.msra.mxu1 %v6512_v13 }
 0x379   :  { %2558 = vmatprep.subr.bf16.mxu0 %v6521_v14  ;;  %2599 = vmatprep.subr.bf16.mxu1 %v6526_v15 }
 0x37c   :  { %2559 = vmatpush1.bf16.msra.mxu0 %v6531_v16  ;;  %2600 = vmatpush1.bf16.msra.mxu1 %v6536_v17 }
 0x37d   :  { %2560 = vmatprep.subr.bf16.mxu0 %v6545_v18  ;;  %2601 = vmatprep.subr.bf16.mxu1 %v6550_v19 }
 0x380   :  { %2561 = vmatpush1.bf16.msra.mxu0 %v6555_v20  ;;  %2602 = vmatpush1.bf16.msra.mxu1 %v6560_v21 }
 0x381   :  { %2562 = vmatprep.subr.bf16.mxu0 %v6569_v22  ;;  %2603 = vmatprep.subr.bf16.mxu1 %v6574_v25 }
 0x384   :  { %2563 = vmatpush1.bf16.msra.mxu0 %v6579_v27  ;;  %2604 = vmatpush1.bf16.msra.mxu1 %v6584_v29 }
 0x385   :  { %2564 = vmatprep.subr.bf16.mxu0 %v6593_v30  ;;  %2605 = vmatprep.subr.bf16.mxu1 %v6598_v31 }
 0x388   :  { %2565 = vmatpush1.bf16.msra.mxu0 %v6603_v32  ;;  %2606 = vmatpush1.bf16.msra.mxu1 %v6608_v33 }
 0x389   :  { %2566 = vmatprep.subr.bf16.mxu0 %v6617_v34  ;;  %2607 = vmatprep.subr.bf16.mxu1 %v6622_v35 }
 0x38c   :  { %2567 = vmatpush1.bf16.msra.mxu0 %v6627_v36  ;;  %2608 = vmatpush1.bf16.msra.mxu1 %v6632_v37 }
 0x38d   :  { %2568 = vmatprep.subr.bf16.mxu0 %v6641_v38  ;;  %2609 = vmatprep.subr.bf16.mxu1 %v6646_v39 }
 0x390   :  { %2569 = vmatpush1.bf16.msra.mxu0 %v6651_v40  ;;  %2610 = vmatpush1.bf16.msra.mxu1 %v6656_v41 }
 0x391   :  { %2570 = vmatprep.subr.bf16.mxu0 %v6665_v43  ;;  %2611 = vmatprep.subr.bf16.mxu1 %v6670_v44 }
 0x394   :  { %2571 = vmatpush1.bf16.msra.mxu0 %v6675_v46  ;;  %2612 = vmatpush1.bf16.msra.mxu1 %v6680_v48 }
 0x395   :  { %2572 = vmatprep.subr.bf16.mxu0 %v6689_v56  ;;  %2613 = vmatprep.subr.bf16.mxu1 %v6694_v59 }
 0x398   :  { %2573 = vmatpush1.bf16.msra.mxu0 %v7772_v47  ;;  %2614 = vmatpush1.bf16.msra.mxu1 %v7773_v55 }
 0x399   :  { %2574 = vmatprep.subr.bf16.mxu0 %v7774_v2  ;;  %2615 = vmatprep.subr.bf16.mxu1 %v7775_v49 }
 0x39c   :  { %2575 = vmatpush1.bf16.msra.mxu0 %v7776_v52  ;;  %2616 = vmatpush1.bf16.msra.mxu1 %v7777_v3 }
 0x39d   :  { %2576 = vmatprep.subr.bf16.mxu0 %v7778_v61  ;;  %2617 = vmatprep.subr.bf16.mxu1 %v7779_v23 }
 0x3a0   :  { %2577 = vmatpush1.bf16.msra.mxu0 %v7780_v60  ;;  %2618 = vmatpush1.bf16.msra.mxu1 %v7781_v63 }
 0x3a1   :  { %2578 = vmatprep.subr.bf16.mxu0 %v7782_v45  ;;  %2619 = vmatprep.subr.bf16.mxu1 %v7783_v1  ;;  %v7793_v45 = vld [vmem:[#allocation29_spill] sm:$0xff]  ;;  %v7794_v1 = vld [vmem:[#allocation6_spill] sm:$0xff] }
 0x3a4   :  { %2579 = vmatpush1.bf16.msra.mxu0 %v7784_v50  ;;  %2620 = vmatpush1.bf16.msra.mxu1 %v7785_v24  ;;  %v7795_v50 = vld [vmem:[#allocation4_spill] sm:$0xff] }
 0x3a5   :  { %2580 = vmatprep.subr.bf16.mxu0 %v7786_v26  ;;  %2621 = vmatprep.subr.bf16.mxu1 %v7787_v51  ;;  %v5066_v51 = vld [vmem:[%s7580_s0 + $0x10] sm:$0xf] }
 0x3a6   :  { %2137 = vst [vmem:[#allocation2] sm:$0xf] %v5066_v51 }
 0x3a8   :  { %2581 = vmatpush1.bf16.msra.mxu0 %v7788_v28  ;;  %2622 = vmatpush1.bf16.msra.mxu1 %v7789_v62  ;;  %v1674_v62 = vld [vmem:[%s7581_s2] sm:$0xf] }
 0x3a9   :  { %2582 = vmatprep.subr.bf16.mxu0 %v7790_v53  ;;  %2623 = vmatprep.subr.bf16.mxu1 %v7791_v58  ;;  %v7796_v53 = vld [vmem:[#allocation23_spill] sm:$0xff]  ;;  %v7797_v58 = vld [vmem:[#allocation24_spill] sm:$0xff]  ;;  %v1691_v49 = vrot.slane %v1674_v62, %v6355_v6 }
 0x3aa   :  { %v1679_v28 = vrot.slane %v1674_v62, %v7796_v53  ;;  %v1683_v26 = vrot.slane %v1674_v62, %v7797_v58  ;;  %v1687_v53 = vrot.slane %v1674_v62, %v6358_v54 }
 0x3ac   :  { %2583 = vmatpush1.bf16.msra.mxu0 %v7792_v42  ;;  %2624 = vmatpush1.bf16.msra.mxu1 %v7793_v45 }
 0x3ad   :  { %3081 = vmatprep.subr.bf16.mxu0 %v7794_v1  ;;  %3122 = vmatprep.subr.bf16.mxu1 %v7795_v50 }
 0x442   :  { %v2057_v42 = vpop.f32.mrb[12].mxu0  ;;  %v2098_v24 = vpop.f32.mrb[12].mxu1 }
 0x443   :  { %v2058_v45 = vadd.f32 %v2057_v42, %v1679_v28  ;;  %v2059_v63 = vpop.f32.mrb[13].mxu0  ;;  %v2100_v1 = vpop.f32.mrb[13].mxu1  ;;  %v2099_v55 = vadd.f32 %v2098_v24, %v1687_v53 }
 0x444   :  { %v2060_v60 = vadd.f32 %v2059_v63, %v1683_v26  ;;  %v2061_v50 = vpop.f32.mrb[14].mxu0  ;;  %v2102_v23 = vpop.f32.mrb[14].mxu1  ;;  %v2101_v2 = vadd.f32 %v2100_v1, %v1691_v49 }
 0x445   :  { %v5062_v61 = vmul.f32 -1.442695, %v2058_v45  ;;  %v2062_v3 = vpop.f32.mrb[15].mxu0  ;;  %v2103_v52 = vpop.f32.mrb[15].mxu1 }
 0x446   :  { %v5063_v51 = vmul.f32 -1.442695, %v2060_v60  ;;  %v5064_v58 = vmul.f32 -1.442695, %v2101_v2 }
 0x447   :  { %5773 = vpow2.f32 %v5062_v61 }
 0x448   :  { %5775 = vpow2.f32 %v5063_v51 }
 0x449   :  { %5777 = vpow2.f32 %v5064_v58 }
 0x44a   :  { %5779 = vtanh.f32 %v2099_v55 }
 0x451   :  { %v5774_v47 = vpop.eup %5773 }
 0x452   :  { %v5776_v28 = vpop.eup %5775  ;;  %v2108_v42 = vadd.f32 1.0, %v5774_v47 }
 0x453   :  { %v2114_v63 = vadd.f32 1.0, %v5776_v28  ;;  %v5778_v3 = vpop.eup %5777 }
 0x454   :  { %5781 = vrcp.f32 %v2108_v42  ;;  %v5780_v52 = vpop.eup %5779  ;;  %v2121_v61 = vadd.f32 1.0, %v5778_v3 }
 0x455   :  { %5783 = vrcp.f32 %v2114_v63 }
 0x456   :  { %5785 = vrcp.f32 %v2121_v61 }
 0x45e   :  { %v5782_v23 = vpop.eup %5781 }
 0x45f   :  { %v5784_v60 = vpop.eup %5783  ;;  %v2126_v45 = vmul.f32 %v5782_v23, %v5780_v52 }
 0x460   :  { %v2125_v49 = vmul.f32 %v5784_v60, %v6843_v57  ;;  %v5786_v2 = vpop.eup %5785 }
 0x462   :  { %v6924_v26 = vadd.f32 %v2126_v45, %v2125_v49 }
 0x464   :  { %5787 = vtanh.f32 %v6924_v26 }
 0x46e   :  { %v5788_v47 = vpop.eup %5787 }
 0x46f   :  { %v2129_v24 = vmul.f32 %v5788_v47, %v5786_v2 }
 0x471   :  { %v2131_v55 = vpack.c.bf16 %v2129_v24, %v2129_v24  ;;  %5065 = vst [vmem:[%s7582_s3 + $0x18] sm:$0xff] %v2129_v24 }
 0x473   :  { %2132 = vst [vmem:[#allocation2 + $0x4] sm:$0xf] %v2131_v55 }
 0x47a   :  { %v2138_v62 = vld [vmem:[#allocation2] sm:$0xff] }
 0x47b   :  { %v5068_v53 = vcombine.high %v2138_v62, %v2138_v62  ;;  %v5067_v58 = vcombine.low %v2138_v62, %v2138_v62 }
 0x47d   :  { %2584 = vmatprep.mubr.bf16.mxu0 %v5068_v53  ;;  %2625 = vmatprep.mubr.bf16.mxu1 %v5068_v53 }
 0x47e   :  { %2585 = vmatmul.mubr.bf16.vlgmr.msra.gmra.mrb[16].mxu0 %v5067_v58  ;;  %2626 = vmatmul.mubr.bf16.vlgmr.msra.gmra.mrb[16].mxu1 %v5067_v58 }
 0x47f   :  { %3082 = vmatpush1.bf16.msra.mxu0 %v6461_v0  ;;  %3123 = vmatpush1.bf16.msra.mxu1 %v6466_v4  ;;  %v7798_v0 = vld [vmem:[#allocation9_spill] sm:$0xff] }
 0x480   :  { %3083 = vmatprep.subr.bf16.mxu0 %v6473_v5  ;;  %3124 = vmatprep.subr.bf16.mxu1 %v6478_v7  ;;  %v7799_v4 = vld [vmem:[#allocation5_spill] sm:$0xff]  ;;  %v7800_v5 = vld [vmem:[#allocation10_spill] sm:$0xff]  ;;  %v7801_v7 = vld [vmem:[#allocation7_spill] sm:$0xff] }
 0x483   :  { %3084 = vmatpush1.bf16.msra.mxu0 %v6483_v8  ;;  %3125 = vmatpush1.bf16.msra.mxu1 %v6488_v9  ;;  %v7802_v8 = vld [vmem:[#allocation13_spill] sm:$0xff]  ;;  %v7803_v9 = vld [vmem:[#allocation8_spill] sm:$0xff] }
 0x484   :  { %3085 = vmatprep.subr.bf16.mxu0 %v6497_v10  ;;  %3126 = vmatprep.subr.bf16.mxu1 %v6502_v11  ;;  %v7804_v10 = vld [vmem:[#allocation14_spill] sm:$0xff]  ;;  %v7805_v11 = vld [vmem:[#allocation11_spill] sm:$0xff] }
 0x487   :  { %3086 = vmatpush1.bf16.msra.mxu0 %v6507_v12  ;;  %3127 = vmatpush1.bf16.msra.mxu1 %v6512_v13  ;;  %v7806_v12 = vld [vmem:[#allocation17_spill] sm:$0xff]  ;;  %v7807_v13 = vld [vmem:[#allocation12_spill] sm:$0xff] }
 0x488   :  { %3087 = vmatprep.subr.bf16.mxu0 %v6521_v14  ;;  %3128 = vmatprep.subr.bf16.mxu1 %v6526_v15  ;;  %v7808_v14 = vld [vmem:[#allocation18_spill] sm:$0xff]  ;;  %v7809_v15 = vld [vmem:[#allocation15_spill] sm:$0xff] }
 0x48b   :  { %3088 = vmatpush1.bf16.msra.mxu0 %v6531_v16  ;;  %3129 = vmatpush1.bf16.msra.mxu1 %v6536_v17  ;;  %v7810_v16 = vld [vmem:[#allocation20_spill] sm:$0xff] }
 0x48c   :  { %3089 = vmatprep.subr.bf16.mxu0 %v6545_v18  ;;  %3130 = vmatprep.subr.bf16.mxu1 %v6550_v19  ;;  %v7811_v17 = vld [vmem:[#allocation16_spill] sm:$0xff]  ;;  %v7812_v18 = vld [vmem:[#allocation21_spill] sm:$0xff] }
 0x48d   :  { %v7813_v19 = vld [vmem:[#allocation25_spill] sm:$0xff] }
 0x48f   :  { %3090 = vmatpush1.bf16.msra.mxu0 %v6555_v20  ;;  %3131 = vmatpush1.bf16.msra.mxu1 %v6560_v21  ;;  %v7814_v20 = vld [vmem:[#allocation19_spill] sm:$0xff]  ;;  %v7815_v21 = vld [vmem:[#allocation22_spill] sm:$0xff] }
 0x490   :  { %3091 = vmatprep.subr.bf16.mxu0 %v6569_v22  ;;  %3132 = vmatprep.subr.bf16.mxu1 %v6574_v25  ;;  %v7816_v22 = vld [vmem:[#allocation26_spill] sm:$0xff]  ;;  %v7817_v25 = vld [vmem:[#allocation27_spill] sm:$0xff] }
 0x493   :  { %3092 = vmatpush1.bf16.msra.mxu0 %v6579_v27  ;;  %3133 = vmatpush1.bf16.msra.mxu1 %v6584_v29  ;;  %v7818_v27 = vld [vmem:[#allocation28_spill] sm:$0xff]  ;;  %v7819_v29 = vld [vmem:[#allocation29_spill] sm:$0xff] }
 0x494   :  { %3093 = vmatprep.subr.bf16.mxu0 %v6593_v30  ;;  %3134 = vmatprep.subr.bf16.mxu1 %v6598_v31  ;;  %v5137_v30 = vld [vmem:[%s7580_s0 + $0x14] sm:$0xf] }
 0x495   :  { %2666 = vst [vmem:[#allocation2] sm:$0xf] %v5137_v30  ;;  %v6998_v31 = vld [vmem:[%s7579_s1 + $0x4] ss:$16 sps:$4 sm:$0xff]   ;;  %v7126_v30 = vld [vmem:[%s7579_s1 + $0x88] ss:$16 sps:$4 sm:$0xff]  }
 0x496   :  { %7820 = vst [vmem:[#allocation6_spill] sm:$0xff] %v6998_v31 }
 0x497   :  { %3094 = vmatpush1.bf16.msra.mxu0 %v6603_v32  ;;  %3135 = vmatpush1.bf16.msra.mxu1 %v6608_v33  ;;  %v7003_v32 = vld [vmem:[%s7579_s1 + $0xc] ss:$16 sps:$4 sm:$0xff]   ;;  %v2203_v33 = vld [vmem:[%s7581_s2] sm:$0xf] }
 0x498   :  { %3095 = vmatprep.subr.bf16.mxu0 %v6617_v34  ;;  %3136 = vmatprep.subr.bf16.mxu1 %v6622_v35  ;;  %7821 = vst [vmem:[#allocation4_spill] sm:$0xff] %v7003_v32  ;;  %v7822_v34 = vld [vmem:[#allocation23_spill] sm:$0xff]  ;;  %v2220_v50 = vrot.slane %v2203_v33, %v6355_v6  ;;  %v2216_v28 = vrot.slane %v2203_v33, %v6358_v54 }
 0x499   :  { %v2208_v35 = vrot.slane %v2203_v33, %v7822_v34 }
 0x49b   :  { %3096 = vmatpush1.bf16.msra.mxu0 %v6627_v36  ;;  %3137 = vmatpush1.bf16.msra.mxu1 %v6632_v37  ;;  %v7823_v36 = vld [vmem:[#allocation24_spill] sm:$0xff] }
 0x49c   :  { %3097 = vmatprep.subr.bf16.mxu0 %v6641_v38  ;;  %3138 = vmatprep.subr.bf16.mxu1 %v6646_v39  ;;  %v2212_v37 = vrot.slane %v2203_v33, %v7823_v36  ;;  %v7135_v33 = vld [vmem:[%s7579_s1 + $0xa4] ss:$16 sps:$4 sm:$0xff]  }
 0x49f   :  { %3098 = vmatpush1.bf16.msra.mxu0 %v6651_v40  ;;  %3139 = vmatpush1.bf16.msra.mxu1 %v6656_v41 }
 0x4a0   :  { %3099 = vmatprep.subr.bf16.mxu0 %v6665_v43  ;;  %3140 = vmatprep.subr.bf16.mxu1 %v6670_v44 }
 0x4a3   :  { %3100 = vmatpush1.bf16.msra.mxu0 %v6675_v46  ;;  %3141 = vmatpush1.bf16.msra.mxu1 %v6680_v48 }
 0x4a4   :  { %3101 = vmatprep.subr.bf16.mxu0 %v6689_v56  ;;  %3142 = vmatprep.subr.bf16.mxu1 %v6694_v59 }
 0x4a7   :  { %3102 = vmatpush1.bf16.msra.mxu0 %v7798_v0  ;;  %3143 = vmatpush1.bf16.msra.mxu1 %v7799_v4 }
 0x4a8   :  { %3103 = vmatprep.subr.bf16.mxu0 %v7800_v5  ;;  %3144 = vmatprep.subr.bf16.mxu1 %v7801_v7  ;;  %v5208_v5 = vld [vmem:[%s7580_s0 + $0x18] sm:$0xf] }
 0x4ab   :  { %3104 = vmatpush1.bf16.msra.mxu0 %v7802_v8  ;;  %3145 = vmatpush1.bf16.msra.mxu1 %v7803_v9  ;;  %v7027_v9 = vld [vmem:[%s7579_s1] ss:$16 sps:$4 sm:$0xff]  }
 0x4ac   :  { %3105 = vmatprep.subr.bf16.mxu0 %v7804_v10  ;;  %3146 = vmatprep.subr.bf16.mxu1 %v7805_v11  ;;  %v7032_v10 = vld [vmem:[%s7579_s1 + $0x8] ss:$16 sps:$4 sm:$0xff]   ;;  %v7039_v11 = vld [vmem:[%s7579_s1 + $0x24] ss:$16 sps:$4 sm:$0xff]  }
 0x4af   :  { %3106 = vmatpush1.bf16.msra.mxu0 %v7806_v12  ;;  %3147 = vmatpush1.bf16.msra.mxu1 %v7807_v13  ;;  %v7044_v12 = vld [vmem:[%s7579_s1 + $0x2c] ss:$16 sps:$4 sm:$0xff]   ;;  %v7049_v13 = vld [vmem:[%s7579_s1 + $0x20] ss:$16 sps:$4 sm:$0xff]  }
 0x4b0   :  { %3107 = vmatprep.subr.bf16.mxu0 %v7808_v14  ;;  %3148 = vmatprep.subr.bf16.mxu1 %v7809_v15  ;;  %v7054_v14 = vld [vmem:[%s7579_s1 + $0x28] ss:$16 sps:$4 sm:$0xff]   ;;  %v7063_v15 = vld [vmem:[%s7579_s1 + $0x44] ss:$16 sps:$4 sm:$0xff]  }
 0x4b3   :  { %3108 = vmatpush1.bf16.msra.mxu0 %v7810_v16  ;;  %3149 = vmatpush1.bf16.msra.mxu1 %v7811_v17  ;;  %v7068_v16 = vld [vmem:[%s7579_s1 + $0x4c] ss:$16 sps:$4 sm:$0xff]   ;;  %v7073_v17 = vld [vmem:[%s7579_s1 + $0x40] ss:$16 sps:$4 sm:$0xff]  }
 0x4b4   :  { %3109 = vmatprep.subr.bf16.mxu0 %v7812_v18  ;;  %3150 = vmatprep.subr.bf16.mxu1 %v7813_v19  ;;  %v7078_v18 = vld [vmem:[%s7579_s1 + $0x48] ss:$16 sps:$4 sm:$0xff]   ;;  %v7087_v19 = vld [vmem:[%s7579_s1 + $0x64] ss:$16 sps:$4 sm:$0xff]  }
 0x4b7   :  { %3110 = vmatpush1.bf16.msra.mxu0 %v7814_v20  ;;  %3151 = vmatpush1.bf16.msra.mxu1 %v7815_v21  ;;  %v7092_v20 = vld [vmem:[%s7579_s1 + $0x6c] ss:$16 sps:$4 sm:$0xff]   ;;  %v7097_v21 = vld [vmem:[%s7579_s1 + $0x60] ss:$16 sps:$4 sm:$0xff]  }
 0x4b8   :  { %3111 = vmatprep.subr.bf16.mxu0 %v7816_v22  ;;  %3152 = vmatprep.subr.bf16.mxu1 %v7817_v25  ;;  %v7102_v22 = vld [vmem:[%s7579_s1 + $0x68] ss:$16 sps:$4 sm:$0xff]   ;;  %v7111_v25 = vld [vmem:[%s7579_s1 + $0x84] ss:$16 sps:$4 sm:$0xff]  }
 0x4bb   :  { %3112 = vmatpush1.bf16.msra.mxu0 %v7818_v27  ;;  %3153 = vmatpush1.bf16.msra.mxu1 %v7819_v29  ;;  %v7116_v27 = vld [vmem:[%s7579_s1 + $0x8c] ss:$16 sps:$4 sm:$0xff]   ;;  %v7121_v29 = vld [vmem:[%s7579_s1 + $0x80] ss:$16 sps:$4 sm:$0xff]  }
 0x4bc   :  { %3610 = vmatprep.subr.bf16.mxu0 %v6998_v31  ;;  %3651 = vmatprep.subr.bf16.mxu1 %v7003_v32 }
 0x551   :  { %v2586_v38 = vpop.f32.mrb[16].mxu0  ;;  %v2627_v39 = vpop.f32.mrb[16].mxu1 }
 0x552   :  { %v2587_v40 = vadd.f32 %v2586_v38, %v2208_v35  ;;  %v2588_v41 = vpop.f32.mrb[17].mxu0  ;;  %v2629_v43 = vpop.f32.mrb[17].mxu1  ;;  %v2628_v63 = vadd.f32 %v2627_v39, %v2216_v28  ;;  %v7140_v35 = vld [vmem:[%s7579_s1 + $0xac] ss:$16 sps:$4 sm:$0xff]   ;;  %v7150_v38 = vld [vmem:[%s7579_s1 + $0xa8] ss:$16 sps:$4 sm:$0xff]  }
 0x553   :  { %v2589_v44 = vadd.f32 %v2588_v41, %v2212_v37  ;;  %v2590_v46 = vpop.f32.mrb[18].mxu0  ;;  %v2631_v48 = vpop.f32.mrb[18].mxu1  ;;  %v2630_v51 = vadd.f32 %v2629_v43, %v2220_v50  ;;  %v7145_v37 = vld [vmem:[%s7579_s1 + $0xa0] ss:$16 sps:$4 sm:$0xff]   ;;  %v7159_v39 = vld [vmem:[%s7579_s1 + $0xc4] ss:$16 sps:$4 sm:$0xff]  }
 0x554   :  { %v5133_v56 = vmul.f32 -1.442695, %v2587_v40  ;;  %v2591_v59 = vpop.f32.mrb[19].mxu0  ;;  %v2632_v57 = vpop.f32.mrb[19].mxu1  ;;  %v7164_v40 = vld [vmem:[%s7579_s1 + $0xcc] ss:$16 sps:$4 sm:$0xff]  }
 0x555   :  { %v5134_v1 = vmul.f32 -1.442695, %v2589_v44  ;;  %v5135_v42 = vmul.f32 -1.442695, %v2630_v51  ;;  %v7169_v41 = vld [vmem:[%s7579_s1 + $0xc0] ss:$16 sps:$4 sm:$0xff]  }
 0x556   :  { %5789 = vpow2.f32 %v5133_v56  ;;  %v7174_v43 = vld [vmem:[%s7579_s1 + $0xc8] ss:$16 sps:$4 sm:$0xff]   ;;  %v7183_v44 = vld [vmem:[%s7579_s1 + $0xe4] ss:$16 sps:$4 sm:$0xff]   ;;  %v7188_v46 = vld [vmem:[%s7579_s1 + $0xec] ss:$16 sps:$4 sm:$0xff]  }
 0x557   :  { %5791 = vpow2.f32 %v5134_v1  ;;  %v7193_v48 = vld [vmem:[%s7579_s1 + $0xe0] ss:$16 sps:$4 sm:$0xff]   ;;  %v7198_v56 = vld [vmem:[%s7579_s1 + $0xe8] ss:$16 sps:$4 sm:$0xff]   ;;  %v7207_v59 = vld [vmem:[%s7579_s1 + $0x104] ss:$16 sps:$4 sm:$0xff]  }
 0x558   :  { %5793 = vpow2.f32 %v5135_v42  ;;  %v7212_v57 = vld [vmem:[%s7579_s1 + $0x10c] ss:$16 sps:$4 sm:$0xff]   ;;  %v7217_v1 = vld [vmem:[%s7579_s1 + $0x100] ss:$16 sps:$4 sm:$0xff]   ;;  %v7222_v50 = vld [vmem:[%s7579_s1 + $0x108] ss:$16 sps:$4 sm:$0xff]  }
 0x559   :  { %5795 = vtanh.f32 %v2628_v63  ;;  %v7231_v51 = vld [vmem:[%s7579_s1 + $0x124] ss:$16 sps:$4 sm:$0xff]   ;;  %v7236_v28 = vld [vmem:[%s7579_s1 + $0x12c] ss:$16 sps:$4 sm:$0xff]   ;;  %v7241_v42 = vld [vmem:[%s7579_s1 + $0x120] ss:$16 sps:$4 sm:$0xff]  }
 0x55a   :  { %v7246_v63 = vld [vmem:[%s7579_s1 + $0x128] ss:$16 sps:$4 sm:$0xff]  }
 0x560   :  { %v5790_v3 = vpop.eup %5789 }
 0x561   :  { %v5792_v52 = vpop.eup %5791  ;;  %v2637_v23 = vadd.f32 1.0, %v5790_v3  ;;  %v7255_v3 = vld [vmem:[%s7579_s1 + $0x144] ss:$16 sps:$4 sm:$0xff]  }
 0x562   :  { %v2643_v60 = vadd.f32 1.0, %v5792_v52  ;;  %v5794_v45 = vpop.eup %5793  ;;  %v7260_v52 = vld [vmem:[%s7579_s1 + $0x14c] ss:$16 sps:$4 sm:$0xff]  }
 0x563   :  { %5797 = vrcp.f32 %v2637_v23  ;;  %v5796_v61 = vpop.eup %5795  ;;  %v2650_v24 = vadd.f32 1.0, %v5794_v45  ;;  %v7265_v23 = vld [vmem:[%s7579_s1 + $0x140] ss:$16 sps:$4 sm:$0xff]   ;;  %v7279_v45 = vld [vmem:[%s7579_s1 + $0x164] ss:$16 sps:$4 sm:$0xff]  }
 0x564   :  { %5799 = vrcp.f32 %v2643_v60  ;;  %7824 = vst [vmem:[#allocation9_spill] sm:$0xff] %v7265_v23  ;;  %v7270_v60 = vld [vmem:[%s7579_s1 + $0x148] ss:$16 sps:$4 sm:$0xff]   ;;  %7826 = vst [vmem:[#allocation10_spill] sm:$0xff] %v7279_v45 }
 0x565   :  { %5801 = vrcp.f32 %v2650_v24  ;;  %7825 = vst [vmem:[#allocation5_spill] sm:$0xff] %v7270_v60  ;;  %v7308_v24 = vld [vmem:[%s7579_s1 + $0x18c] ss:$16 sps:$4 sm:$0xff]  }
 0x566   :  { %7831 = vst [vmem:[#allocation11_spill] sm:$0xff] %v7308_v24 }
 0x56d   :  { %v5798_v49 = vpop.eup %5797 }
 0x56e   :  { %v5800_v2 = vpop.eup %5799  ;;  %v2655_v47 = vmul.f32 %v5798_v49, %v5796_v61  ;;  %v7284_v61 = vld [vmem:[%s7579_s1 + $0x16c] ss:$16 sps:$4 sm:$0xff]   ;;  %v7289_v49 = vld [vmem:[%s7579_s1 + $0x160] ss:$16 sps:$4 sm:$0xff]  }
 0x56f   :  { %v2654_v55 = vmul.f32 %v5800_v2, %v6924_v26  ;;  %v5802_v53 = vpop.eup %5801  ;;  %7827 = vst [vmem:[#allocation7_spill] sm:$0xff] %v7284_v61  ;;  %7828 = vst [vmem:[#allocation13_spill] sm:$0xff] %v7289_v49  ;;  %v7294_v2 = vld [vmem:[%s7579_s1 + $0x168] ss:$16 sps:$4 sm:$0xff]  }
 0x570   :  { %7829 = vst [vmem:[#allocation8_spill] sm:$0xff] %v7294_v2 }
 0x571   :  { %v7015_v62 = vadd.f32 %v2655_v47, %v2654_v55  ;;  %v7303_v47 = vld [vmem:[%s7579_s1 + $0x184] ss:$16 sps:$4 sm:$0xff]   ;;  %v7313_v55 = vld [vmem:[%s7579_s1 + $0x180] ss:$16 sps:$4 sm:$0xff]  }
 0x572   :  { %7830 = vst [vmem:[#allocation14_spill] sm:$0xff] %v7303_v47  ;;  %7832 = vst [vmem:[#allocation17_spill] sm:$0xff] %v7313_v55 }
 0x573   :  { %5803 = vtanh.f32 %v7015_v62 }
 0x57d   :  { %v5804_v58 = vpop.eup %5803 }
 0x57e   :  { %v2658_v0 = vmul.f32 %v5804_v58, %v5802_v53  ;;  %v7318_v53 = vld [vmem:[%s7579_s1 + $0x188] ss:$16 sps:$4 sm:$0xff]   ;;  %v7327_v58 = vld [vmem:[%s7579_s1 + $0x1a4] ss:$16 sps:$4 sm:$0xff]  }
 0x57f   :  { %7833 = vst [vmem:[#allocation12_spill] sm:$0xff] %v7318_v53  ;;  %7834 = vst [vmem:[#allocation18_spill] sm:$0xff] %v7327_v58 }
 0x580   :  { %v2660_v4 = vpack.c.bf16 %v2658_v0, %v2658_v0  ;;  %5136 = vst [vmem:[%s7582_s3 + $0x20] sm:$0xff] %v2658_v0  ;;  %v7332_v0 = vld [vmem:[%s7579_s1 + $0x1ac] ss:$16 sps:$4 sm:$0xff]  }
 0x581   :  { %7835 = vst [vmem:[#allocation15_spill] sm:$0xff] %v7332_v0 }
 0x582   :  { %2661 = vst [vmem:[#allocation2 + $0x4] sm:$0xf] %v2660_v4  ;;  %v7337_v4 = vld [vmem:[%s7579_s1 + $0x1a0] ss:$16 sps:$4 sm:$0xff]  }
 0x583   :  { %7836 = vst [vmem:[#allocation20_spill] sm:$0xff] %v7337_v4 }
 0x589   :  { %v2667_v7 = vld [vmem:[#allocation2] sm:$0xff] }
 0x58a   :  { %v5139_v26 = vcombine.high %v2667_v7, %v2667_v7  ;;  %3195 = vst [vmem:[#allocation2] sm:$0xf] %v5208_v5  ;;  %v5138_v8 = vcombine.low %v2667_v7, %v2667_v7  ;;  %v7342_v5 = vld [vmem:[%s7579_s1 + $0x1a8] ss:$16 sps:$4 sm:$0xff]   ;;  %v7349_v7 = vld [vmem:[%s7579_s1 + $0x1c4] ss:$16 sps:$4 sm:$0xff]  }
 0x58b   :  { %7837 = vst [vmem:[#allocation16_spill] sm:$0xff] %v7342_v5  ;;  %7838 = vst [vmem:[#allocation21_spill] sm:$0xff] %v7349_v7 }
 0x58c   :  { %3113 = vmatprep.mubr.bf16.mxu0 %v5139_v26  ;;  %3154 = vmatprep.mubr.bf16.mxu1 %v5139_v26  ;;  %v7356_v26 = vld [vmem:[%s7579_s1 + $0x1c0] ss:$16 sps:$4 sm:$0xff]  }
 0x58d   :  { %3114 = vmatmul.mubr.bf16.vlgmr.msra.gmra.mrb[20].mxu0 %v5138_v8  ;;  %3155 = vmatmul.mubr.bf16.vlgmr.msra.gmra.mrb[20].mxu1 %v5138_v8  ;;  %7839 = vst [vmem:[#allocation25_spill] sm:$0xff] %v7356_v26  ;;  %v7361_v8 = vld [vmem:[%s7579_s1 + $0x1c8] ss:$16 sps:$4 sm:$0xff]  }
 0x58e   :  { %3611 = vmatpush1.bf16.msra.mxu0 %v7027_v9  ;;  %3652 = vmatpush1.bf16.msra.mxu1 %v7032_v10  ;;  %7840 = vst [vmem:[#allocation19_spill] sm:$0xff] %v7361_v8 }
 0x58f   :  { %3612 = vmatprep.subr.bf16.mxu0 %v7039_v11  ;;  %3653 = vmatprep.subr.bf16.mxu1 %v7044_v12 }
 0x592   :  { %3613 = vmatpush1.bf16.msra.mxu0 %v7049_v13  ;;  %3654 = vmatpush1.bf16.msra.mxu1 %v7054_v14 }
 0x593   :  { %3614 = vmatprep.subr.bf16.mxu0 %v7063_v15  ;;  %3655 = vmatprep.subr.bf16.mxu1 %v7068_v16 }
 0x596   :  { %3615 = vmatpush1.bf16.msra.mxu0 %v7073_v17  ;;  %3656 = vmatpush1.bf16.msra.mxu1 %v7078_v18 }
 0x597   :  { %3616 = vmatprep.subr.bf16.mxu0 %v7087_v19  ;;  %3657 = vmatprep.subr.bf16.mxu1 %v7092_v20 }
 0x59a   :  { %3617 = vmatpush1.bf16.msra.mxu0 %v7097_v21  ;;  %3658 = vmatpush1.bf16.msra.mxu1 %v7102_v22 }
 0x59b   :  { %3618 = vmatprep.subr.bf16.mxu0 %v7111_v25  ;;  %3659 = vmatprep.subr.bf16.mxu1 %v7116_v27 }
 0x59e   :  { %3619 = vmatpush1.bf16.msra.mxu0 %v7121_v29  ;;  %3660 = vmatpush1.bf16.msra.mxu1 %v7126_v30 }
 0x59f   :  { %3620 = vmatprep.subr.bf16.mxu0 %v7135_v33  ;;  %3661 = vmatprep.subr.bf16.mxu1 %v7140_v35 }
 0x5a2   :  { %3621 = vmatpush1.bf16.msra.mxu0 %v7145_v37  ;;  %3662 = vmatpush1.bf16.msra.mxu1 %v7150_v38 }
 0x5a3   :  { %3622 = vmatprep.subr.bf16.mxu0 %v7159_v39  ;;  %3663 = vmatprep.subr.bf16.mxu1 %v7164_v40 }
 0x5a6   :  { %3623 = vmatpush1.bf16.msra.mxu0 %v7169_v41  ;;  %3664 = vmatpush1.bf16.msra.mxu1 %v7174_v43 }
 0x5a7   :  { %3624 = vmatprep.subr.bf16.mxu0 %v7183_v44  ;;  %3665 = vmatprep.subr.bf16.mxu1 %v7188_v46 }
 0x5aa   :  { %3625 = vmatpush1.bf16.msra.mxu0 %v7193_v48  ;;  %3666 = vmatpush1.bf16.msra.mxu1 %v7198_v56 }
 0x5ab   :  { %3626 = vmatprep.subr.bf16.mxu0 %v7207_v59  ;;  %3667 = vmatprep.subr.bf16.mxu1 %v7212_v57 }
 0x5ae   :  { %3627 = vmatpush1.bf16.msra.mxu0 %v7217_v1  ;;  %3668 = vmatpush1.bf16.msra.mxu1 %v7222_v50 }
 0x5af   :  { %3628 = vmatprep.subr.bf16.mxu0 %v7231_v51  ;;  %3669 = vmatprep.subr.bf16.mxu1 %v7236_v28 }
 0x5b2   :  { %3629 = vmatpush1.bf16.msra.mxu0 %v7241_v42  ;;  %3670 = vmatpush1.bf16.msra.mxu1 %v7246_v63 }
 0x5b3   :  { %3630 = vmatprep.subr.bf16.mxu0 %v7255_v3  ;;  %3671 = vmatprep.subr.bf16.mxu1 %v7260_v52 }
 0x5b6   :  { %3631 = vmatpush1.bf16.msra.mxu0 %v7265_v23  ;;  %3672 = vmatpush1.bf16.msra.mxu1 %v7270_v60 }
 0x5b7   :  { %3632 = vmatprep.subr.bf16.mxu0 %v7279_v45  ;;  %3673 = vmatprep.subr.bf16.mxu1 %v7284_v61 }
 0x5ba   :  { %3633 = vmatpush1.bf16.msra.mxu0 %v7289_v49  ;;  %3674 = vmatpush1.bf16.msra.mxu1 %v7294_v2 }
 0x5bb   :  { %3634 = vmatprep.subr.bf16.mxu0 %v7303_v47  ;;  %3675 = vmatprep.subr.bf16.mxu1 %v7308_v24 }
 0x5be   :  { %3635 = vmatpush1.bf16.msra.mxu0 %v7313_v55  ;;  %3676 = vmatpush1.bf16.msra.mxu1 %v7318_v53 }
 0x5bf   :  { %3636 = vmatprep.subr.bf16.mxu0 %v7327_v58  ;;  %3677 = vmatprep.subr.bf16.mxu1 %v7332_v0  ;;  %v7366_v0 = vld [vmem:[%s7579_s1 + $0x1cc] ss:$16 sps:$4 sm:$0xff]   ;;  %v7390_v58 = vld [vmem:[%s7579_s1 + $0x1e8] ss:$16 sps:$4 sm:$0xff]  }
 0x5c0   :  { %7841 = vst [vmem:[#allocation22_spill] sm:$0xff] %v7366_v0  ;;  %7845 = vst [vmem:[#allocation29_spill] sm:$0xff] %v7390_v58 }
 0x5c2   :  { %3637 = vmatpush1.bf16.msra.mxu0 %v7337_v4  ;;  %3678 = vmatpush1.bf16.msra.mxu1 %v7342_v5  ;;  %v7372_v5 = vld [vmem:[%s7579_s1 + $0x1e4] ss:$16 sps:$4 sm:$0xff]   ;;  %v7377_v4 = vld [vmem:[%s7579_s1 + $0x1ec] ss:$16 sps:$4 sm:$0xff]  }
 0x5c3   :  { %3638 = vmatprep.subr.bf16.mxu0 %v7349_v7  ;;  %7842 = vst [vmem:[#allocation26_spill] sm:$0xff] %v7372_v5  ;;  %7843 = vst [vmem:[#allocation27_spill] sm:$0xff] %v7377_v4  ;;  %3679 = vmatprep.subr.bf16.mxu1 %v7366_v0  ;;  %v7385_v7 = vld [vmem:[%s7579_s1 + $0x1e0] ss:$16 sps:$4 sm:$0xff]  }
 0x5c4   :  { %7844 = vst [vmem:[#allocation28_spill] sm:$0xff] %v7385_v7 }
 0x5c6   :  { %3639 = vmatpush1.bf16.msra.mxu0 %v7356_v26  ;;  %3680 = vmatpush1.bf16.msra.mxu1 %v7361_v8  ;;  %v2732_v8 = vld [vmem:[%s7581_s2] sm:$0xf] }
 0x5c7   :  { %3640 = vmatprep.subr.bf16.mxu0 %v7372_v5  ;;  %3681 = vmatprep.subr.bf16.mxu1 %v7377_v4  ;;  %v2737_v26 = vrot.slane %v2732_v8, %v7822_v34  ;;  %v2741_v0 = vrot.slane %v2732_v8, %v7823_v36  ;;  %v2749_v61 = vrot.slane %v2732_v8, %v6355_v6 }
 0x5c8   :  { %v2745_v34 = vrot.slane %v2732_v8, %v6358_v54  ;;  %v7848_v8 = vld [vmem:[#allocation10_spill] sm:$0xff] }
 0x5ca   :  { %3641 = vmatpush1.bf16.msra.mxu0 %v7385_v7  ;;  %3682 = vmatpush1.bf16.msra.mxu1 %v7390_v58 }
 0x5cb   :  { %4139 = vmatprep.subr.bf16.mxu0 %v6998_v31  ;;  %4180 = vmatprep.subr.bf16.mxu1 %v7003_v32 }
 0x660   :  { %v3115_v53 = vpop.f32.mrb[20].mxu0  ;;  %v3156_v5 = vpop.f32.mrb[20].mxu1 }
 0x661   :  { %v3116_v55 = vadd.f32 %v3115_v53, %v2737_v26  ;;  %v3117_v4 = vpop.f32.mrb[21].mxu0  ;;  %v3158_v24 = vpop.f32.mrb[21].mxu1  ;;  %v3157_v60 = vadd.f32 %v3156_v5, %v2745_v34  ;;  %v7846_v5 = vld [vmem:[#allocation9_spill] sm:$0xff] }
 0x662   :  { %v3118_v7 = vadd.f32 %v3117_v4, %v2741_v0  ;;  %v3119_v47 = vpop.f32.mrb[22].mxu0  ;;  %v3160_v58 = vpop.f32.mrb[22].mxu1  ;;  %v3159_v45 = vadd.f32 %v3158_v24, %v2749_v61 }
 0x663   :  { %v5204_v2 = vmul.f32 -1.442695, %v3116_v55  ;;  %v3120_v31 = vpop.f32.mrb[23].mxu0  ;;  %v3161_v49 = vpop.f32.mrb[23].mxu1 }
 0x664   :  { %v5205_v32 = vmul.f32 -1.442695, %v3118_v7  ;;  %v5206_v36 = vmul.f32 -1.442695, %v3159_v45  ;;  %v5279_v45 = vld [vmem:[%s7580_s0 + $0x1c] sm:$0xf] }
 0x665   :  { %5805 = vpow2.f32 %v5204_v2  ;;  %v7847_v7 = vld [vmem:[#allocation5_spill] sm:$0xff] }
 0x666   :  { %5807 = vpow2.f32 %v5205_v32 }
 0x667   :  { %5809 = vpow2.f32 %v5206_v36 }
 0x668   :  { %5811 = vtanh.f32 %v3157_v60 }
 0x66f   :  { %v5806_v23 = vpop.eup %5805 }
 0x670   :  { %v5808_v53 = vpop.eup %5807  ;;  %v3166_v26 = vadd.f32 1.0, %v5806_v23 }
 0x671   :  { %v3172_v47 = vadd.f32 1.0, %v5808_v53  ;;  %v5810_v31 = vpop.eup %5809  ;;  %v7849_v53 = vld [vmem:[#allocation7_spill] sm:$0xff] }
 0x672   :  { %5813 = vrcp.f32 %v3166_v26  ;;  %v5812_v49 = vpop.eup %5811  ;;  %v3179_v2 = vadd.f32 1.0, %v5810_v31  ;;  %v7850_v26 = vld [vmem:[#allocation13_spill] sm:$0xff]  ;;  %v7852_v31 = vld [vmem:[#allocation14_spill] sm:$0xff] }
 0x673   :  { %5815 = vrcp.f32 %v3172_v47  ;;  %v7851_v47 = vld [vmem:[#allocation8_spill] sm:$0xff] }
 0x674   :  { %5817 = vrcp.f32 %v3179_v2  ;;  %v7857_v2 = vld [vmem:[#allocation15_spill] sm:$0xff] }
 0x67c   :  { %v5814_v55 = vpop.eup %5813 }
 0x67d   :  { %v5816_v58 = vpop.eup %5815  ;;  %v3184_v0 = vmul.f32 %v5814_v55, %v5812_v49  ;;  %v7853_v49 = vld [vmem:[#allocation11_spill] sm:$0xff]  ;;  %v7854_v55 = vld [vmem:[#allocation17_spill] sm:$0xff] }
 0x67e   :  { %v3183_v32 = vmul.f32 %v5816_v58, %v7015_v62  ;;  %v5818_v34 = vpop.eup %5817  ;;  %v7855_v58 = vld [vmem:[#allocation12_spill] sm:$0xff] }
 0x680   :  { %v7406_v61 = vadd.f32 %v3184_v0, %v3183_v32  ;;  %v7856_v0 = vld [vmem:[#allocation18_spill] sm:$0xff]  ;;  %v7858_v32 = vld [vmem:[#allocation20_spill] sm:$0xff] }
 0x682   :  { %5819 = vtanh.f32 %v7406_v61 }
 0x68c   :  { %v5820_v23 = vpop.eup %5819 }
 0x68d   :  { %v3187_v36 = vmul.f32 %v5820_v23, %v5818_v34  ;;  %v7859_v34 = vld [vmem:[#allocation16_spill] sm:$0xff]  ;;  %v7860_v23 = vld [vmem:[#allocation21_spill] sm:$0xff] }
 0x68f   :  { %v3189_v60 = vpack.c.bf16 %v3187_v36, %v3187_v36  ;;  %5207 = vst [vmem:[%s7582_s3 + $0x28] sm:$0xff] %v3187_v36  ;;  %v7861_v36 = vld [vmem:[#allocation22_spill] sm:$0xff] }
 0x691   :  { %3190 = vst [vmem:[#allocation2 + $0x4] sm:$0xf] %v3189_v60  ;;  %v7862_v60 = vld [vmem:[#allocation25_spill] sm:$0xff] }
 0x698   :  { %v3196_v24 = vld [vmem:[#allocation2] sm:$0xff] }
 0x699   :  { %v5210_v62 = vcombine.high %v3196_v24, %v3196_v24  ;;  %3724 = vst [vmem:[#allocation2] sm:$0xf] %v5279_v45  ;;  %v5209_v4 = vcombine.low %v3196_v24, %v3196_v24  ;;  %v7863_v45 = vld [vmem:[#allocation19_spill] sm:$0xff]  ;;  %v7864_v24 = vld [vmem:[#allocation26_spill] sm:$0xff] }
 0x69b   :  { %3642 = vmatprep.mubr.bf16.mxu0 %v5210_v62  ;;  %3683 = vmatprep.mubr.bf16.mxu1 %v5210_v62  ;;  %v7865_v62 = vld [vmem:[#allocation27_spill] sm:$0xff] }
 0x69c   :  { %3643 = vmatmul.mubr.bf16.vlgmr.msra.gmra.mrb[24].mxu0 %v5209_v4  ;;  %3684 = vmatmul.mubr.bf16.vlgmr.msra.gmra.mrb[24].mxu1 %v5209_v4  ;;  %v7866_v4 = vld [vmem:[#allocation28_spill] sm:$0xff] }
 0x69d   :  { %4140 = vmatpush1.bf16.msra.mxu0 %v7027_v9  ;;  %4181 = vmatpush1.bf16.msra.mxu1 %v7032_v10 }
 0x69e   :  { %4141 = vmatprep.subr.bf16.mxu0 %v7039_v11  ;;  %4182 = vmatprep.subr.bf16.mxu1 %v7044_v12 }
 0x6a1   :  { %4142 = vmatpush1.bf16.msra.mxu0 %v7049_v13  ;;  %4183 = vmatpush1.bf16.msra.mxu1 %v7054_v14 }
 0x6a2   :  { %4143 = vmatprep.subr.bf16.mxu0 %v7063_v15  ;;  %4184 = vmatprep.subr.bf16.mxu1 %v7068_v16 }
 0x6a5   :  { %4144 = vmatpush1.bf16.msra.mxu0 %v7073_v17  ;;  %4185 = vmatpush1.bf16.msra.mxu1 %v7078_v18 }
 0x6a6   :  { %4145 = vmatprep.subr.bf16.mxu0 %v7087_v19  ;;  %4186 = vmatprep.subr.bf16.mxu1 %v7092_v20 }
 0x6a9   :  { %4146 = vmatpush1.bf16.msra.mxu0 %v7097_v21  ;;  %4187 = vmatpush1.bf16.msra.mxu1 %v7102_v22 }
 0x6aa   :  { %4147 = vmatprep.subr.bf16.mxu0 %v7111_v25  ;;  %4188 = vmatprep.subr.bf16.mxu1 %v7116_v27 }
 0x6ad   :  { %4148 = vmatpush1.bf16.msra.mxu0 %v7121_v29  ;;  %4189 = vmatpush1.bf16.msra.mxu1 %v7126_v30 }
 0x6ae   :  { %4149 = vmatprep.subr.bf16.mxu0 %v7135_v33  ;;  %4190 = vmatprep.subr.bf16.mxu1 %v7140_v35 }
 0x6b1   :  { %4150 = vmatpush1.bf16.msra.mxu0 %v7145_v37  ;;  %4191 = vmatpush1.bf16.msra.mxu1 %v7150_v38 }
 0x6b2   :  { %4151 = vmatprep.subr.bf16.mxu0 %v7159_v39  ;;  %4192 = vmatprep.subr.bf16.mxu1 %v7164_v40 }
 0x6b5   :  { %4152 = vmatpush1.bf16.msra.mxu0 %v7169_v41  ;;  %4193 = vmatpush1.bf16.msra.mxu1 %v7174_v43 }
 0x6b6   :  { %4153 = vmatprep.subr.bf16.mxu0 %v7183_v44  ;;  %4194 = vmatprep.subr.bf16.mxu1 %v7188_v46 }
 0x6b9   :  { %4154 = vmatpush1.bf16.msra.mxu0 %v7193_v48  ;;  %4195 = vmatpush1.bf16.msra.mxu1 %v7198_v56 }
 0x6ba   :  { %4155 = vmatprep.subr.bf16.mxu0 %v7207_v59  ;;  %4196 = vmatprep.subr.bf16.mxu1 %v7212_v57 }
 0x6bd   :  { %4156 = vmatpush1.bf16.msra.mxu0 %v7217_v1  ;;  %4197 = vmatpush1.bf16.msra.mxu1 %v7222_v50 }
 0x6be   :  { %4157 = vmatprep.subr.bf16.mxu0 %v7231_v51  ;;  %4198 = vmatprep.subr.bf16.mxu1 %v7236_v28 }
 0x6c1   :  { %4158 = vmatpush1.bf16.msra.mxu0 %v7241_v42  ;;  %4199 = vmatpush1.bf16.msra.mxu1 %v7246_v63 }
 0x6c2   :  { %4159 = vmatprep.subr.bf16.mxu0 %v7255_v3  ;;  %4200 = vmatprep.subr.bf16.mxu1 %v7260_v52 }
 0x6c5   :  { %4160 = vmatpush1.bf16.msra.mxu0 %v7846_v5  ;;  %4201 = vmatpush1.bf16.msra.mxu1 %v7847_v7 }
 0x6c6   :  { %4161 = vmatprep.subr.bf16.mxu0 %v7848_v8  ;;  %4202 = vmatprep.subr.bf16.mxu1 %v7849_v53 }
 0x6c9   :  { %4162 = vmatpush1.bf16.msra.mxu0 %v7850_v26  ;;  %4203 = vmatpush1.bf16.msra.mxu1 %v7851_v47 }
 0x6ca   :  { %4163 = vmatprep.subr.bf16.mxu0 %v7852_v31  ;;  %4204 = vmatprep.subr.bf16.mxu1 %v7853_v49 }
 0x6cd   :  { %4164 = vmatpush1.bf16.msra.mxu0 %v7854_v55  ;;  %4205 = vmatpush1.bf16.msra.mxu1 %v7855_v58 }
 0x6ce   :  { %4165 = vmatprep.subr.bf16.mxu0 %v7856_v0  ;;  %4206 = vmatprep.subr.bf16.mxu1 %v7857_v2  ;;  %v7867_v0 = vld [vmem:[#allocation29_spill] sm:$0xff]  ;;  %v7868_v2 = vld [vmem:[#allocation6_spill] sm:$0xff] }
 0x6d1   :  { %4166 = vmatpush1.bf16.msra.mxu0 %v7858_v32  ;;  %4207 = vmatpush1.bf16.msra.mxu1 %v7859_v34  ;;  %v7869_v32 = vld [vmem:[#allocation4_spill] sm:$0xff] }
 0x6d2   :  { %4167 = vmatprep.subr.bf16.mxu0 %v7860_v23  ;;  %4208 = vmatprep.subr.bf16.mxu1 %v7861_v36  ;;  %v3261_v36 = vld [vmem:[%s7581_s2] sm:$0xf]  ;;  %v7871_v34 = vld [vmem:[#allocation24_spill] sm:$0xff] }
 0x6d3   :  { %v7870_v23 = vld [vmem:[#allocation23_spill] sm:$0xff]  ;;  %v3278_v53 = vrot.slane %v3261_v36, %v6355_v6 }
 0x6d5   :  { %4168 = vmatpush1.bf16.msra.mxu0 %v7862_v60  ;;  %4209 = vmatpush1.bf16.msra.mxu1 %v7863_v45  ;;  %v3266_v60 = vrot.slane %v3261_v36, %v7870_v23  ;;  %v3270_v45 = vrot.slane %v3261_v36, %v7871_v34  ;;  %v3274_v23 = vrot.slane %v3261_v36, %v6358_v54 }
 0x6d6   :  { %4169 = vmatprep.subr.bf16.mxu0 %v7864_v24  ;;  %4210 = vmatprep.subr.bf16.mxu1 %v7865_v62 }
 0x6d9   :  { %4170 = vmatpush1.bf16.msra.mxu0 %v7866_v4  ;;  %4211 = vmatpush1.bf16.msra.mxu1 %v7867_v0 }
 0x6da   :  { %4668 = vmatprep.subr.bf16.mxu0 %v7868_v2  ;;  %4709 = vmatprep.subr.bf16.mxu1 %v7869_v32 }
 0x76f   :  { %v3644_v58 = vpop.f32.mrb[24].mxu0  ;;  %v3685_v24 = vpop.f32.mrb[24].mxu1 }
 0x770   :  { %v3645_v55 = vadd.f32 %v3644_v58, %v3266_v60  ;;  %v3646_v62 = vpop.f32.mrb[25].mxu0  ;;  %v3687_v49 = vpop.f32.mrb[25].mxu1  ;;  %v3686_v7 = vadd.f32 %v3685_v24, %v3274_v23  ;;  %v5350_v23 = vld [vmem:[%s7580_s0 + $0x20] sm:$0xf] }
 0x771   :  { %v3647_v4 = vadd.f32 %v3646_v62, %v3270_v45  ;;  %v3648_v31 = vpop.f32.mrb[26].mxu0  ;;  %v3689_v0 = vpop.f32.mrb[26].mxu1  ;;  %v3688_v8 = vadd.f32 %v3687_v49, %v3278_v53 }
 0x772   :  { %v5275_v47 = vmul.f32 -1.442695, %v3645_v55  ;;  %v3649_v2 = vpop.f32.mrb[27].mxu0  ;;  %v3690_v26 = vpop.f32.mrb[27].mxu1 }
 0x773   :  { %v5276_v32 = vmul.f32 -1.442695, %v3647_v4  ;;  %v5277_v34 = vmul.f32 -1.442695, %v3688_v8 }
 0x774   :  { %5821 = vpow2.f32 %v5275_v47 }
 0x775   :  { %5823 = vpow2.f32 %v5276_v32 }
 0x776   :  { %5825 = vpow2.f32 %v5277_v34 }
 0x777   :  { %5827 = vtanh.f32 %v3686_v7 }
 0x77e   :  { %v5822_v5 = vpop.eup %5821 }
 0x77f   :  { %v5824_v58 = vpop.eup %5823  ;;  %v3695_v60 = vadd.f32 1.0, %v5822_v5 }
 0x780   :  { %v3701_v31 = vadd.f32 1.0, %v5824_v58  ;;  %v5826_v55 = vpop.eup %5825 }
 0x781   :  { %5829 = vrcp.f32 %v3695_v60  ;;  %v5828_v26 = vpop.eup %5827  ;;  %v3708_v47 = vadd.f32 1.0, %v5826_v55 }
 0x782   :  { %5831 = vrcp.f32 %v3701_v31 }
 0x783   :  { %5833 = vrcp.f32 %v3708_v47 }
 0x78b   :  { %v5830_v0 = vpop.eup %5829 }
 0x78c   :  { %v5832_v45 = vpop.eup %5831  ;;  %v3713_v62 = vmul.f32 %v5830_v0, %v5828_v26 }
 0x78d   :  { %v3712_v53 = vmul.f32 %v5832_v45, %v7406_v61  ;;  %v5834_v8 = vpop.eup %5833 }
 0x78f   :  { %v7487_v49 = vadd.f32 %v3713_v62, %v3712_v53 }
 0x791   :  { %5835 = vtanh.f32 %v7487_v49 }
 0x79b   :  { %v5836_v5 = vpop.eup %5835 }
 0x79c   :  { %v3716_v34 = vmul.f32 %v5836_v5, %v5834_v8 }
 0x79e   :  { %v3718_v7 = vpack.c.bf16 %v3716_v34, %v3716_v34  ;;  %5278 = vst [vmem:[%s7582_s3 + $0x30] sm:$0xff] %v3716_v34 }
 0x7a0   :  { %3719 = vst [vmem:[#allocation2 + $0x4] sm:$0xf] %v3718_v7 }
 0x7a7   :  { %v3725_v36 = vld [vmem:[#allocation2] sm:$0xff] }
 0x7a8   :  { %v5281_v61 = vcombine.high %v3725_v36, %v3725_v36  ;;  %4253 = vst [vmem:[#allocation2] sm:$0xf] %v5350_v23  ;;  %v5280_v24 = vcombine.low %v3725_v36, %v3725_v36 }
 0x7aa   :  { %4171 = vmatprep.mubr.bf16.mxu0 %v5281_v61  ;;  %4212 = vmatprep.mubr.bf16.mxu1 %v5281_v61 }
 0x7ab   :  { %4172 = vmatmul.mubr.bf16.vlgmr.msra.gmra.mrb[28].mxu0 %v5280_v24  ;;  %4213 = vmatmul.mubr.bf16.vlgmr.msra.gmra.mrb[28].mxu1 %v5280_v24 }
 0x7ac   :  { %4669 = vmatpush1.bf16.msra.mxu0 %v7027_v9  ;;  %4710 = vmatpush1.bf16.msra.mxu1 %v7032_v10  ;;  %v7872_v9 = vld [vmem:[#allocation9_spill] sm:$0xff] }
 0x7ad   :  { %4670 = vmatprep.subr.bf16.mxu0 %v7039_v11  ;;  %4711 = vmatprep.subr.bf16.mxu1 %v7044_v12  ;;  %v7873_v10 = vld [vmem:[#allocation5_spill] sm:$0xff]  ;;  %v7874_v11 = vld [vmem:[#allocation10_spill] sm:$0xff]  ;;  %v7875_v12 = vld [vmem:[#allocation7_spill] sm:$0xff] }
 0x7b0   :  { %4671 = vmatpush1.bf16.msra.mxu0 %v7049_v13  ;;  %4712 = vmatpush1.bf16.msra.mxu1 %v7054_v14  ;;  %v7876_v13 = vld [vmem:[#allocation13_spill] sm:$0xff]  ;;  %v7877_v14 = vld [vmem:[#allocation8_spill] sm:$0xff] }
 0x7b1   :  { %4672 = vmatprep.subr.bf16.mxu0 %v7063_v15  ;;  %4713 = vmatprep.subr.bf16.mxu1 %v7068_v16  ;;  %v7878_v15 = vld [vmem:[#allocation14_spill] sm:$0xff]  ;;  %v7879_v16 = vld [vmem:[#allocation11_spill] sm:$0xff] }
 0x7b4   :  { %4673 = vmatpush1.bf16.msra.mxu0 %v7073_v17  ;;  %4714 = vmatpush1.bf16.msra.mxu1 %v7078_v18  ;;  %v7880_v17 = vld [vmem:[#allocation17_spill] sm:$0xff]  ;;  %v7881_v18 = vld [vmem:[#allocation12_spill] sm:$0xff] }
 0x7b5   :  { %4674 = vmatprep.subr.bf16.mxu0 %v7087_v19  ;;  %4715 = vmatprep.subr.bf16.mxu1 %v7092_v20  ;;  %v7882_v19 = vld [vmem:[#allocation18_spill] sm:$0xff]  ;;  %v7883_v20 = vld [vmem:[#allocation15_spill] sm:$0xff] }
 0x7b8   :  { %4675 = vmatpush1.bf16.msra.mxu0 %v7097_v21  ;;  %4716 = vmatpush1.bf16.msra.mxu1 %v7102_v22  ;;  %v7884_v21 = vld [vmem:[#allocation20_spill] sm:$0xff] }
 0x7b9   :  { %4676 = vmatprep.subr.bf16.mxu0 %v7111_v25  ;;  %4717 = vmatprep.subr.bf16.mxu1 %v7116_v27  ;;  %v7885_v22 = vld [vmem:[#allocation16_spill] sm:$0xff]  ;;  %v7886_v25 = vld [vmem:[#allocation21_spill] sm:$0xff]  ;;  %v7887_v27 = vld [vmem:[#allocation22_spill] sm:$0xff] }
 0x7bc   :  { %4677 = vmatpush1.bf16.msra.mxu0 %v7121_v29  ;;  %4718 = vmatpush1.bf16.msra.mxu1 %v7126_v30  ;;  %v7888_v29 = vld [vmem:[#allocation25_spill] sm:$0xff]  ;;  %v7889_v30 = vld [vmem:[#allocation19_spill] sm:$0xff] }
 0x7bd   :  { %4678 = vmatprep.subr.bf16.mxu0 %v7135_v33  ;;  %4719 = vmatprep.subr.bf16.mxu1 %v7140_v35  ;;  %v7890_v33 = vld [vmem:[#allocation26_spill] sm:$0xff]  ;;  %v7891_v35 = vld [vmem:[#allocation27_spill] sm:$0xff] }
 0x7c0   :  { %4679 = vmatpush1.bf16.msra.mxu0 %v7145_v37  ;;  %4720 = vmatpush1.bf16.msra.mxu1 %v7150_v38  ;;  %v7892_v37 = vld [vmem:[#allocation28_spill] sm:$0xff]  ;;  %v7893_v38 = vld [vmem:[#allocation29_spill] sm:$0xff] }
 0x7c1   :  { %4680 = vmatprep.subr.bf16.mxu0 %v7159_v39  ;;  %4721 = vmatprep.subr.bf16.mxu1 %v7164_v40  ;;  %v3790_v39 = vld [vmem:[%s7581_s2] sm:$0xf] }
 0x7c2   :  { %v7894_v40 = vld [vmem:[#allocation23_spill] sm:$0xff]  ;;  %v3803_v2 = vrot.slane %v3790_v39, %v6358_v54 }
 0x7c4   :  { %4681 = vmatpush1.bf16.msra.mxu0 %v7169_v41  ;;  %4722 = vmatpush1.bf16.msra.mxu1 %v7174_v43  ;;  %v3795_v41 = vrot.slane %v3790_v39, %v7894_v40  ;;  %v7895_v43 = vld [vmem:[#allocation24_spill] sm:$0xff] }
 0x7c5   :  { %4682 = vmatprep.subr.bf16.mxu0 %v7183_v44  ;;  %4723 = vmatprep.subr.bf16.mxu1 %v7188_v46  ;;  %v3799_v44 = vrot.slane %v3790_v39, %v7895_v43 }
 0x7c8   :  { %4683 = vmatpush1.bf16.msra.mxu0 %v7193_v48  ;;  %4724 = vmatpush1.bf16.msra.mxu1 %v7198_v56 }
 0x7c9   :  { %4684 = vmatprep.subr.bf16.mxu0 %v7207_v59  ;;  %4725 = vmatprep.subr.bf16.mxu1 %v7212_v57 }
 0x7cc   :  { %4685 = vmatpush1.bf16.msra.mxu0 %v7217_v1  ;;  %4726 = vmatpush1.bf16.msra.mxu1 %v7222_v50 }
 0x7cd   :  { %4686 = vmatprep.subr.bf16.mxu0 %v7231_v51  ;;  %4727 = vmatprep.subr.bf16.mxu1 %v7236_v28 }
 0x7d0   :  { %4687 = vmatpush1.bf16.msra.mxu0 %v7241_v42  ;;  %4728 = vmatpush1.bf16.msra.mxu1 %v7246_v63 }
 0x7d1   :  { %4688 = vmatprep.subr.bf16.mxu0 %v7255_v3  ;;  %4729 = vmatprep.subr.bf16.mxu1 %v7260_v52  ;;  %v3807_v52 = vrot.slane %v3790_v39, %v6355_v6 }
 0x7d4   :  { %4689 = vmatpush1.bf16.msra.mxu0 %v7872_v9  ;;  %4730 = vmatpush1.bf16.msra.mxu1 %v7873_v10 }
 0x7d5   :  { %4690 = vmatprep.subr.bf16.mxu0 %v7874_v11  ;;  %4731 = vmatprep.subr.bf16.mxu1 %v7875_v12 }
 0x7d8   :  { %4691 = vmatpush1.bf16.msra.mxu0 %v7876_v13  ;;  %4732 = vmatpush1.bf16.msra.mxu1 %v7877_v14 }
 0x7d9   :  { %4692 = vmatprep.subr.bf16.mxu0 %v7878_v15  ;;  %4733 = vmatprep.subr.bf16.mxu1 %v7879_v16 }
 0x7dc   :  { %4693 = vmatpush1.bf16.msra.mxu0 %v7880_v17  ;;  %4734 = vmatpush1.bf16.msra.mxu1 %v7881_v18 }
 0x7dd   :  { %4694 = vmatprep.subr.bf16.mxu0 %v7882_v19  ;;  %4735 = vmatprep.subr.bf16.mxu1 %v7883_v20 }
 0x7e0   :  { %4695 = vmatpush1.bf16.msra.mxu0 %v7884_v21  ;;  %4736 = vmatpush1.bf16.msra.mxu1 %v7885_v22 }
 0x7e1   :  { %4696 = vmatprep.subr.bf16.mxu0 %v7886_v25  ;;  %4737 = vmatprep.subr.bf16.mxu1 %v7887_v27 }
 0x7e4   :  { %4697 = vmatpush1.bf16.msra.mxu0 %v7888_v29  ;;  %4738 = vmatpush1.bf16.msra.mxu1 %v7889_v30 }
 0x7e5   :  { %4698 = vmatprep.subr.bf16.mxu0 %v7890_v33  ;;  %4739 = vmatprep.subr.bf16.mxu1 %v7891_v35 }
 0x7e8   :  { %4699 = vmatpush1.bf16.msra.mxu0 %v7892_v37  ;;  %4740 = vmatpush1.bf16.msra.mxu1 %v7893_v38 }
 0x87e   :  { %v4173_v46 = vpop.f32.mrb[28].mxu0  ;;  %v4214_v48 = vpop.f32.mrb[28].mxu1 }
 0x87f   :  { %v4174_v56 = vadd.f32 %v4173_v46, %v3795_v41  ;;  %v4175_v59 = vpop.f32.mrb[29].mxu0  ;;  %v4216_v57 = vpop.f32.mrb[29].mxu1  ;;  %v4215_v58 = vadd.f32 %v4214_v48, %v3803_v2 }
 0x880   :  { %v4176_v1 = vadd.f32 %v4175_v59, %v3799_v44  ;;  %v4177_v50 = vpop.f32.mrb[30].mxu0  ;;  %v4218_v51 = vpop.f32.mrb[30].mxu1  ;;  %v4217_v4 = vadd.f32 %v4216_v57, %v3807_v52 }
 0x881   :  { %v5346_v28 = vmul.f32 -1.442695, %v4174_v56  ;;  %v4178_v42 = vpop.f32.mrb[31].mxu0  ;;  %v4219_v63 = vpop.f32.mrb[31].mxu1 }
 0x882   :  { %v5347_v3 = vmul.f32 -1.442695, %v4176_v1  ;;  %v5348_v32 = vmul.f32 -1.442695, %v4217_v4 }
 0x883   :  { %5837 = vpow2.f32 %v5346_v28 }
 0x884   :  { %5839 = vpow2.f32 %v5347_v3 }
 0x885   :  { %5841 = vpow2.f32 %v5348_v32 }
 0x886   :  { %5843 = vtanh.f32 %v4215_v58 }
 0x88d   :  { %v5838_v60 = vpop.eup %5837 }
 0x88e   :  { %v5840_v31 = vpop.eup %5839  ;;  %v4224_v55 = vadd.f32 1.0, %v5838_v60 }
 0x88f   :  { %v4230_v26 = vadd.f32 1.0, %v5840_v31  ;;  %v5842_v0 = vpop.eup %5841 }
 0x890   :  { %5845 = vrcp.f32 %v4224_v55  ;;  %v5844_v45 = vpop.eup %5843  ;;  %v4237_v8 = vadd.f32 1.0, %v5842_v0 }
 0x891   :  { %5847 = vrcp.f32 %v4230_v26 }
 0x892   :  { %5849 = vrcp.f32 %v4237_v8 }
 0x89a   :  { %v5846_v62 = vpop.eup %5845 }
 0x89b   :  { %v5848_v47 = vpop.eup %5847  ;;  %v4242_v53 = vmul.f32 %v5846_v62, %v5844_v45 }
 0x89c   :  { %v4241_v5 = vmul.f32 %v5848_v47, %v7487_v49  ;;  %v5850_v7 = vpop.eup %5849  ;;  %v4319_v49 = vld [vmem:[%s7581_s2] sm:$0xf] }
 0x89d   :  { %v4324_v11 = vrot.slane %v4319_v49, %v7894_v40  ;;  %v4328_v12 = vrot.slane %v4319_v49, %v7895_v43  ;;  %v4336_v29 = vrot.slane %v4319_v49, %v6355_v6  ;;  %v4332_v33 = vrot.slane %v4319_v49, %v6358_v54 }
 0x89e   :  { %v4243_v34 = vadd.f32 %v4242_v53, %v4241_v5 }
 0x8a0   :  { %5851 = vtanh.f32 %v4243_v34 }
 0x8aa   :  { %v5852_v23 = vpop.eup %5851 }
 0x8ab   :  { %v4245_v36 = vmul.f32 %v5852_v23, %v5850_v7 }
 0x8ad   :  { %v4247_v61 = vpack.c.bf16 %v4245_v36, %v4245_v36  ;;  %5349 = vst [vmem:[%s7582_s3 + $0x38] sm:$0xff] %v4245_v36 }
 0x8af   :  { %4248 = vst [vmem:[#allocation2 + $0x4] sm:$0xf] %v4247_v61 }
 0x8b6   :  { %v4254_v24 = vld [vmem:[#allocation2] sm:$0xff] }
 0x8b7   :  { %v5352_v9 = vcombine.high %v4254_v24, %v4254_v24  ;;  %v5351_v10 = vcombine.low %v4254_v24, %v4254_v24 }
 0x8b9   :  { %4700 = vmatprep.mubr.bf16.mxu0 %v5352_v9  ;;  %4741 = vmatprep.mubr.bf16.mxu1 %v5352_v9 }
 0x8ba   :  { %4701 = vmatmul.mubr.bf16.vlgmr.msra.gmra.mrb[32].mxu0 %v5351_v10  ;;  %4742 = vmatmul.mubr.bf16.vlgmr.msra.gmra.mrb[32].mxu1 %v5351_v10 }
 0x98d   :  { %v4702_v13 = vpop.f32.mrb[32].mxu0  ;;  %v4743_v14 = vpop.f32.mrb[32].mxu1 }
 0x98e   :  { %v4703_v15 = vadd.f32 %v4702_v13, %v4324_v11  ;;  %v4704_v16 = vpop.f32.mrb[33].mxu0  ;;  %v4745_v17 = vpop.f32.mrb[33].mxu1  ;;  %v4744_v37 = vadd.f32 %v4743_v14, %v4332_v33 }
 0x98f   :  { %v4705_v18 = vadd.f32 %v4704_v16, %v4328_v12  ;;  %v4706_v19 = vpop.f32.mrb[34].mxu0  ;;  %v4747_v20 = vpop.f32.mrb[34].mxu1  ;;  %v4746_v30 = vadd.f32 %v4745_v17, %v4336_v29 }
 0x990   :  { %v5417_v21 = vmul.f32 -1.442695, %v4703_v15  ;;  %v4707_v22 = vpop.f32.mrb[35].mxu0  ;;  %v4748_v25 = vpop.f32.mrb[35].mxu1 }
 0x991   :  { %v5418_v27 = vmul.f32 -1.442695, %v4705_v18  ;;  %v5419_v35 = vmul.f32 -1.442695, %v4746_v30 }
 0x992   :  { %5853 = vpow2.f32 %v5417_v21 }
 0x993   :  { %5855 = vpow2.f32 %v5418_v27 }
 0x994   :  { %5857 = vpow2.f32 %v5419_v35 }
 0x995   :  { %5859 = vtanh.f32 %v4744_v37 }
 0x99c   :  { %v5854_v38 = vpop.eup %5853 }
 0x99d   :  { %v5856_v39 = vpop.eup %5855  ;;  %v4753_v40 = vadd.f32 1.0, %v5854_v38 }
 0x99e   :  { %v4759_v41 = vadd.f32 1.0, %v5856_v39  ;;  %v5858_v43 = vpop.eup %5857 }
 0x99f   :  { %5861 = vrcp.f32 %v4753_v40  ;;  %v5860_v44 = vpop.eup %5859  ;;  %v4766_v56 = vadd.f32 1.0, %v5858_v43 }
 0x9a0   :  { %5863 = vrcp.f32 %v4759_v41 }
 0x9a1   :  { %5865 = vrcp.f32 %v4766_v56 }
 0x9a9   :  { %v5862_v46 = vpop.eup %5861 }
 0x9aa   :  { %v5864_v48 = vpop.eup %5863  ;;  %v4771_v6 = vmul.f32 %v5862_v46, %v5860_v44 }
 0x9ab   :  { %v4770_v59 = vmul.f32 %v5864_v48, %v4243_v34  ;;  %v5866_v54 = vpop.eup %5865 }
 0x9ad   :  { %v4772_v57 = vadd.f32 %v4771_v6, %v4770_v59 }
 0x9af   :  { %5867 = vtanh.f32 %v4772_v57 }
 0x9b9   :  { %v5868_v1 = vpop.eup %5867 }
 0x9ba   :  { %v4774_v50 = vmul.f32 %v5868_v1, %v5866_v54 }
 0x9bc   :  { %v4776_v51 = vpack.c.bf16 %v4774_v50, %v4774_v50  ;;  %5420 = vst [vmem:[%s7582_s3 + $0x40] sm:$0xff] %v4774_v50 }
 0x9be   :  { %4777 = vst [vmem:[#allocation2 + $0x4] sm:$0xf] %v4776_v51 }

</bundles_post_ra>
